<compile_context>
chip_gen: v6e
topology: v6e:2x2x1
jax: 0.10.0
libtpu: 0.0.40
codegen_flags: <defaults>
</compile_context>

<pallas_src>
import functools
import numpy as np

import jax
import jax.numpy as jnp
from jax.experimental import pallas as pl
from jax.experimental.pallas import tpu as pltpu


# ----------------------------- in-kernel helpers -----------------------------

def _gelu(x):
    # TODO(synk): PyTorch nn.GELU default is erf-based; tanh approximation used here.
    return jax.nn.gelu(x, approximate=True)


def _silu(x):
    return x * jax.nn.sigmoid(x)


def _ln(x, g, b, eps):
    mu = jnp.mean(x, axis=-1, keepdims=True)
    xc = x - mu
    var = jnp.mean(xc * xc, axis=-1, keepdims=True)
    return xc * jax.lax.rsqrt(var + eps) * g + b


# ----------------------------- single fused kernel -----------------------------

def _fused_kernel(length_ref,
                  z_ref, ca_ref, im_ref, win_ref, cos_ref, sina_ref, sinb_ref,
                  w_obs1_ref, b_obs1_ref, w_obs2_ref, b_obs2_ref,
                  w_ca1_ref, b_ca1_ref, w_ca2_ref, b_ca2_ref,
                  im_g_ref, im_b_ref, w_im_ref, b_im_ref,
                  ln1g_ref, ln1b_ref, wq_ref, bq_ref, wk_ref, bk_ref,
                  wv_ref, bv_ref, wp_ref, bp_ref,
                  ln2g_ref, ln2b_ref, wf1_ref, bf1_ref, wf2_ref, bf2_ref,
                  wh1_ref, bh1_ref, wh2_ref, bh2_ref,
                  xout_ref, hout_ref,
                  *, num_layers, num_heads, head_dim, eps):
    f32, bf16 = jnp.float32, jnp.bfloat16
    L = z_ref.shape[1]
    D = xout_ref.shape[2]
    half = head_dim // 2
    b = pl.program_id(0)

    # ---- prologue: noisy-obs embedding (per-joint linear + learned-pos select folded
    #      into one matmul at init), cliffcam+angvel embedders (fused block-diagonal),
    #      imgseq LN + linear, residual adds -------------------------------------------------
    z = z_ref[0].astype(bf16)                                          # (L, ZK)
    h = _gelu(jnp.dot(z, w_obs1_ref[...], preferred_element_type=f32) + b_obs1_ref[...])
    x = jnp.dot(h.astype(bf16), w_obs2_ref[...], preferred_element_type=f32) + b_obs2_ref[...]

    ca = ca_ref[0].astype(bf16)                                        # (L, CA)
    hc = _silu(jnp.dot(ca, w_ca1_ref[...], preferred_element_type=f32) + b_ca1_ref[...])
    x = x + jnp.dot(hc.astype(bf16), w_ca2_ref[...], preferred_element_type=f32) + b_ca2_ref[...]

    im = _ln(im_ref[0].astype(f32), im_g_ref[...], im_b_ref[...], eps)
    x = x + jnp.dot(im.astype(bf16), w_im_ref[...], preferred_element_type=f32) + b_im_ref[...]

    # ---- attention bias built in-kernel from the scalar-prefetched length (no (B,L,L)
    #      DMA); static local-window mask (L > max_len) is a shared (L,L) constant -----------
    key_idx = jax.lax.broadcasted_iota(jnp.int32, (L, L), 1)
    bias = jnp.where(key_idx < length_ref[b], 0.0, -1e9).astype(f32) + win_ref[...]

    cos = cos_ref[...]
    sin_a = sina_ref[...]
    sin_b = sinb_ref[...]

    def rope(t):
        # per-head rotate-half via two full-width XLU lane rolls; sign + head
        # boundaries are baked into the precomputed sin_a / sin_b tables.
        return (t * cos
                + pltpu.roll(t, shift=D - half, axis=1) * sin_a
                + pltpu.roll(t, shift=half, axis=1) * sin_b)

    # ---- transformer blocks: unrolled over layers, all weights VMEM-resident ---------------
    for l in range(num_layers):
        h1 = _ln(x, ln1g_ref[l], ln1b_ref[l], eps).astype(bf16)
        q = jnp.dot(h1, wq_ref[l], preferred_element_type=f32) + bq_ref[l]   # 1/sqrt(Dh) folded
        k = jnp.dot(h1, wk_ref[l], preferred_element_type=f32) + bk_ref[l]
        qr = rope(q).astype(bf16)
        kr = rope(k).astype(bf16)
        v = (jnp.dot(h1, wv_ref[l], preferred_element_type=f32) + bv_ref[l]).astype(bf16)
        wp_l = wp_ref[l]                                               # (D, D) bf16

        attn = jnp.zeros((L, D), f32)
        for hh in range(num_heads):
            sl = slice(hh * head_dim, (hh + 1) * head_dim)
            s = jax.lax.dot_general(qr[:, sl], kr[:, sl], (((1,), (1,)), ((), ())),
                                    preferred_element_type=f32)        # (L, L)
            s = s + bias
            m = jnp.max(s, axis=-1, keepdims=True)
            p = jnp.exp(s - m)
            p = p * pl.reciprocal(jnp.sum(p, axis=-1, keepdims=True), approx=True)
            hv = jnp.dot(p.astype(bf16), v[:, sl], preferred_element_type=f32)   # (L, Dh)
            # fold the per-head output straight into the lane-dense (128-wide) proj matmul
            attn = attn + jnp.dot(hv.astype(bf16), wp_l[sl, :], preferred_element_type=f32)
        x = x + attn + bp_ref[l]

        h2 = _ln(x, ln2g_ref[l], ln2b_ref[l], eps).astype(bf16)
        mm = _gelu(jnp.dot(h2, wf1_ref[l], preferred_element_type=f32) + bf1_ref[l])
        x = x + jnp.dot(mm.astype(bf16), wf2_ref[l], preferred_element_type=f32) + bf2_ref[l]

    xout_ref[0] = x.astype(xout_ref.dtype)

    # ---- fused output heads: concatenated fc1, block-diagonal fc2, lane-padded output ------
    hh1 = _gelu(jnp.dot(x.astype(bf16), wh1_ref[...], preferred_element_type=f32) + bh1_ref[...])
    hout_ref[0] = (jnp.dot(hh1.astype(bf16), wh2_ref[...], preferred_element_type=f32)
                   + bh2_ref[...]).astype(hout_ref.dtype)


def _fused_call(fp, cfg, length_i32, z, ca, im, win, cos_t, sin_a, sin_b):
    B, L, ZK = z.shape
    D = cfg["latent_dim"]
    H = cfg["num_heads"]
    Dh = D // H
    NL = cfg["num_layers"]
    hid = int(D * cfg["mlp_ratio"])
    CA = ca.shape[-1]
    CI = im.shape[-1]
    NH = fp["w_h2"].shape[1]

    kern = functools.partial(_fused_kernel, num_layers=NL, num_heads=H,
                             head_dim=Dh, eps=1e-5)

    per_b = lambda b, ln: (b, 0, 0)
    c2 = lambda b, ln: (0, 0)
    c3 = lambda b, ln: (0, 0, 0)

    in_specs = [
        pl.BlockSpec((1, L, ZK), per_b),                                   # z features
        pl.BlockSpec((1, L, CA), per_b),                                   # cliffcam|angvel
        pl.BlockSpec((1, L, CI), per_b),                                   # imgseq
        pl.BlockSpec((L, L), c2),                                          # static window bias
        pl.BlockSpec((L, D), c2),                                          # cos
        pl.BlockSpec((L, D), c2),                                          # sin_a
        pl.BlockSpec((L, D), c2),                                          # sin_b
        pl.BlockSpec((ZK, 2 * D), c2), pl.BlockSpec((1, 2 * D), c2),       # obs fc1 (folded)
        pl.BlockSpec((2 * D, D), c2), pl.BlockSpec((1, D), c2),            # obs fc2
        pl.BlockSpec((CA, 2 * D), c2), pl.BlockSpec((1, 2 * D), c2),       # cliff+angvel fc1
        pl.BlockSpec((2 * D, D), c2), pl.BlockSpec((1, D), c2),            # cliff+angvel fc2
        pl.BlockSpec((1, CI), c2), pl.BlockSpec((1, CI), c2),              # imgseq LN
        pl.BlockSpec((CI, D), c2), pl.BlockSpec((1, D), c2),               # imgseq fc
        pl.BlockSpec((NL, 1, D), c3), pl.BlockSpec((NL, 1, D), c3),        # ln1
        pl.BlockSpec((NL, D, D), c3), pl.BlockSpec((NL, 1, D), c3),        # q (scaled)
        pl.BlockSpec((NL, D, D), c3), pl.BlockSpec((NL, 1, D), c3),        # k
        pl.BlockSpec((NL, D, D), c3), pl.BlockSpec((NL, 1, D), c3),        # v
        pl.BlockSpec((NL, D, D), c3), pl.BlockSpec((NL, 1, D), c3),        # proj
        pl.BlockSpec((NL, 1, D), c3), pl.BlockSpec((NL, 1, D), c3),        # ln2
        pl.BlockSpec((NL, D, hid), c3), pl.BlockSpec((NL, 1, hid), c3),    # fc1
        pl.BlockSpec((NL, hid, D), c3), pl.BlockSpec((NL, 1, D), c3),      # fc2
        pl.BlockSpec((D, 3 * D), c2), pl.BlockSpec((1, 3 * D), c2),        # heads fc1
        pl.BlockSpec((3 * D, NH), c2), pl.BlockSpec((1, NH), c2),          # heads fc2 (blockdiag)
    ]

    args = (length_i32, z, ca, im, win, cos_t, sin_a, sin_b,
            fp["w_obs1"], fp["b_obs1"], fp["w_obs2"], fp["b_obs2"],
            fp["w_ca1"], fp["b_ca1"], fp["w_ca2"], fp["b_ca2"],
            fp["im_g"], fp["im_b"], fp["w_im"], fp["b_im"],
            fp["ln1_g"], fp["ln1_b"], fp["w_q"], fp["b_q"], fp["w_k"], fp["b_k"],
            fp["w_v"], fp["b_v"], fp["w_proj"], fp["b_proj"],
            fp["ln2_g"], fp["ln2_b"], fp["w_fc1"], fp["b_fc1"], fp["w_fc2"], fp["b_fc2"],
            fp["w_h1"], fp["b_h1"], fp["w_h2"], fp["b_h2"])

    # advisory cost estimate so XLA can overlap the tiny surrounding JAX ops
    flops_pro = 2 * L * (ZK * 2 * D + 2 * D * D + CA * 2 * D + 2 * D * D + CI * D)
    flops_lyr = 8 * L * D * D + 4 * L * L * D + 4 * L * D * hid
    flops_hd = 2 * L * (3 * D * D + 3 * D * NH)
    flops = B * (flops_pro + NL * flops_lyr + flops_hd)
    transc = B * (L * 4 * D + NL * (H * L * L + L * hid) + L * 3 * D)
    in_bytes = sum(int(a.size) * a.dtype.itemsize for a in args)
    out_bytes = B * L * (D + NH) * 4

    grid_spec = pltpu.PrefetchScalarGridSpec(
        num_scalar_prefetch=1,
        grid=(B,),
        in_specs=in_specs,
        out_specs=[pl.BlockSpec((1, L, D), per_b),
                   pl.BlockSpec((1, L, NH), per_b)])

    return pl.pallas_call(
        kern,
        out_shape=(jax.ShapeDtypeStruct((B, L, D), jnp.float32),
                   jax.ShapeDtypeStruct((B, L, NH), jnp.float32)),
        grid_spec=grid_spec,
        compiler_params=pltpu.CompilerParams(
            dimension_semantics=("parallel",),            # v7x: one batch per TensorCore
            vmem_limit_bytes=32 * 1024 * 1024),
        cost_estimate=pl.CostEstimate(flops=int(flops), transcendentals=int(transc),
                                      bytes_accessed=int(in_bytes + out_bytes)),
    )(*args)


# ----------------------------- one-time weight preparation -----------------------------

def _pad16(n):
    return ((n + 15) // 16) * 16


def prepare_fused_params(params, cfg):
    """Hoisted (once-per-model) weight prep: bf16 casts, per-layer stacking, attention
    scale fold, per-joint/embedder folds, block-diagonal lane-padded heads."""
    D = cfg["latent_dim"]
    H = cfg["num_heads"]
    Dh = D // H
    hid = int(D * cfg["mlp_ratio"])
    J = 17
    bf16 = jnp.bfloat16
    fp = {}

    # noisy-obs: fold (per-joint Linear(2,32) + visibility/learned-pos select) and the
    # Mlp fc1 into one matmul:  f_obs @ fc1 = z @ (W_big @ fc1) + offset @ fc1
    wpl = np.asarray(params["learned_pos_linear"]["w"], np.float32)    # (2, 32)
    bpl = np.asarray(params["learned_pos_linear"]["b"], np.float32)    # (32,)
    lp = np.asarray(params["learned_pos_params"], np.float32)          # (17, 32)
    zk_pad = _pad16(3 * J)
    W_big = np.zeros((zk_pad, J * 32), np.float32)
    for j in range(J):
        W_big[3 * j + 0, j * 32:(j + 1) * 32] = wpl[0]
        W_big[3 * j + 1, j * 32:(j + 1) * 32] = wpl[1]
        W_big[3 * j + 2, j * 32:(j + 1) * 32] = bpl - lp[j]
    offset = lp.reshape(1, J * 32)
    fc1w = np.asarray(params["embed_noisyobs"]["fc1"]["w"], np.float32)
    fc1b = np.asarray(params["embed_noisyobs"]["fc1"]["b"], np.float32)
    fp["w_obs1"] = jnp.asarray(W_big @ fc1w, bf16)                     # (zk_pad, 2D)
    fp["b_obs1"] = jnp.asarray(offset @ fc1w + fc1b[None, :], jnp.float32)
    fp["w_obs2"] = jnp.asarray(params["embed_noisyobs"]["fc2"]["w"], bf16)
    fp["b_obs2"] = jnp.asarray(params["embed_noisyobs"]["fc2"]["b"]).reshape(1, D)

    # cliffcam + cam_angvel embedders fused: block-diag first layer, stacked second layer
    Cc = cfg["cliffcam_dim"]
    Ca = cfg["cam_angvel_dim"]
    ca_pad = _pad16(Cc + Ca)
    wca1 = np.zeros((ca_pad, 2 * D), np.float32)
    wca1[:Cc, :D] = np.asarray(params["cliffcam"]["fc1"]["w"])
    wca1[Cc:Cc + Ca, D:] = np.asarray(params["cam_angvel"]["fc1"]["w"])
    fp["w_ca1"] = jnp.asarray(wca1, bf16)
    fp["b_ca1"] = jnp.concatenate([params["cliffcam"]["fc1"]["b"],
                                   params["cam_angvel"]["fc1"]["b"]]).reshape(1, 2 * D)
    fp["w_ca2"] = jnp.concatenate([params["cliffcam"]["fc2"]["w"],
                                   params["cam_angvel"]["fc2"]["w"]], axis=0).astype(bf16)
    fp["b_ca2"] = (params["cliffcam"]["fc2"]["b"]
                   + params["cam_angvel"]["fc2"]["b"]).reshape(1, D)

    fp["im_g"] = params["imgseq"]["ln_g"].reshape(1, -1)
    fp["im_b"] = params["imgseq"]["ln_b"].reshape(1, -1)
    fp["w_im"] = params["imgseq"]["fc"]["w"].astype(bf16)
    fp["b_im"] = params["imgseq"]["fc"]["b"].reshape(1, D)

    # transformer blocks: stack per-layer weights on a leading axis; fold 1/sqrt(Dh)
    # into the q projection (RoPE is a rotation, so the scale commutes)
    scale = 1.0 / float(Dh) ** 0.5
    blocks = params["blocks"]
    st = lambda fn: jnp.stack([fn(blk) for blk in blocks], axis=0)
    fp["ln1_g"] = st(lambda blk: blk["ln1_g"].reshape(1, D))
    fp["ln1_b"] = st(lambda blk: blk["ln1_b"].reshape(1, D))
    fp["w_q"] = st(lambda blk: blk["qkv"]["w"][:, :D] * scale).astype(bf16)
    fp["b_q"] = st(lambda blk: (blk["qkv"]["b"][:D] * scale).reshape(1, D))
    fp["w_k"] = st(lambda blk: blk["qkv"]["w"][:, D:2 * D]).astype(bf16)
    fp["b_k"] = st(lambda blk: blk["qkv"]["b"][D:2 * D].reshape(1, D))
    fp["w_v"] = st(lambda blk: blk["qkv"]["w"][:, 2 * D:]).astype(bf16)
    fp["b_v"] = st(lambda blk: blk["qkv"]["b"][2 * D:].reshape(1, D))
    fp["w_proj"] = st(lambda blk: blk["proj"]["w"]).astype(bf16)
    fp["b_proj"] = st(lambda blk: blk["proj"]["b"].reshape(1, D))
    fp["ln2_g"] = st(lambda blk: blk["ln2_g"].reshape(1, D))
    fp["ln2_b"] = st(lambda blk: blk["ln2_b"].reshape(1, D))
    fp["w_fc1"] = st(lambda blk: blk["fc1"]["w"]).astype(bf16)
    fp["b_fc1"] = st(lambda blk: blk["fc1"]["b"].reshape(1, hid))
    fp["w_fc2"] = st(lambda blk: blk["fc2"]["w"]).astype(bf16)
    fp["b_fc2"] = st(lambda blk: blk["fc2"]["b"].reshape(1, D))

    # output heads: fc1 concatenated, fc2 block-diagonal, output lane-padded to 256
    out_dim = cfg["output_dim"]
    sc_dim = cfg["static_conf_dim"]
    n_real = out_dim + 3 + sc_dim
    n_pad = ((n_real + 127) // 128) * 128
    fp["w_h1"] = jnp.concatenate([params["final"]["fc1"]["w"],
                                  params["pred_cam"]["fc1"]["w"],
                                  params["static_conf"]["fc1"]["w"]], axis=1).astype(bf16)
    fp["b_h1"] = jnp.concatenate([params["final"]["fc1"]["b"],
                                  params["pred_cam"]["fc1"]["b"],
                                  params["static_conf"]["fc1"]["b"]]).reshape(1, 3 * D)
    w2 = np.zeros((3 * D, n_pad), np.float32)
    b2 = np.zeros((1, n_pad), np.float32)
    w2[0:D, 0:out_dim] = np.asarray(params["final"]["fc2"]["w"])
    w2[D:2 * D, out_dim:out_dim + 3] = np.asarray(params["pred_cam"]["fc2"]["w"])
    w2[2 * D:3 * D, out_dim + 3:n_real] = np.asarray(params["static_conf"]["fc2"]["w"])
    b2[0, 0:out_dim] = np.asarray(params["final"]["fc2"]["b"])
    b2[0, out_dim:out_dim + 3] = np.asarray(params["pred_cam"]["fc2"]["b"])
    b2[0, out_dim + 3:n_real] = np.asarray(params["static_conf"]["fc2"]["b"])
    fp["w_h2"] = jnp.asarray(w2, bf16)
    fp["b_h2"] = jnp.asarray(b2)

    fp["pred_cam_mean"] = params["pred_cam_mean"]
    fp["pred_cam_std"] = params["pred_cam_std"]
    return fp


# ----------------------------- parameters (synthetic) -----------------------------

def _linear_params(ks, kin, kout, scale=0.02):
    kw, kb = next(ks), next(ks)
    return {"w": scale * jax.random.normal(kw, (kin, kout), jnp.float32),
            "b": scale * jax.random.normal(kb, (kout,), jnp.float32)}


def init_params(key, cfg):
    D = cfg["latent_dim"]
    hid = int(D * cfg["mlp_ratio"])
    ks = iter(jax.random.split(key, 256))
    p = {}
    p["learned_pos_linear"] = _linear_params(ks, 2, 32)
    p["learned_pos_params"] = jax.random.normal(next(ks), (17, 32), jnp.float32)
    p["embed_noisyobs"] = {"fc1": _linear_params(ks, 17 * 32, 2 * D),
                           "fc2": _linear_params(ks, 2 * D, D)}
    # original: last linear of each embedder is zero_module(...) (zero-init); random here.
    p["cliffcam"] = {"fc1": _linear_params(ks, cfg["cliffcam_dim"], D),
                     "fc2": _linear_params(ks, D, D)}
    p["cam_angvel"] = {"fc1": _linear_params(ks, cfg["cam_angvel_dim"], D),
                       "fc2": _linear_params(ks, D, D)}
    p["imgseq"] = {"ln_g": jnp.ones((cfg["imgseq_dim"],), jnp.float32),
                   "ln_b": jnp.zeros((cfg["imgseq_dim"],), jnp.float32),
                   "fc": _linear_params(ks, cfg["imgseq_dim"], D)}
    blocks = []
    for _ in range(cfg["num_layers"]):
        blocks.append({
            "ln1_g": jnp.ones((D,), jnp.float32), "ln1_b": jnp.zeros((D,), jnp.float32),
            "qkv": _linear_params(ks, D, 3 * D),
            "proj": _linear_params(ks, D, D),
            "ln2_g": jnp.ones((D,), jnp.float32), "ln2_b": jnp.zeros((D,), jnp.float32),
            "fc1": _linear_params(ks, D, hid),
            "fc2": _linear_params(ks, hid, D),
        })
    p["blocks"] = blocks
    p["final"] = {"fc1": _linear_params(ks, D, D),
                  "fc2": _linear_params(ks, D, cfg["output_dim"])}
    p["pred_cam"] = {"fc1": _linear_params(ks, D, D),
                     "fc2": _linear_params(ks, D, 3)}
    p["static_conf"] = {"fc1": _linear_params(ks, D, D),
                        "fc2": _linear_params(ks, D, cfg["static_conf_dim"])}
    p["pred_cam_mean"] = jnp.array([1.0606, -0.0027, 0.2702], jnp.float32)
    p["pred_cam_std"] = jnp.array([0.1784, 0.0956, 0.0764], jnp.float32)
    return p


# ----------------------------- forward pass -----------------------------

def network_encoder_rope_forward(fp, cfg, length, obs, f_cliffcam, f_cam_angvel, f_imgseq):
    B, L, J, C = obs.shape
    assert J == 17 and C == 3
    D = cfg["latent_dim"]
    H = cfg["num_heads"]
    Dh = D // H
    half = Dh // 2

    # host-side (cheap, elementwise) feature prep for the folded prologue matmuls
    vis = (obs[..., 2:3] > 0.5).astype(jnp.float32)
    z = jnp.concatenate([obs[..., :2] * vis, vis], axis=-1).reshape(B, L, 3 * J)
    ca = jnp.concatenate([f_cliffcam, f_cam_angvel], axis=-1)
    z = jnp.pad(z, ((0, 0), (0, 0), (0, fp["w_obs1"].shape[0] - z.shape[-1])))
    ca = jnp.pad(ca, ((0, 0), (0, 0), (0, fp["w_ca1"].shape[0] - ca.shape[-1])))

    # RoPE tables (host constants), full (L, D) width; rotate-half sign and head
    # boundaries baked into sin_a / sin_b so the kernel uses two XLU lane rolls.
    inv_freq = 1.0 / (10000.0 ** (np.arange(half, dtype=np.float32) / half))
    freqs = np.arange(L, dtype=np.float32)[:, None] * inv_freq[None, :]          # (L, half)
    cos_h = np.concatenate([np.cos(freqs), np.cos(freqs)], axis=-1)              # (L, Dh)
    sin_h = np.concatenate([np.sin(freqs), np.sin(freqs)], axis=-1)
    cos_t = np.tile(cos_h, (1, H)).astype(np.float32)                            # (L, D)
    sin_t = np.tile(sin_h, (1, H)).astype(np.float32)
    first = np.tile(np.arange(Dh) < half, H)[None, :]
    sin_a = np.where(first, -sin_t, 0.0).astype(np.float32)   # multiplies roll(x, D-half)
    sin_b = np.where(first, 0.0, sin_t).astype(np.float32)    # multiplies roll(x, half)

    # static local-window mask (only active when L > max_len); key padding is in-kernel
    if L > cfg["max_len"]:
        attnmask = np.ones((L, L), dtype=bool)
        for i in range(L):
            min_ind = max(0, i - cfg["max_len"] // 2)
            max_ind = min(L, i + cfg["max_len"] // 2)
            max_ind = max(cfg["max_len"], max_ind)
            min_ind = min(L - cfg["max_len"], min_ind)
            attnmask[i, min_ind:max_ind] = False
        win = np.where(attnmask, np.float32(-1e9), np.float32(0.0)).astype(np.float32)
    else:
        win = np.zeros((L, L), np.float32)

    x, heads = _fused_call(fp, cfg, jnp.asarray(length, jnp.int32), z, ca, f_imgseq,
                           jnp.asarray(win), jnp.asarray(cos_t),
                           jnp.asarray(sin_a), jnp.asarray(sin_b))

    out_dim = cfg["output_dim"]
    sc_dim = cfg["static_conf_dim"]
    sample = heads[..., :out_dim]
    pc = heads[..., out_dim:out_dim + 3]
    sc = heads[..., out_dim + 3:out_dim + 3 + sc_dim]

    if cfg["avgbeta"]:
        valid = (jnp.arange(L)[None, :] < length[:, None]).astype(jnp.float32)[..., None]
        betas = (sample[..., 126:136] * valid).sum(axis=1) / length[:, None].astype(jnp.float32)
        betas = jnp.broadcast_to(betas[:, None, :], (B, L, 10))
        sample = jnp.concatenate([sample[..., :126], betas, sample[..., 136:]], axis=-1)

    pc = pc * fp["pred_cam_std"] + fp["pred_cam_mean"]
    pc = jnp.concatenate([jnp.maximum(pc[..., :1], 0.25), pc[..., 1:]], axis=-1)

    return {"pred_context": x, "pred_x": sample, "pred_cam": pc, "static_conf_logits": sc}


# ----------------------------- main -----------------------------

if __name__ == "__main__":
    cfg = dict(output_dim=151, max_len=120, cliffcam_dim=3, cam_angvel_dim=6,
               imgseq_dim=64, latent_dim=128, num_layers=2, num_heads=4,
               mlp_ratio=4.0, static_conf_dim=6, avgbeta=True)

    B, L = 2, 16
    key = jax.random.PRNGKey(0)
    kp, kx, kc, k1, k2, k3 = jax.random.split(key, 6)

    params = init_params(kp, cfg)
    fparams = prepare_fused_params(params, cfg)       # one-time, hoisted off the hot path

    obs_xy = jax.random.normal(kx, (B, L, 17, 2), jnp.float32)
    obs_conf = jax.random.uniform(kc, (B, L, 17, 1), jnp.float32)     # mixed visibility
    obs = jnp.concatenate([obs_xy, obs_conf], axis=-1)
    f_cliffcam = jax.random.normal(k1, (B, L, cfg["cliffcam_dim"]), jnp.float32)
    f_cam_angvel = jax.random.normal(k2, (B, L, cfg["cam_angvel_dim"]), jnp.float32)
    f_imgseq = jax.random.normal(k3, (B, L, cfg["imgseq_dim"]), jnp.float32)
    length = jnp.array([L, L - 5], dtype=jnp.int32)

    fwd = jax.jit(functools.partial(network_encoder_rope_forward, fparams, cfg))
    out = fwd(length, obs, f_cliffcam, f_cam_angvel, f_imgseq)
    out = jax.block_until_ready(out)

    assert out["pred_context"].shape == (B, L, cfg["latent_dim"])
    assert out["pred_x"].shape == (B, L, cfg["output_dim"])
    assert out["pred_cam"].shape == (B, L, 3)
    assert out["static_conf_logits"].shape == (B, L, cfg["static_conf_dim"])
    assert all(bool(jnp.all(jnp.isfinite(v))) for v in out.values())
    print("KERNEL_OK")
</pallas_src>

<mosaic_0001>
module attributes {stable_mosaic.version = 11 : i64} {
  func.func @_fused_kernel(%arg0: i32, %arg1: memref<2xi32, #tpu.memory_space<smem>>, %arg2: memref<1x16x64xf32, #tpu.memory_space<vmem>>, %arg3: memref<1x16x16xf32, #tpu.memory_space<vmem>>, %arg4: memref<1x16x64xf32, #tpu.memory_space<vmem>>, %arg5: memref<16x16xf32, #tpu.memory_space<vmem>>, %arg6: memref<16x128xf32, #tpu.memory_space<vmem>>, %arg7: memref<16x128xf32, #tpu.memory_space<vmem>>, %arg8: memref<16x128xf32, #tpu.memory_space<vmem>>, %arg9: memref<64x256xbf16, #tpu.memory_space<vmem>>, %arg10: memref<1x256xf32, #tpu.memory_space<vmem>>, %arg11: memref<256x128xbf16, #tpu.memory_space<vmem>>, %arg12: memref<1x128xf32, #tpu.memory_space<vmem>>, %arg13: memref<16x256xbf16, #tpu.memory_space<vmem>>, %arg14: memref<1x256xf32, #tpu.memory_space<vmem>>, %arg15: memref<256x128xbf16, #tpu.memory_space<vmem>>, %arg16: memref<1x128xf32, #tpu.memory_space<vmem>>, %arg17: memref<1x64xf32, #tpu.memory_space<vmem>>, %arg18: memref<1x64xf32, #tpu.memory_space<vmem>>, %arg19: memref<64x128xbf16, #tpu.memory_space<vmem>>, %arg20: memref<1x128xf32, #tpu.memory_space<vmem>>, %arg21: memref<2x1x128xf32, #tpu.memory_space<vmem>>, %arg22: memref<2x1x128xf32, #tpu.memory_space<vmem>>, %arg23: memref<2x128x128xbf16, #tpu.memory_space<vmem>>, %arg24: memref<2x1x128xf32, #tpu.memory_space<vmem>>, %arg25: memref<2x128x128xbf16, #tpu.memory_space<vmem>>, %arg26: memref<2x1x128xf32, #tpu.memory_space<vmem>>, %arg27: memref<2x128x128xbf16, #tpu.memory_space<vmem>>, %arg28: memref<2x1x128xf32, #tpu.memory_space<vmem>>, %arg29: memref<2x128x128xbf16, #tpu.memory_space<vmem>>, %arg30: memref<2x1x128xf32, #tpu.memory_space<vmem>>, %arg31: memref<2x1x128xf32, #tpu.memory_space<vmem>>, %arg32: memref<2x1x128xf32, #tpu.memory_space<vmem>>, %arg33: memref<2x128x512xbf16, #tpu.memory_space<vmem>>, %arg34: memref<2x1x512xf32, #tpu.memory_space<vmem>>, %arg35: memref<2x512x128xbf16, #tpu.memory_space<vmem>>, %arg36: memref<2x1x128xf32, #tpu.memory_space<vmem>>, %arg37: memref<128x384xbf16, #tpu.memory_space<vmem>>, %arg38: memref<1x384xf32, #tpu.memory_space<vmem>>, %arg39: memref<384x256xbf16, #tpu.memory_space<vmem>>, %arg40: memref<1x256xf32, #tpu.memory_space<vmem>>, %arg41: memref<1x16x128xf32, #tpu.memory_space<vmem>>, %arg42: memref<1x16x256xf32, #tpu.memory_space<vmem>>) attributes {dimension_semantics = [#tpu.dimension_semantics<parallel>], iteration_bounds = array<i64: 2>, scalar_prefetch = 1 : i64, scratch_operands = 0 : i64, tpu.core_type = #tpu.core_type<tc>, window_params = [{transform_indices = @transform_0, window_bounds = array<i64: 1, 16, 64>}, {transform_indices = @transform_1, window_bounds = array<i64: 1, 16, 16>}, {transform_indices = @transform_2, window_bounds = array<i64: 1, 16, 64>}, {pipeline_mode = #tpu.pipeline_mode<synchronous>, transform_indices = @transform_3, window_bounds = array<i64: 16, 16>}, {pipeline_mode = #tpu.pipeline_mode<synchronous>, transform_indices = @transform_4, window_bounds = array<i64: 16, 128>}, {pipeline_mode = #tpu.pipeline_mode<synchronous>, transform_indices = @transform_5, window_bounds = array<i64: 16, 128>}, {pipeline_mode = #tpu.pipeline_mode<synchronous>, transform_indices = @transform_6, window_bounds = array<i64: 16, 128>}, {pipeline_mode = #tpu.pipeline_mode<synchronous>, transform_indices = @transform_7, window_bounds = array<i64: 64, 256>}, {pipeline_mode = #tpu.pipeline_mode<synchronous>, transform_indices = @transform_8, window_bounds = array<i64: 1, 256>}, {pipeline_mode = #tpu.pipeline_mode<synchronous>, transform_indices = @transform_9, window_bounds = array<i64: 256, 128>}, {pipeline_mode = #tpu.pipeline_mode<synchronous>, transform_indices = @transform_10, window_bounds = array<i64: 1, 128>}, {pipeline_mode = #tpu.pipeline_mode<synchronous>, transform_indices = @transform_11, window_bounds = array<i64: 16, 256>}, {pipeline_mode = #tpu.pipeline_mode<synchronous>, transform_indices = @transform_12, window_bounds = array<i64: 1, 256>}, {pipeline_mode = #tpu.pipeline_mode<synchronous>, transform_indices = @transform_13, window_bounds = array<i64: 256, 128>}, {pipeline_mode = #tpu.pipeline_mode<synchronous>, transform_indices = @transform_14, window_bounds = array<i64: 1, 128>}, {pipeline_mode = #tpu.pipeline_mode<synchronous>, transform_indices = @transform_15, window_bounds = array<i64: 1, 64>}, {pipeline_mode = #tpu.pipeline_mode<synchronous>, transform_indices = @transform_16, window_bounds = array<i64: 1, 64>}, {pipeline_mode = #tpu.pipeline_mode<synchronous>, transform_indices = @transform_17, window_bounds = array<i64: 64, 128>}, {pipeline_mode = #tpu.pipeline_mode<synchronous>, transform_indices = @transform_18, window_bounds = array<i64: 1, 128>}, {pipeline_mode = #tpu.pipeline_mode<synchronous>, transform_indices = @transform_19, window_bounds = array<i64: 2, 1, 128>}, {pipeline_mode = #tpu.pipeline_mode<synchronous>, transform_indices = @transform_20, window_bounds = array<i64: 2, 1, 128>}, {pipeline_mode = #tpu.pipeline_mode<synchronous>, transform_indices = @transform_21, window_bounds = array<i64: 2, 128, 128>}, {pipeline_mode = #tpu.pipeline_mode<synchronous>, transform_indices = @transform_22, window_bounds = array<i64: 2, 1, 128>}, {pipeline_mode = #tpu.pipeline_mode<synchronous>, transform_indices = @transform_23, window_bounds = array<i64: 2, 128, 128>}, {pipeline_mode = #tpu.pipeline_mode<synchronous>, transform_indices = @transform_24, window_bounds = array<i64: 2, 1, 128>}, {pipeline_mode = #tpu.pipeline_mode<synchronous>, transform_indices = @transform_25, window_bounds = array<i64: 2, 128, 128>}, {pipeline_mode = #tpu.pipeline_mode<synchronous>, transform_indices = @transform_26, window_bounds = array<i64: 2, 1, 128>}, {pipeline_mode = #tpu.pipeline_mode<synchronous>, transform_indices = @transform_27, window_bounds = array<i64: 2, 128, 128>}, {pipeline_mode = #tpu.pipeline_mode<synchronous>, transform_indices = @transform_28, window_bounds = array<i64: 2, 1, 128>}, {pipeline_mode = #tpu.pipeline_mode<synchronous>, transform_indices = @transform_29, window_bounds = array<i64: 2, 1, 128>}, {pipeline_mode = #tpu.pipeline_mode<synchronous>, transform_indices = @transform_30, window_bounds = array<i64: 2, 1, 128>}, {pipeline_mode = #tpu.pipeline_mode<synchronous>, transform_indices = @transform_31, window_bounds = array<i64: 2, 128, 512>}, {pipeline_mode = #tpu.pipeline_mode<synchronous>, transform_indices = @transform_32, window_bounds = array<i64: 2, 1, 512>}, {pipeline_mode = #tpu.pipeline_mode<synchronous>, transform_indices = @transform_33, window_bounds = array<i64: 2, 512, 128>}, {pipeline_mode = #tpu.pipeline_mode<synchronous>, transform_indices = @transform_34, window_bounds = array<i64: 2, 1, 128>}, {pipeline_mode = #tpu.pipeline_mode<synchronous>, transform_indices = @transform_35, window_bounds = array<i64: 128, 384>}, {pipeline_mode = #tpu.pipeline_mode<synchronous>, transform_indices = @transform_36, window_bounds = array<i64: 1, 384>}, {pipeline_mode = #tpu.pipeline_mode<synchronous>, transform_indices = @transform_37, window_bounds = array<i64: 384, 256>}, {pipeline_mode = #tpu.pipeline_mode<synchronous>, transform_indices = @transform_38, window_bounds = array<i64: 1, 256>}, {transform_indices = @transform_39, window_bounds = array<i64: 1, 16, 128>}, {transform_indices = @transform_40, window_bounds = array<i64: 1, 16, 256>}]} {
    %c0 = arith.constant 0 : index
    %c0_0 = arith.constant 0 : index
    %c0_1 = arith.constant 0 : index
    %0 = vector.load %arg2[%c0, %c0_0, %c0_1] : memref<1x16x64xf32, #tpu.memory_space<vmem>>, vector<1x16x64xf32>
    %1 = vector.shape_cast %0 : vector<1x16x64xf32> to vector<16x64xf32>
    %2 = arith.truncf %1 : vector<16x64xf32> to vector<16x64xbf16>
    %c0_2 = arith.constant 0 : index
    %c0_3 = arith.constant 0 : index
    %3 = vector.load %arg9[%c0_2, %c0_3] : memref<64x256xbf16, #tpu.memory_space<vmem>>, vector<64x256xbf16>
    %cst = arith.constant dense<0.000000e+00> : vector<16x256xf32>
    %4 = tpu.matmul %2, %3, %cst {dimension_numbers = #tpu.dot_dimension_numbers<[1], [0], [0], [1], [0, 0, 1, 1], [], []>} : vector<16x64xbf16>, vector<64x256xbf16>, vector<16x256xf32> -> vector<16x256xf32>
    %c0_4 = arith.constant 0 : index
    %c0_5 = arith.constant 0 : index
    %5 = vector.load %arg10[%c0_4, %c0_5] : memref<1x256xf32, #tpu.memory_space<vmem>>, vector<1x256xf32>
    %6 = vector.broadcast %5 : vector<1x256xf32> to vector<16x256xf32>
    %7 = arith.addf %4, %6 : vector<16x256xf32>
    %8 = arith.mulf %7, %7 : vector<16x256xf32>
    %9 = arith.mulf %7, %8 : vector<16x256xf32>
    %cst_6 = arith.constant 4.471500e-02 : f32
    %10 = vector.broadcast %cst_6 : f32 to vector<16x256xf32>
    %11 = arith.mulf %10, %9 : vector<16x256xf32>
    %12 = arith.addf %7, %11 : vector<16x256xf32>
    %cst_7 = arith.constant 0.797884583 : f32
    %13 = vector.broadcast %cst_7 : f32 to vector<16x256xf32>
    %14 = arith.mulf %13, %12 : vector<16x256xf32>
    %15 = math.tanh %14 : vector<16x256xf32>
    %cst_8 = arith.constant 1.000000e+00 : f32
    %16 = vector.broadcast %cst_8 : f32 to vector<16x256xf32>
    %17 = arith.addf %16, %15 : vector<16x256xf32>
    %cst_9 = arith.constant 5.000000e-01 : f32
    %18 = vector.broadcast %cst_9 : f32 to vector<16x256xf32>
    %19 = arith.mulf %18, %17 : vector<16x256xf32>
    %20 = arith.mulf %7, %19 : vector<16x256xf32>
    %21 = arith.truncf %20 : vector<16x256xf32> to vector<16x256xbf16>
    %c0_10 = arith.constant 0 : index
    %c0_11 = arith.constant 0 : index
    %22 = vector.load %arg11[%c0_10, %c0_11] : memref<256x128xbf16, #tpu.memory_space<vmem>>, vector<256x128xbf16>
    %cst_12 = arith.constant dense<0.000000e+00> : vector<16x128xf32>
    %23 = tpu.matmul %21, %22, %cst_12 {dimension_numbers = #tpu.dot_dimension_numbers<[1], [0], [0], [1], [0, 0, 1, 1], [], []>} : vector<16x256xbf16>, vector<256x128xbf16>, vector<16x128xf32> -> vector<16x128xf32>
    %c0_13 = arith.constant 0 : index
    %c0_14 = arith.constant 0 : index
    %24 = vector.load %arg12[%c0_13, %c0_14] : memref<1x128xf32, #tpu.memory_space<vmem>>, vector<1x128xf32>
    %25 = vector.broadcast %24 : vector<1x128xf32> to vector<16x128xf32>
    %26 = arith.addf %23, %25 : vector<16x128xf32>
    %c0_15 = arith.constant 0 : index
    %c0_16 = arith.constant 0 : index
    %c0_17 = arith.constant 0 : index
    %27 = vector.load %arg3[%c0_15, %c0_16, %c0_17] : memref<1x16x16xf32, #tpu.memory_space<vmem>>, vector<1x16x16xf32>
    %28 = vector.shape_cast %27 : vector<1x16x16xf32> to vector<16x16xf32>
    %29 = arith.truncf %28 : vector<16x16xf32> to vector<16x16xbf16>
    %c0_18 = arith.constant 0 : index
    %c0_19 = arith.constant 0 : index
    %30 = vector.load %arg13[%c0_18, %c0_19] : memref<16x256xbf16, #tpu.memory_space<vmem>>, vector<16x256xbf16>
    %cst_20 = arith.constant dense<0.000000e+00> : vector<16x256xf32>
    %31 = tpu.matmul %29, %30, %cst_20 {dimension_numbers = #tpu.dot_dimension_numbers<[1], [0], [0], [1], [0, 0, 1, 1], [], []>} : vector<16x16xbf16>, vector<16x256xbf16>, vector<16x256xf32> -> vector<16x256xf32>
    %c0_21 = arith.constant 0 : index
    %c0_22 = arith.constant 0 : index
    %32 = vector.load %arg14[%c0_21, %c0_22] : memref<1x256xf32, #tpu.memory_space<vmem>>, vector<1x256xf32>
    %33 = vector.broadcast %32 : vector<1x256xf32> to vector<16x256xf32>
    %34 = arith.addf %31, %33 : vector<16x256xf32>
    %35 = arith.negf %34 : vector<16x256xf32>
    %36 = math.exp %35 : vector<16x256xf32>
    %cst_23 = arith.constant 1.000000e+00 : f32
    %37 = vector.broadcast %cst_23 : f32 to vector<16x256xf32>
    %38 = arith.addf %37, %36 : vector<16x256xf32>
    %39 = arith.divf %37, %38 : vector<16x256xf32>
    %40 = arith.mulf %34, %39 : vector<16x256xf32>
    %41 = arith.truncf %40 : vector<16x256xf32> to vector<16x256xbf16>
    %c0_24 = arith.constant 0 : index
    %c0_25 = arith.constant 0 : index
    %42 = vector.load %arg15[%c0_24, %c0_25] : memref<256x128xbf16, #tpu.memory_space<vmem>>, vector<256x128xbf16>
    %cst_26 = arith.constant dense<0.000000e+00> : vector<16x128xf32>
    %43 = tpu.matmul %41, %42, %cst_26 {dimension_numbers = #tpu.dot_dimension_numbers<[1], [0], [0], [1], [0, 0, 1, 1], [], []>} : vector<16x256xbf16>, vector<256x128xbf16>, vector<16x128xf32> -> vector<16x128xf32>
    %44 = arith.addf %26, %43 : vector<16x128xf32>
    %c0_27 = arith.constant 0 : index
    %c0_28 = arith.constant 0 : index
    %45 = vector.load %arg16[%c0_27, %c0_28] : memref<1x128xf32, #tpu.memory_space<vmem>>, vector<1x128xf32>
    %46 = vector.broadcast %45 : vector<1x128xf32> to vector<16x128xf32>
    %47 = arith.addf %44, %46 : vector<16x128xf32>
    %c0_29 = arith.constant 0 : index
    %c0_30 = arith.constant 0 : index
    %c0_31 = arith.constant 0 : index
    %48 = vector.load %arg4[%c0_29, %c0_30, %c0_31] : memref<1x16x64xf32, #tpu.memory_space<vmem>>, vector<1x16x64xf32>
    %49 = vector.shape_cast %48 : vector<1x16x64xf32> to vector<16x64xf32>
    %c0_32 = arith.constant 0 : index
    %c0_33 = arith.constant 0 : index
    %50 = vector.load %arg17[%c0_32, %c0_33] : memref<1x64xf32, #tpu.memory_space<vmem>>, vector<1x64xf32>
    %c0_34 = arith.constant 0 : index
    %c0_35 = arith.constant 0 : index
    %51 = vector.load %arg18[%c0_34, %c0_35] : memref<1x64xf32, #tpu.memory_space<vmem>>, vector<1x64xf32>
    %cst_36 = arith.constant dense<0.000000e+00> : vector<16xf32>
    %52 = vector.multi_reduction <add>, %49, %cst_36 [1] : vector<16x64xf32> to vector<16xf32>
    %53 = vector.shape_cast %52 : vector<16xf32> to vector<16x1xf32>
    %cst_37 = arith.constant 6.400000e+01 : f32
    %54 = vector.broadcast %cst_37 : f32 to vector<16x1xf32>
    %55 = arith.divf %53, %54 : vector<16x1xf32>
    %56 = vector.broadcast %55 : vector<16x1xf32> to vector<16x64xf32>
    %57 = arith.subf %49, %56 : vector<16x64xf32>
    %58 = arith.mulf %57, %57 : vector<16x64xf32>
    %cst_38 = arith.constant dense<0.000000e+00> : vector<16xf32>
    %59 = vector.multi_reduction <add>, %58, %cst_38 [1] : vector<16x64xf32> to vector<16xf32>
    %60 = vector.shape_cast %59 : vector<16xf32> to vector<16x1xf32>
    %cst_39 = arith.constant 6.400000e+01 : f32
    %61 = vector.broadcast %cst_39 : f32 to vector<16x1xf32>
    %62 = arith.divf %60, %61 : vector<16x1xf32>
    %cst_40 = arith.constant 9.99999974E-6 : f32
    %63 = vector.broadcast %cst_40 : f32 to vector<16x1xf32>
    %64 = arith.addf %62, %63 : vector<16x1xf32>
    %65 = math.rsqrt %64 : vector<16x1xf32>
    %66 = vector.broadcast %65 : vector<16x1xf32> to vector<16x64xf32>
    %67 = arith.mulf %57, %66 : vector<16x64xf32>
    %68 = vector.broadcast %50 : vector<1x64xf32> to vector<16x64xf32>
    %69 = arith.mulf %67, %68 : vector<16x64xf32>
    %70 = vector.broadcast %51 : vector<1x64xf32> to vector<16x64xf32>
    %71 = arith.addf %69, %70 : vector<16x64xf32>
    %72 = arith.truncf %71 : vector<16x64xf32> to vector<16x64xbf16>
    %c0_41 = arith.constant 0 : index
    %c0_42 = arith.constant 0 : index
    %73 = vector.load %arg19[%c0_41, %c0_42] : memref<64x128xbf16, #tpu.memory_space<vmem>>, vector<64x128xbf16>
    %cst_43 = arith.constant dense<0.000000e+00> : vector<16x128xf32>
    %74 = tpu.matmul %72, %73, %cst_43 {dimension_numbers = #tpu.dot_dimension_numbers<[1], [0], [0], [1], [0, 0, 1, 1], [], []>} : vector<16x64xbf16>, vector<64x128xbf16>, vector<16x128xf32> -> vector<16x128xf32>
    %75 = arith.addf %47, %74 : vector<16x128xf32>
    %c0_44 = arith.constant 0 : index
    %c0_45 = arith.constant 0 : index
    %76 = vector.load %arg20[%c0_44, %c0_45] : memref<1x128xf32, #tpu.memory_space<vmem>>, vector<1x128xf32>
    %77 = vector.broadcast %76 : vector<1x128xf32> to vector<16x128xf32>
    %78 = arith.addf %75, %77 : vector<16x128xf32>
    %79 = tpu.iota {dimensions = array<i32: 1>} : vector<16x16xi32>
    %80 = arith.index_cast %arg0 : i32 to index
    %81 = memref.load %arg1[%80] : memref<2xi32, #tpu.memory_space<smem>>
    %82 = vector.broadcast %81 : i32 to vector<16x16xi32>
    %83 = arith.cmpi slt, %79, %82 : vector<16x16xi32>
    %cst_46 = arith.constant 0.000000e+00 : f32
    %cst_47 = arith.constant -1.000000e+09 : f32
    %84 = vector.broadcast %cst_46 : f32 to vector<16x16xf32>
    %85 = vector.broadcast %cst_47 : f32 to vector<16x16xf32>
    %86 = arith.select %83, %84, %85 : vector<16x16xi1>, vector<16x16xf32>
    %c0_48 = arith.constant 0 : index
    %c0_49 = arith.constant 0 : index
    %87 = vector.load %arg5[%c0_48, %c0_49] : memref<16x16xf32, #tpu.memory_space<vmem>>, vector<16x16xf32>
    %88 = arith.addf %86, %87 : vector<16x16xf32>
    %c0_50 = arith.constant 0 : index
    %c0_51 = arith.constant 0 : index
    %89 = vector.load %arg6[%c0_50, %c0_51] : memref<16x128xf32, #tpu.memory_space<vmem>>, vector<16x128xf32>
    %c0_52 = arith.constant 0 : index
    %c0_53 = arith.constant 0 : index
    %90 = vector.load %arg7[%c0_52, %c0_53] : memref<16x128xf32, #tpu.memory_space<vmem>>, vector<16x128xf32>
    %c0_54 = arith.constant 0 : index
    %c0_55 = arith.constant 0 : index
    %91 = vector.load %arg8[%c0_54, %c0_55] : memref<16x128xf32, #tpu.memory_space<vmem>>, vector<16x128xf32>
    %c0_56 = arith.constant 0 : index
    %c0_57 = arith.constant 0 : index
    %c0_58 = arith.constant 0 : index
    %92 = vector.load %arg21[%c0_56, %c0_57, %c0_58] : memref<2x1x128xf32, #tpu.memory_space<vmem>>, vector<1x1x128xf32>
    %93 = vector.shape_cast %92 : vector<1x1x128xf32> to vector<1x128xf32>
    %c0_59 = arith.constant 0 : index
    %c0_60 = arith.constant 0 : index
    %c0_61 = arith.constant 0 : index
    %94 = vector.load %arg22[%c0_59, %c0_60, %c0_61] : memref<2x1x128xf32, #tpu.memory_space<vmem>>, vector<1x1x128xf32>
    %95 = vector.shape_cast %94 : vector<1x1x128xf32> to vector<1x128xf32>
    %cst_62 = arith.constant dense<0.000000e+00> : vector<16xf32>
    %96 = vector.multi_reduction <add>, %78, %cst_62 [1] : vector<16x128xf32> to vector<16xf32>
    %97 = vector.shape_cast %96 : vector<16xf32> to vector<16x1xf32>
    %cst_63 = arith.constant 1.280000e+02 : f32
    %98 = vector.broadcast %cst_63 : f32 to vector<16x1xf32>
    %99 = arith.divf %97, %98 : vector<16x1xf32>
    %100 = vector.broadcast %99 : vector<16x1xf32> to vector<16x128xf32>
    %101 = arith.subf %78, %100 : vector<16x128xf32>
    %102 = arith.mulf %101, %101 : vector<16x128xf32>
    %cst_64 = arith.constant dense<0.000000e+00> : vector<16xf32>
    %103 = vector.multi_reduction <add>, %102, %cst_64 [1] : vector<16x128xf32> to vector<16xf32>
    %104 = vector.shape_cast %103 : vector<16xf32> to vector<16x1xf32>
    %cst_65 = arith.constant 1.280000e+02 : f32
    %105 = vector.broadcast %cst_65 : f32 to vector<16x1xf32>
    %106 = arith.divf %104, %105 : vector<16x1xf32>
    %cst_66 = arith.constant 9.99999974E-6 : f32
    %107 = vector.broadcast %cst_66 : f32 to vector<16x1xf32>
    %108 = arith.addf %106, %107 : vector<16x1xf32>
    %109 = math.rsqrt %108 : vector<16x1xf32>
    %110 = vector.broadcast %109 : vector<16x1xf32> to vector<16x128xf32>
    %111 = arith.mulf %101, %110 : vector<16x128xf32>
    %112 = vector.broadcast %93 : vector<1x128xf32> to vector<16x128xf32>
    %113 = arith.mulf %111, %112 : vector<16x128xf32>
    %114 = vector.broadcast %95 : vector<1x128xf32> to vector<16x128xf32>
    %115 = arith.addf %113, %114 : vector<16x128xf32>
    %116 = arith.truncf %115 : vector<16x128xf32> to vector<16x128xbf16>
    %c0_67 = arith.constant 0 : index
    %c0_68 = arith.constant 0 : index
    %c0_69 = arith.constant 0 : index
    %117 = vector.load %arg23[%c0_67, %c0_68, %c0_69] : memref<2x128x128xbf16, #tpu.memory_space<vmem>>, vector<1x128x128xbf16>
    %118 = vector.shape_cast %117 : vector<1x128x128xbf16> to vector<128x128xbf16>
    %cst_70 = arith.constant dense<0.000000e+00> : vector<16x128xf32>
    %119 = tpu.matmul %116, %118, %cst_70 {dimension_numbers = #tpu.dot_dimension_numbers<[1], [0], [0], [1], [0, 0, 1, 1], [], []>} : vector<16x128xbf16>, vector<128x128xbf16>, vector<16x128xf32> -> vector<16x128xf32>
    %c0_71 = arith.constant 0 : index
    %c0_72 = arith.constant 0 : index
    %c0_73 = arith.constant 0 : index
    %120 = vector.load %arg24[%c0_71, %c0_72, %c0_73] : memref<2x1x128xf32, #tpu.memory_space<vmem>>, vector<1x1x128xf32>
    %121 = vector.shape_cast %120 : vector<1x1x128xf32> to vector<1x128xf32>
    %122 = vector.broadcast %121 : vector<1x128xf32> to vector<16x128xf32>
    %123 = arith.addf %119, %122 : vector<16x128xf32>
    %c0_74 = arith.constant 0 : index
    %c0_75 = arith.constant 0 : index
    %c0_76 = arith.constant 0 : index
    %124 = vector.load %arg25[%c0_74, %c0_75, %c0_76] : memref<2x128x128xbf16, #tpu.memory_space<vmem>>, vector<1x128x128xbf16>
    %125 = vector.shape_cast %124 : vector<1x128x128xbf16> to vector<128x128xbf16>
    %cst_77 = arith.constant dense<0.000000e+00> : vector<16x128xf32>
    %126 = tpu.matmul %116, %125, %cst_77 {dimension_numbers = #tpu.dot_dimension_numbers<[1], [0], [0], [1], [0, 0, 1, 1], [], []>} : vector<16x128xbf16>, vector<128x128xbf16>, vector<16x128xf32> -> vector<16x128xf32>
    %c0_78 = arith.constant 0 : index
    %c0_79 = arith.constant 0 : index
    %c0_80 = arith.constant 0 : index
    %127 = vector.load %arg26[%c0_78, %c0_79, %c0_80] : memref<2x1x128xf32, #tpu.memory_space<vmem>>, vector<1x1x128xf32>
    %128 = vector.shape_cast %127 : vector<1x1x128xf32> to vector<1x128xf32>
    %129 = vector.broadcast %128 : vector<1x128xf32> to vector<16x128xf32>
    %130 = arith.addf %126, %129 : vector<16x128xf32>
    %131 = arith.mulf %123, %89 : vector<16x128xf32>
    %c112_i32 = arith.constant 112 : i32
    %132 = tpu.dynamic_rotate %123 by %c112_i32 dim 1 : vector<16x128xf32>, i32 -> vector<16x128xf32>
    %133 = arith.mulf %132, %90 : vector<16x128xf32>
    %134 = arith.addf %131, %133 : vector<16x128xf32>
    %c16_i32 = arith.constant 16 : i32
    %135 = tpu.dynamic_rotate %123 by %c16_i32 dim 1 : vector<16x128xf32>, i32 -> vector<16x128xf32>
    %136 = arith.mulf %135, %91 : vector<16x128xf32>
    %137 = arith.addf %134, %136 : vector<16x128xf32>
    %138 = arith.truncf %137 : vector<16x128xf32> to vector<16x128xbf16>
    %139 = arith.mulf %130, %89 : vector<16x128xf32>
    %c112_i32_81 = arith.constant 112 : i32
    %140 = tpu.dynamic_rotate %130 by %c112_i32_81 dim 1 : vector<16x128xf32>, i32 -> vector<16x128xf32>
    %141 = arith.mulf %140, %90 : vector<16x128xf32>
    %142 = arith.addf %139, %141 : vector<16x128xf32>
    %c16_i32_82 = arith.constant 16 : i32
    %143 = tpu.dynamic_rotate %130 by %c16_i32_82 dim 1 : vector<16x128xf32>, i32 -> vector<16x128xf32>
    %144 = arith.mulf %143, %91 : vector<16x128xf32>
    %145 = arith.addf %142, %144 : vector<16x128xf32>
    %146 = arith.truncf %145 : vector<16x128xf32> to vector<16x128xbf16>
    %c0_83 = arith.constant 0 : index
    %c0_84 = arith.constant 0 : index
    %c0_85 = arith.constant 0 : index
    %147 = vector.load %arg27[%c0_83, %c0_84, %c0_85] : memref<2x128x128xbf16, #tpu.memory_space<vmem>>, vector<1x128x128xbf16>
    %148 = vector.shape_cast %147 : vector<1x128x128xbf16> to vector<128x128xbf16>
    %cst_86 = arith.constant dense<0.000000e+00> : vector<16x128xf32>
    %149 = tpu.matmul %116, %148, %cst_86 {dimension_numbers = #tpu.dot_dimension_numbers<[1], [0], [0], [1], [0, 0, 1, 1], [], []>} : vector<16x128xbf16>, vector<128x128xbf16>, vector<16x128xf32> -> vector<16x128xf32>
    %c0_87 = arith.constant 0 : index
    %c0_88 = arith.constant 0 : index
    %c0_89 = arith.constant 0 : index
    %150 = vector.load %arg28[%c0_87, %c0_88, %c0_89] : memref<2x1x128xf32, #tpu.memory_space<vmem>>, vector<1x1x128xf32>
    %151 = vector.shape_cast %150 : vector<1x1x128xf32> to vector<1x128xf32>
    %152 = vector.broadcast %151 : vector<1x128xf32> to vector<16x128xf32>
    %153 = arith.addf %149, %152 : vector<16x128xf32>
    %154 = arith.truncf %153 : vector<16x128xf32> to vector<16x128xbf16>
    %c0_90 = arith.constant 0 : index
    %c0_91 = arith.constant 0 : index
    %c0_92 = arith.constant 0 : index
    %155 = vector.load %arg29[%c0_90, %c0_91, %c0_92] : memref<2x128x128xbf16, #tpu.memory_space<vmem>>, vector<1x128x128xbf16>
    %156 = vector.shape_cast %155 : vector<1x128x128xbf16> to vector<128x128xbf16>
    %cst_93 = arith.constant 0.000000e+00 : f32
    %157 = vector.broadcast %cst_93 : f32 to vector<16x128xf32>
    %158 = vector.extract_strided_slice %138 {offsets = [0, 0], sizes = [16, 32], strides = [1, 1]} : vector<16x128xbf16> to vector<16x32xbf16>
    %159 = vector.extract_strided_slice %146 {offsets = [0, 0], sizes = [16, 32], strides = [1, 1]} : vector<16x128xbf16> to vector<16x32xbf16>
    %cst_94 = arith.constant dense<0.000000e+00> : vector<16x16xf32>
    %160 = tpu.matmul %158, %159, %cst_94 {dimension_numbers = #tpu.dot_dimension_numbers<[1], [1], [0], [0], [0, 0, 1, 0], [], []>} : vector<16x32xbf16>, vector<16x32xbf16>, vector<16x16xf32> -> vector<16x16xf32>
    %161 = arith.addf %160, %88 : vector<16x16xf32>
    %cst_95 = arith.constant dense<0xFF800000> : vector<16xf32>
    %162 = vector.multi_reduction <maximumf>, %161, %cst_95 [1] : vector<16x16xf32> to vector<16xf32>
    %163 = vector.shape_cast %162 : vector<16xf32> to vector<16x1xf32>
    %164 = vector.broadcast %163 : vector<16x1xf32> to vector<16x16xf32>
    %165 = arith.subf %161, %164 : vector<16x16xf32>
    %166 = math.exp %165 : vector<16x16xf32>
    %cst_96 = arith.constant dense<0.000000e+00> : vector<16xf32>
    %167 = vector.multi_reduction <add>, %166, %cst_96 [1] : vector<16x16xf32> to vector<16xf32>
    %168 = vector.shape_cast %167 : vector<16xf32> to vector<16x1xf32>
    %169 = tpu.reciprocal %168 {approx = true} : vector<16x1xf32> -> vector<16x1xf32>
    %170 = vector.broadcast %169 : vector<16x1xf32> to vector<16x16xf32>
    %171 = arith.mulf %166, %170 : vector<16x16xf32>
    %172 = arith.truncf %171 : vector<16x16xf32> to vector<16x16xbf16>
    %173 = vector.extract_strided_slice %154 {offsets = [0, 0], sizes = [16, 32], strides = [1, 1]} : vector<16x128xbf16> to vector<16x32xbf16>
    %cst_97 = arith.constant dense<0.000000e+00> : vector<16x32xf32>
    %174 = tpu.matmul %172, %173, %cst_97 {dimension_numbers = #tpu.dot_dimension_numbers<[1], [0], [0], [1], [0, 0, 1, 1], [], []>} : vector<16x16xbf16>, vector<16x32xbf16>, vector<16x32xf32> -> vector<16x32xf32>
    %175 = arith.truncf %174 : vector<16x32xf32> to vector<16x32xbf16>
    %176 = vector.extract_strided_slice %156 {offsets = [0, 0], sizes = [32, 128], strides = [1, 1]} : vector<128x128xbf16> to vector<32x128xbf16>
    %cst_98 = arith.constant dense<0.000000e+00> : vector<16x128xf32>
    %177 = tpu.matmul %175, %176, %cst_98 {dimension_numbers = #tpu.dot_dimension_numbers<[1], [0], [0], [1], [0, 0, 1, 1], [], []>} : vector<16x32xbf16>, vector<32x128xbf16>, vector<16x128xf32> -> vector<16x128xf32>
    %178 = arith.addf %157, %177 : vector<16x128xf32>
    %179 = vector.extract_strided_slice %138 {offsets = [0, 32], sizes = [16, 32], strides = [1, 1]} : vector<16x128xbf16> to vector<16x32xbf16>
    %180 = vector.extract_strided_slice %146 {offsets = [0, 32], sizes = [16, 32], strides = [1, 1]} : vector<16x128xbf16> to vector<16x32xbf16>
    %cst_99 = arith.constant dense<0.000000e+00> : vector<16x16xf32>
    %181 = tpu.matmul %179, %180, %cst_99 {dimension_numbers = #tpu.dot_dimension_numbers<[1], [1], [0], [0], [0, 0, 1, 0], [], []>} : vector<16x32xbf16>, vector<16x32xbf16>, vector<16x16xf32> -> vector<16x16xf32>
    %182 = arith.addf %181, %88 : vector<16x16xf32>
    %cst_100 = arith.constant dense<0xFF800000> : vector<16xf32>
    %183 = vector.multi_reduction <maximumf>, %182, %cst_100 [1] : vector<16x16xf32> to vector<16xf32>
    %184 = vector.shape_cast %183 : vector<16xf32> to vector<16x1xf32>
    %185 = vector.broadcast %184 : vector<16x1xf32> to vector<16x16xf32>
    %186 = arith.subf %182, %185 : vector<16x16xf32>
    %187 = math.exp %186 : vector<16x16xf32>
    %cst_101 = arith.constant dense<0.000000e+00> : vector<16xf32>
    %188 = vector.multi_reduction <add>, %187, %cst_101 [1] : vector<16x16xf32> to vector<16xf32>
    %189 = vector.shape_cast %188 : vector<16xf32> to vector<16x1xf32>
    %190 = tpu.reciprocal %189 {approx = true} : vector<16x1xf32> -> vector<16x1xf32>
    %191 = vector.broadcast %190 : vector<16x1xf32> to vector<16x16xf32>
    %192 = arith.mulf %187, %191 : vector<16x16xf32>
    %193 = arith.truncf %192 : vector<16x16xf32> to vector<16x16xbf16>
    %194 = vector.extract_strided_slice %154 {offsets = [0, 32], sizes = [16, 32], strides = [1, 1]} : vector<16x128xbf16> to vector<16x32xbf16>
    %cst_102 = arith.constant dense<0.000000e+00> : vector<16x32xf32>
    %195 = tpu.matmul %193, %194, %cst_102 {dimension_numbers = #tpu.dot_dimension_numbers<[1], [0], [0], [1], [0, 0, 1, 1], [], []>} : vector<16x16xbf16>, vector<16x32xbf16>, vector<16x32xf32> -> vector<16x32xf32>
    %196 = arith.truncf %195 : vector<16x32xf32> to vector<16x32xbf16>
    %197 = vector.extract_strided_slice %156 {offsets = [32, 0], sizes = [32, 128], strides = [1, 1]} : vector<128x128xbf16> to vector<32x128xbf16>
    %cst_103 = arith.constant dense<0.000000e+00> : vector<16x128xf32>
    %198 = tpu.matmul %196, %197, %cst_103 {dimension_numbers = #tpu.dot_dimension_numbers<[1], [0], [0], [1], [0, 0, 1, 1], [], []>} : vector<16x32xbf16>, vector<32x128xbf16>, vector<16x128xf32> -> vector<16x128xf32>
    %199 = arith.addf %178, %198 : vector<16x128xf32>
    %200 = vector.extract_strided_slice %138 {offsets = [0, 64], sizes = [16, 32], strides = [1, 1]} : vector<16x128xbf16> to vector<16x32xbf16>
    %201 = vector.extract_strided_slice %146 {offsets = [0, 64], sizes = [16, 32], strides = [1, 1]} : vector<16x128xbf16> to vector<16x32xbf16>
    %cst_104 = arith.constant dense<0.000000e+00> : vector<16x16xf32>
    %202 = tpu.matmul %200, %201, %cst_104 {dimension_numbers = #tpu.dot_dimension_numbers<[1], [1], [0], [0], [0, 0, 1, 0], [], []>} : vector<16x32xbf16>, vector<16x32xbf16>, vector<16x16xf32> -> vector<16x16xf32>
    %203 = arith.addf %202, %88 : vector<16x16xf32>
    %cst_105 = arith.constant dense<0xFF800000> : vector<16xf32>
    %204 = vector.multi_reduction <maximumf>, %203, %cst_105 [1] : vector<16x16xf32> to vector<16xf32>
    %205 = vector.shape_cast %204 : vector<16xf32> to vector<16x1xf32>
    %206 = vector.broadcast %205 : vector<16x1xf32> to vector<16x16xf32>
    %207 = arith.subf %203, %206 : vector<16x16xf32>
    %208 = math.exp %207 : vector<16x16xf32>
    %cst_106 = arith.constant dense<0.000000e+00> : vector<16xf32>
    %209 = vector.multi_reduction <add>, %208, %cst_106 [1] : vector<16x16xf32> to vector<16xf32>
    %210 = vector.shape_cast %209 : vector<16xf32> to vector<16x1xf32>
    %211 = tpu.reciprocal %210 {approx = true} : vector<16x1xf32> -> vector<16x1xf32>
    %212 = vector.broadcast %211 : vector<16x1xf32> to vector<16x16xf32>
    %213 = arith.mulf %208, %212 : vector<16x16xf32>
    %214 = arith.truncf %213 : vector<16x16xf32> to vector<16x16xbf16>
    %215 = vector.extract_strided_slice %154 {offsets = [0, 64], sizes = [16, 32], strides = [1, 1]} : vector<16x128xbf16> to vector<16x32xbf16>
    %cst_107 = arith.constant dense<0.000000e+00> : vector<16x32xf32>
    %216 = tpu.matmul %214, %215, %cst_107 {dimension_numbers = #tpu.dot_dimension_numbers<[1], [0], [0], [1], [0, 0, 1, 1], [], []>} : vector<16x16xbf16>, vector<16x32xbf16>, vector<16x32xf32> -> vector<16x32xf32>
    %217 = arith.truncf %216 : vector<16x32xf32> to vector<16x32xbf16>
    %218 = vector.extract_strided_slice %156 {offsets = [64, 0], sizes = [32, 128], strides = [1, 1]} : vector<128x128xbf16> to vector<32x128xbf16>
    %cst_108 = arith.constant dense<0.000000e+00> : vector<16x128xf32>
    %219 = tpu.matmul %217, %218, %cst_108 {dimension_numbers = #tpu.dot_dimension_numbers<[1], [0], [0], [1], [0, 0, 1, 1], [], []>} : vector<16x32xbf16>, vector<32x128xbf16>, vector<16x128xf32> -> vector<16x128xf32>
    %220 = arith.addf %199, %219 : vector<16x128xf32>
    %221 = vector.extract_strided_slice %138 {offsets = [0, 96], sizes = [16, 32], strides = [1, 1]} : vector<16x128xbf16> to vector<16x32xbf16>
    %222 = vector.extract_strided_slice %146 {offsets = [0, 96], sizes = [16, 32], strides = [1, 1]} : vector<16x128xbf16> to vector<16x32xbf16>
    %cst_109 = arith.constant dense<0.000000e+00> : vector<16x16xf32>
    %223 = tpu.matmul %221, %222, %cst_109 {dimension_numbers = #tpu.dot_dimension_numbers<[1], [1], [0], [0], [0, 0, 1, 0], [], []>} : vector<16x32xbf16>, vector<16x32xbf16>, vector<16x16xf32> -> vector<16x16xf32>
    %224 = arith.addf %223, %88 : vector<16x16xf32>
    %cst_110 = arith.constant dense<0xFF800000> : vector<16xf32>
    %225 = vector.multi_reduction <maximumf>, %224, %cst_110 [1] : vector<16x16xf32> to vector<16xf32>
    %226 = vector.shape_cast %225 : vector<16xf32> to vector<16x1xf32>
    %227 = vector.broadcast %226 : vector<16x1xf32> to vector<16x16xf32>
    %228 = arith.subf %224, %227 : vector<16x16xf32>
    %229 = math.exp %228 : vector<16x16xf32>
    %cst_111 = arith.constant dense<0.000000e+00> : vector<16xf32>
    %230 = vector.multi_reduction <add>, %229, %cst_111 [1] : vector<16x16xf32> to vector<16xf32>
    %231 = vector.shape_cast %230 : vector<16xf32> to vector<16x1xf32>
    %232 = tpu.reciprocal %231 {approx = true} : vector<16x1xf32> -> vector<16x1xf32>
    %233 = vector.broadcast %232 : vector<16x1xf32> to vector<16x16xf32>
    %234 = arith.mulf %229, %233 : vector<16x16xf32>
    %235 = arith.truncf %234 : vector<16x16xf32> to vector<16x16xbf16>
    %236 = vector.extract_strided_slice %154 {offsets = [0, 96], sizes = [16, 32], strides = [1, 1]} : vector<16x128xbf16> to vector<16x32xbf16>
    %cst_112 = arith.constant dense<0.000000e+00> : vector<16x32xf32>
    %237 = tpu.matmul %235, %236, %cst_112 {dimension_numbers = #tpu.dot_dimension_numbers<[1], [0], [0], [1], [0, 0, 1, 1], [], []>} : vector<16x16xbf16>, vector<16x32xbf16>, vector<16x32xf32> -> vector<16x32xf32>
    %238 = arith.truncf %237 : vector<16x32xf32> to vector<16x32xbf16>
    %239 = vector.extract_strided_slice %156 {offsets = [96, 0], sizes = [32, 128], strides = [1, 1]} : vector<128x128xbf16> to vector<32x128xbf16>
    %cst_113 = arith.constant dense<0.000000e+00> : vector<16x128xf32>
    %240 = tpu.matmul %238, %239, %cst_113 {dimension_numbers = #tpu.dot_dimension_numbers<[1], [0], [0], [1], [0, 0, 1, 1], [], []>} : vector<16x32xbf16>, vector<32x128xbf16>, vector<16x128xf32> -> vector<16x128xf32>
    %241 = arith.addf %220, %240 : vector<16x128xf32>
    %242 = arith.addf %78, %241 : vector<16x128xf32>
    %c0_114 = arith.constant 0 : index
    %c0_115 = arith.constant 0 : index
    %c0_116 = arith.constant 0 : index
    %243 = vector.load %arg30[%c0_114, %c0_115, %c0_116] : memref<2x1x128xf32, #tpu.memory_space<vmem>>, vector<1x1x128xf32>
    %244 = vector.shape_cast %243 : vector<1x1x128xf32> to vector<1x128xf32>
    %245 = vector.broadcast %244 : vector<1x128xf32> to vector<16x128xf32>
    %246 = arith.addf %242, %245 : vector<16x128xf32>
    %c0_117 = arith.constant 0 : index
    %c0_118 = arith.constant 0 : index
    %c0_119 = arith.constant 0 : index
    %247 = vector.load %arg31[%c0_117, %c0_118, %c0_119] : memref<2x1x128xf32, #tpu.memory_space<vmem>>, vector<1x1x128xf32>
    %248 = vector.shape_cast %247 : vector<1x1x128xf32> to vector<1x128xf32>
    %c0_120 = arith.constant 0 : index
    %c0_121 = arith.constant 0 : index
    %c0_122 = arith.constant 0 : index
    %249 = vector.load %arg32[%c0_120, %c0_121, %c0_122] : memref<2x1x128xf32, #tpu.memory_space<vmem>>, vector<1x1x128xf32>
    %250 = vector.shape_cast %249 : vector<1x1x128xf32> to vector<1x128xf32>
    %cst_123 = arith.constant dense<0.000000e+00> : vector<16xf32>
    %251 = vector.multi_reduction <add>, %246, %cst_123 [1] : vector<16x128xf32> to vector<16xf32>
    %252 = vector.shape_cast %251 : vector<16xf32> to vector<16x1xf32>
    %cst_124 = arith.constant 1.280000e+02 : f32
    %253 = vector.broadcast %cst_124 : f32 to vector<16x1xf32>
    %254 = arith.divf %252, %253 : vector<16x1xf32>
    %255 = vector.broadcast %254 : vector<16x1xf32> to vector<16x128xf32>
    %256 = arith.subf %246, %255 : vector<16x128xf32>
    %257 = arith.mulf %256, %256 : vector<16x128xf32>
    %cst_125 = arith.constant dense<0.000000e+00> : vector<16xf32>
    %258 = vector.multi_reduction <add>, %257, %cst_125 [1] : vector<16x128xf32> to vector<16xf32>
    %259 = vector.shape_cast %258 : vector<16xf32> to vector<16x1xf32>
    %cst_126 = arith.constant 1.280000e+02 : f32
    %260 = vector.broadcast %cst_126 : f32 to vector<16x1xf32>
    %261 = arith.divf %259, %260 : vector<16x1xf32>
    %cst_127 = arith.constant 9.99999974E-6 : f32
    %262 = vector.broadcast %cst_127 : f32 to vector<16x1xf32>
    %263 = arith.addf %261, %262 : vector<16x1xf32>
    %264 = math.rsqrt %263 : vector<16x1xf32>
    %265 = vector.broadcast %264 : vector<16x1xf32> to vector<16x128xf32>
    %266 = arith.mulf %256, %265 : vector<16x128xf32>
    %267 = vector.broadcast %248 : vector<1x128xf32> to vector<16x128xf32>
    %268 = arith.mulf %266, %267 : vector<16x128xf32>
    %269 = vector.broadcast %250 : vector<1x128xf32> to vector<16x128xf32>
    %270 = arith.addf %268, %269 : vector<16x128xf32>
    %271 = arith.truncf %270 : vector<16x128xf32> to vector<16x128xbf16>
    %c0_128 = arith.constant 0 : index
    %c0_129 = arith.constant 0 : index
    %c0_130 = arith.constant 0 : index
    %272 = vector.load %arg33[%c0_128, %c0_129, %c0_130] : memref<2x128x512xbf16, #tpu.memory_space<vmem>>, vector<1x128x512xbf16>
    %273 = vector.shape_cast %272 : vector<1x128x512xbf16> to vector<128x512xbf16>
    %cst_131 = arith.constant dense<0.000000e+00> : vector<16x512xf32>
    %274 = tpu.matmul %271, %273, %cst_131 {dimension_numbers = #tpu.dot_dimension_numbers<[1], [0], [0], [1], [0, 0, 1, 1], [], []>} : vector<16x128xbf16>, vector<128x512xbf16>, vector<16x512xf32> -> vector<16x512xf32>
    %c0_132 = arith.constant 0 : index
    %c0_133 = arith.constant 0 : index
    %c0_134 = arith.constant 0 : index
    %275 = vector.load %arg34[%c0_132, %c0_133, %c0_134] : memref<2x1x512xf32, #tpu.memory_space<vmem>>, vector<1x1x512xf32>
    %276 = vector.shape_cast %275 : vector<1x1x512xf32> to vector<1x512xf32>
    %277 = vector.broadcast %276 : vector<1x512xf32> to vector<16x512xf32>
    %278 = arith.addf %274, %277 : vector<16x512xf32>
    %279 = arith.mulf %278, %278 : vector<16x512xf32>
    %280 = arith.mulf %278, %279 : vector<16x512xf32>
    %cst_135 = arith.constant 4.471500e-02 : f32
    %281 = vector.broadcast %cst_135 : f32 to vector<16x512xf32>
    %282 = arith.mulf %281, %280 : vector<16x512xf32>
    %283 = arith.addf %278, %282 : vector<16x512xf32>
    %cst_136 = arith.constant 0.797884583 : f32
    %284 = vector.broadcast %cst_136 : f32 to vector<16x512xf32>
    %285 = arith.mulf %284, %283 : vector<16x512xf32>
    %286 = math.tanh %285 : vector<16x512xf32>
    %cst_137 = arith.constant 1.000000e+00 : f32
    %287 = vector.broadcast %cst_137 : f32 to vector<16x512xf32>
    %288 = arith.addf %287, %286 : vector<16x512xf32>
    %cst_138 = arith.constant 5.000000e-01 : f32
    %289 = vector.broadcast %cst_138 : f32 to vector<16x512xf32>
    %290 = arith.mulf %289, %288 : vector<16x512xf32>
    %291 = arith.mulf %278, %290 : vector<16x512xf32>
    %292 = arith.truncf %291 : vector<16x512xf32> to vector<16x512xbf16>
    %c0_139 = arith.constant 0 : index
    %c0_140 = arith.constant 0 : index
    %c0_141 = arith.constant 0 : index
    %293 = vector.load %arg35[%c0_139, %c0_140, %c0_141] : memref<2x512x128xbf16, #tpu.memory_space<vmem>>, vector<1x512x128xbf16>
    %294 = vector.shape_cast %293 : vector<1x512x128xbf16> to vector<512x128xbf16>
    %cst_142 = arith.constant dense<0.000000e+00> : vector<16x128xf32>
    %295 = tpu.matmul %292, %294, %cst_142 {dimension_numbers = #tpu.dot_dimension_numbers<[1], [0], [0], [1], [0, 0, 1, 1], [], []>} : vector<16x512xbf16>, vector<512x128xbf16>, vector<16x128xf32> -> vector<16x128xf32>
    %296 = arith.addf %246, %295 : vector<16x128xf32>
    %c0_143 = arith.constant 0 : index
    %c0_144 = arith.constant 0 : index
    %c0_145 = arith.constant 0 : index
    %297 = vector.load %arg36[%c0_143, %c0_144, %c0_145] : memref<2x1x128xf32, #tpu.memory_space<vmem>>, vector<1x1x128xf32>
    %298 = vector.shape_cast %297 : vector<1x1x128xf32> to vector<1x128xf32>
    %299 = vector.broadcast %298 : vector<1x128xf32> to vector<16x128xf32>
    %300 = arith.addf %296, %299 : vector<16x128xf32>
    %c1 = arith.constant 1 : index
    %c0_146 = arith.constant 0 : index
    %c0_147 = arith.constant 0 : index
    %301 = vector.load %arg21[%c1, %c0_146, %c0_147] : memref<2x1x128xf32, #tpu.memory_space<vmem>>, vector<1x1x128xf32>
    %302 = vector.shape_cast %301 : vector<1x1x128xf32> to vector<1x128xf32>
    %c1_148 = arith.constant 1 : index
    %c0_149 = arith.constant 0 : index
    %c0_150 = arith.constant 0 : index
    %303 = vector.load %arg22[%c1_148, %c0_149, %c0_150] : memref<2x1x128xf32, #tpu.memory_space<vmem>>, vector<1x1x128xf32>
    %304 = vector.shape_cast %303 : vector<1x1x128xf32> to vector<1x128xf32>
    %cst_151 = arith.constant dense<0.000000e+00> : vector<16xf32>
    %305 = vector.multi_reduction <add>, %300, %cst_151 [1] : vector<16x128xf32> to vector<16xf32>
    %306 = vector.shape_cast %305 : vector<16xf32> to vector<16x1xf32>
    %cst_152 = arith.constant 1.280000e+02 : f32
    %307 = vector.broadcast %cst_152 : f32 to vector<16x1xf32>
    %308 = arith.divf %306, %307 : vector<16x1xf32>
    %309 = vector.broadcast %308 : vector<16x1xf32> to vector<16x128xf32>
    %310 = arith.subf %300, %309 : vector<16x128xf32>
    %311 = arith.mulf %310, %310 : vector<16x128xf32>
    %cst_153 = arith.constant dense<0.000000e+00> : vector<16xf32>
    %312 = vector.multi_reduction <add>, %311, %cst_153 [1] : vector<16x128xf32> to vector<16xf32>
    %313 = vector.shape_cast %312 : vector<16xf32> to vector<16x1xf32>
    %cst_154 = arith.constant 1.280000e+02 : f32
    %314 = vector.broadcast %cst_154 : f32 to vector<16x1xf32>
    %315 = arith.divf %313, %314 : vector<16x1xf32>
    %cst_155 = arith.constant 9.99999974E-6 : f32
    %316 = vector.broadcast %cst_155 : f32 to vector<16x1xf32>
    %317 = arith.addf %315, %316 : vector<16x1xf32>
    %318 = math.rsqrt %317 : vector<16x1xf32>
    %319 = vector.broadcast %318 : vector<16x1xf32> to vector<16x128xf32>
    %320 = arith.mulf %310, %319 : vector<16x128xf32>
    %321 = vector.broadcast %302 : vector<1x128xf32> to vector<16x128xf32>
    %322 = arith.mulf %320, %321 : vector<16x128xf32>
    %323 = vector.broadcast %304 : vector<1x128xf32> to vector<16x128xf32>
    %324 = arith.addf %322, %323 : vector<16x128xf32>
    %325 = arith.truncf %324 : vector<16x128xf32> to vector<16x128xbf16>
    %c1_156 = arith.constant 1 : index
    %c0_157 = arith.constant 0 : index
    %c0_158 = arith.constant 0 : index
    %326 = vector.load %arg23[%c1_156, %c0_157, %c0_158] : memref<2x128x128xbf16, #tpu.memory_space<vmem>>, vector<1x128x128xbf16>
    %327 = vector.shape_cast %326 : vector<1x128x128xbf16> to vector<128x128xbf16>
    %cst_159 = arith.constant dense<0.000000e+00> : vector<16x128xf32>
    %328 = tpu.matmul %325, %327, %cst_159 {dimension_numbers = #tpu.dot_dimension_numbers<[1], [0], [0], [1], [0, 0, 1, 1], [], []>} : vector<16x128xbf16>, vector<128x128xbf16>, vector<16x128xf32> -> vector<16x128xf32>
    %c1_160 = arith.constant 1 : index
    %c0_161 = arith.constant 0 : index
    %c0_162 = arith.constant 0 : index
    %329 = vector.load %arg24[%c1_160, %c0_161, %c0_162] : memref<2x1x128xf32, #tpu.memory_space<vmem>>, vector<1x1x128xf32>
    %330 = vector.shape_cast %329 : vector<1x1x128xf32> to vector<1x128xf32>
    %331 = vector.broadcast %330 : vector<1x128xf32> to vector<16x128xf32>
    %332 = arith.addf %328, %331 : vector<16x128xf32>
    %c1_163 = arith.constant 1 : index
    %c0_164 = arith.constant 0 : index
    %c0_165 = arith.constant 0 : index
    %333 = vector.load %arg25[%c1_163, %c0_164, %c0_165] : memref<2x128x128xbf16, #tpu.memory_space<vmem>>, vector<1x128x128xbf16>
    %334 = vector.shape_cast %333 : vector<1x128x128xbf16> to vector<128x128xbf16>
    %cst_166 = arith.constant dense<0.000000e+00> : vector<16x128xf32>
    %335 = tpu.matmul %325, %334, %cst_166 {dimension_numbers = #tpu.dot_dimension_numbers<[1], [0], [0], [1], [0, 0, 1, 1], [], []>} : vector<16x128xbf16>, vector<128x128xbf16>, vector<16x128xf32> -> vector<16x128xf32>
    %c1_167 = arith.constant 1 : index
    %c0_168 = arith.constant 0 : index
    %c0_169 = arith.constant 0 : index
    %336 = vector.load %arg26[%c1_167, %c0_168, %c0_169] : memref<2x1x128xf32, #tpu.memory_space<vmem>>, vector<1x1x128xf32>
    %337 = vector.shape_cast %336 : vector<1x1x128xf32> to vector<1x128xf32>
    %338 = vector.broadcast %337 : vector<1x128xf32> to vector<16x128xf32>
    %339 = arith.addf %335, %338 : vector<16x128xf32>
    %340 = arith.mulf %332, %89 : vector<16x128xf32>
    %c112_i32_170 = arith.constant 112 : i32
    %341 = tpu.dynamic_rotate %332 by %c112_i32_170 dim 1 : vector<16x128xf32>, i32 -> vector<16x128xf32>
    %342 = arith.mulf %341, %90 : vector<16x128xf32>
    %343 = arith.addf %340, %342 : vector<16x128xf32>
    %c16_i32_171 = arith.constant 16 : i32
    %344 = tpu.dynamic_rotate %332 by %c16_i32_171 dim 1 : vector<16x128xf32>, i32 -> vector<16x128xf32>
    %345 = arith.mulf %344, %91 : vector<16x128xf32>
    %346 = arith.addf %343, %345 : vector<16x128xf32>
    %347 = arith.truncf %346 : vector<16x128xf32> to vector<16x128xbf16>
    %348 = arith.mulf %339, %89 : vector<16x128xf32>
    %c112_i32_172 = arith.constant 112 : i32
    %349 = tpu.dynamic_rotate %339 by %c112_i32_172 dim 1 : vector<16x128xf32>, i32 -> vector<16x128xf32>
    %350 = arith.mulf %349, %90 : vector<16x128xf32>
    %351 = arith.addf %348, %350 : vector<16x128xf32>
    %c16_i32_173 = arith.constant 16 : i32
    %352 = tpu.dynamic_rotate %339 by %c16_i32_173 dim 1 : vector<16x128xf32>, i32 -> vector<16x128xf32>
    %353 = arith.mulf %352, %91 : vector<16x128xf32>
    %354 = arith.addf %351, %353 : vector<16x128xf32>
    %355 = arith.truncf %354 : vector<16x128xf32> to vector<16x128xbf16>
    %c1_174 = arith.constant 1 : index
    %c0_175 = arith.constant 0 : index
    %c0_176 = arith.constant 0 : index
    %356 = vector.load %arg27[%c1_174, %c0_175, %c0_176] : memref<2x128x128xbf16, #tpu.memory_space<vmem>>, vector<1x128x128xbf16>
    %357 = vector.shape_cast %356 : vector<1x128x128xbf16> to vector<128x128xbf16>
    %cst_177 = arith.constant dense<0.000000e+00> : vector<16x128xf32>
    %358 = tpu.matmul %325, %357, %cst_177 {dimension_numbers = #tpu.dot_dimension_numbers<[1], [0], [0], [1], [0, 0, 1, 1], [], []>} : vector<16x128xbf16>, vector<128x128xbf16>, vector<16x128xf32> -> vector<16x128xf32>
    %c1_178 = arith.constant 1 : index
    %c0_179 = arith.constant 0 : index
    %c0_180 = arith.constant 0 : index
    %359 = vector.load %arg28[%c1_178, %c0_179, %c0_180] : memref<2x1x128xf32, #tpu.memory_space<vmem>>, vector<1x1x128xf32>
    %360 = vector.shape_cast %359 : vector<1x1x128xf32> to vector<1x128xf32>
    %361 = vector.broadcast %360 : vector<1x128xf32> to vector<16x128xf32>
    %362 = arith.addf %358, %361 : vector<16x128xf32>
    %363 = arith.truncf %362 : vector<16x128xf32> to vector<16x128xbf16>
    %c1_181 = arith.constant 1 : index
    %c0_182 = arith.constant 0 : index
    %c0_183 = arith.constant 0 : index
    %364 = vector.load %arg29[%c1_181, %c0_182, %c0_183] : memref<2x128x128xbf16, #tpu.memory_space<vmem>>, vector<1x128x128xbf16>
    %365 = vector.shape_cast %364 : vector<1x128x128xbf16> to vector<128x128xbf16>
    %cst_184 = arith.constant 0.000000e+00 : f32
    %366 = vector.broadcast %cst_184 : f32 to vector<16x128xf32>
    %367 = vector.extract_strided_slice %347 {offsets = [0, 0], sizes = [16, 32], strides = [1, 1]} : vector<16x128xbf16> to vector<16x32xbf16>
    %368 = vector.extract_strided_slice %355 {offsets = [0, 0], sizes = [16, 32], strides = [1, 1]} : vector<16x128xbf16> to vector<16x32xbf16>
    %cst_185 = arith.constant dense<0.000000e+00> : vector<16x16xf32>
    %369 = tpu.matmul %367, %368, %cst_185 {dimension_numbers = #tpu.dot_dimension_numbers<[1], [1], [0], [0], [0, 0, 1, 0], [], []>} : vector<16x32xbf16>, vector<16x32xbf16>, vector<16x16xf32> -> vector<16x16xf32>
    %370 = arith.addf %369, %88 : vector<16x16xf32>
    %cst_186 = arith.constant dense<0xFF800000> : vector<16xf32>
    %371 = vector.multi_reduction <maximumf>, %370, %cst_186 [1] : vector<16x16xf32> to vector<16xf32>
    %372 = vector.shape_cast %371 : vector<16xf32> to vector<16x1xf32>
    %373 = vector.broadcast %372 : vector<16x1xf32> to vector<16x16xf32>
    %374 = arith.subf %370, %373 : vector<16x16xf32>
    %375 = math.exp %374 : vector<16x16xf32>
    %cst_187 = arith.constant dense<0.000000e+00> : vector<16xf32>
    %376 = vector.multi_reduction <add>, %375, %cst_187 [1] : vector<16x16xf32> to vector<16xf32>
    %377 = vector.shape_cast %376 : vector<16xf32> to vector<16x1xf32>
    %378 = tpu.reciprocal %377 {approx = true} : vector<16x1xf32> -> vector<16x1xf32>
    %379 = vector.broadcast %378 : vector<16x1xf32> to vector<16x16xf32>
    %380 = arith.mulf %375, %379 : vector<16x16xf32>
    %381 = arith.truncf %380 : vector<16x16xf32> to vector<16x16xbf16>
    %382 = vector.extract_strided_slice %363 {offsets = [0, 0], sizes = [16, 32], strides = [1, 1]} : vector<16x128xbf16> to vector<16x32xbf16>
    %cst_188 = arith.constant dense<0.000000e+00> : vector<16x32xf32>
    %383 = tpu.matmul %381, %382, %cst_188 {dimension_numbers = #tpu.dot_dimension_numbers<[1], [0], [0], [1], [0, 0, 1, 1], [], []>} : vector<16x16xbf16>, vector<16x32xbf16>, vector<16x32xf32> -> vector<16x32xf32>
    %384 = arith.truncf %383 : vector<16x32xf32> to vector<16x32xbf16>
    %385 = vector.extract_strided_slice %365 {offsets = [0, 0], sizes = [32, 128], strides = [1, 1]} : vector<128x128xbf16> to vector<32x128xbf16>
    %cst_189 = arith.constant dense<0.000000e+00> : vector<16x128xf32>
    %386 = tpu.matmul %384, %385, %cst_189 {dimension_numbers = #tpu.dot_dimension_numbers<[1], [0], [0], [1], [0, 0, 1, 1], [], []>} : vector<16x32xbf16>, vector<32x128xbf16>, vector<16x128xf32> -> vector<16x128xf32>
    %387 = arith.addf %366, %386 : vector<16x128xf32>
    %388 = vector.extract_strided_slice %347 {offsets = [0, 32], sizes = [16, 32], strides = [1, 1]} : vector<16x128xbf16> to vector<16x32xbf16>
    %389 = vector.extract_strided_slice %355 {offsets = [0, 32], sizes = [16, 32], strides = [1, 1]} : vector<16x128xbf16> to vector<16x32xbf16>
    %cst_190 = arith.constant dense<0.000000e+00> : vector<16x16xf32>
    %390 = tpu.matmul %388, %389, %cst_190 {dimension_numbers = #tpu.dot_dimension_numbers<[1], [1], [0], [0], [0, 0, 1, 0], [], []>} : vector<16x32xbf16>, vector<16x32xbf16>, vector<16x16xf32> -> vector<16x16xf32>
    %391 = arith.addf %390, %88 : vector<16x16xf32>
    %cst_191 = arith.constant dense<0xFF800000> : vector<16xf32>
    %392 = vector.multi_reduction <maximumf>, %391, %cst_191 [1] : vector<16x16xf32> to vector<16xf32>
    %393 = vector.shape_cast %392 : vector<16xf32> to vector<16x1xf32>
    %394 = vector.broadcast %393 : vector<16x1xf32> to vector<16x16xf32>
    %395 = arith.subf %391, %394 : vector<16x16xf32>
    %396 = math.exp %395 : vector<16x16xf32>
    %cst_192 = arith.constant dense<0.000000e+00> : vector<16xf32>
    %397 = vector.multi_reduction <add>, %396, %cst_192 [1] : vector<16x16xf32> to vector<16xf32>
    %398 = vector.shape_cast %397 : vector<16xf32> to vector<16x1xf32>
    %399 = tpu.reciprocal %398 {approx = true} : vector<16x1xf32> -> vector<16x1xf32>
    %400 = vector.broadcast %399 : vector<16x1xf32> to vector<16x16xf32>
    %401 = arith.mulf %396, %400 : vector<16x16xf32>
    %402 = arith.truncf %401 : vector<16x16xf32> to vector<16x16xbf16>
    %403 = vector.extract_strided_slice %363 {offsets = [0, 32], sizes = [16, 32], strides = [1, 1]} : vector<16x128xbf16> to vector<16x32xbf16>
    %cst_193 = arith.constant dense<0.000000e+00> : vector<16x32xf32>
    %404 = tpu.matmul %402, %403, %cst_193 {dimension_numbers = #tpu.dot_dimension_numbers<[1], [0], [0], [1], [0, 0, 1, 1], [], []>} : vector<16x16xbf16>, vector<16x32xbf16>, vector<16x32xf32> -> vector<16x32xf32>
    %405 = arith.truncf %404 : vector<16x32xf32> to vector<16x32xbf16>
    %406 = vector.extract_strided_slice %365 {offsets = [32, 0], sizes = [32, 128], strides = [1, 1]} : vector<128x128xbf16> to vector<32x128xbf16>
    %cst_194 = arith.constant dense<0.000000e+00> : vector<16x128xf32>
    %407 = tpu.matmul %405, %406, %cst_194 {dimension_numbers = #tpu.dot_dimension_numbers<[1], [0], [0], [1], [0, 0, 1, 1], [], []>} : vector<16x32xbf16>, vector<32x128xbf16>, vector<16x128xf32> -> vector<16x128xf32>
    %408 = arith.addf %387, %407 : vector<16x128xf32>
    %409 = vector.extract_strided_slice %347 {offsets = [0, 64], sizes = [16, 32], strides = [1, 1]} : vector<16x128xbf16> to vector<16x32xbf16>
    %410 = vector.extract_strided_slice %355 {offsets = [0, 64], sizes = [16, 32], strides = [1, 1]} : vector<16x128xbf16> to vector<16x32xbf16>
    %cst_195 = arith.constant dense<0.000000e+00> : vector<16x16xf32>
    %411 = tpu.matmul %409, %410, %cst_195 {dimension_numbers = #tpu.dot_dimension_numbers<[1], [1], [0], [0], [0, 0, 1, 0], [], []>} : vector<16x32xbf16>, vector<16x32xbf16>, vector<16x16xf32> -> vector<16x16xf32>
    %412 = arith.addf %411, %88 : vector<16x16xf32>
    %cst_196 = arith.constant dense<0xFF800000> : vector<16xf32>
    %413 = vector.multi_reduction <maximumf>, %412, %cst_196 [1] : vector<16x16xf32> to vector<16xf32>
    %414 = vector.shape_cast %413 : vector<16xf32> to vector<16x1xf32>
    %415 = vector.broadcast %414 : vector<16x1xf32> to vector<16x16xf32>
    %416 = arith.subf %412, %415 : vector<16x16xf32>
    %417 = math.exp %416 : vector<16x16xf32>
    %cst_197 = arith.constant dense<0.000000e+00> : vector<16xf32>
    %418 = vector.multi_reduction <add>, %417, %cst_197 [1] : vector<16x16xf32> to vector<16xf32>
    %419 = vector.shape_cast %418 : vector<16xf32> to vector<16x1xf32>
    %420 = tpu.reciprocal %419 {approx = true} : vector<16x1xf32> -> vector<16x1xf32>
    %421 = vector.broadcast %420 : vector<16x1xf32> to vector<16x16xf32>
    %422 = arith.mulf %417, %421 : vector<16x16xf32>
    %423 = arith.truncf %422 : vector<16x16xf32> to vector<16x16xbf16>
    %424 = vector.extract_strided_slice %363 {offsets = [0, 64], sizes = [16, 32], strides = [1, 1]} : vector<16x128xbf16> to vector<16x32xbf16>
    %cst_198 = arith.constant dense<0.000000e+00> : vector<16x32xf32>
    %425 = tpu.matmul %423, %424, %cst_198 {dimension_numbers = #tpu.dot_dimension_numbers<[1], [0], [0], [1], [0, 0, 1, 1], [], []>} : vector<16x16xbf16>, vector<16x32xbf16>, vector<16x32xf32> -> vector<16x32xf32>
    %426 = arith.truncf %425 : vector<16x32xf32> to vector<16x32xbf16>
    %427 = vector.extract_strided_slice %365 {offsets = [64, 0], sizes = [32, 128], strides = [1, 1]} : vector<128x128xbf16> to vector<32x128xbf16>
    %cst_199 = arith.constant dense<0.000000e+00> : vector<16x128xf32>
    %428 = tpu.matmul %426, %427, %cst_199 {dimension_numbers = #tpu.dot_dimension_numbers<[1], [0], [0], [1], [0, 0, 1, 1], [], []>} : vector<16x32xbf16>, vector<32x128xbf16>, vector<16x128xf32> -> vector<16x128xf32>
    %429 = arith.addf %408, %428 : vector<16x128xf32>
    %430 = vector.extract_strided_slice %347 {offsets = [0, 96], sizes = [16, 32], strides = [1, 1]} : vector<16x128xbf16> to vector<16x32xbf16>
    %431 = vector.extract_strided_slice %355 {offsets = [0, 96], sizes = [16, 32], strides = [1, 1]} : vector<16x128xbf16> to vector<16x32xbf16>
    %cst_200 = arith.constant dense<0.000000e+00> : vector<16x16xf32>
    %432 = tpu.matmul %430, %431, %cst_200 {dimension_numbers = #tpu.dot_dimension_numbers<[1], [1], [0], [0], [0, 0, 1, 0], [], []>} : vector<16x32xbf16>, vector<16x32xbf16>, vector<16x16xf32> -> vector<16x16xf32>
    %433 = arith.addf %432, %88 : vector<16x16xf32>
    %cst_201 = arith.constant dense<0xFF800000> : vector<16xf32>
    %434 = vector.multi_reduction <maximumf>, %433, %cst_201 [1] : vector<16x16xf32> to vector<16xf32>
    %435 = vector.shape_cast %434 : vector<16xf32> to vector<16x1xf32>
    %436 = vector.broadcast %435 : vector<16x1xf32> to vector<16x16xf32>
    %437 = arith.subf %433, %436 : vector<16x16xf32>
    %438 = math.exp %437 : vector<16x16xf32>
    %cst_202 = arith.constant dense<0.000000e+00> : vector<16xf32>
    %439 = vector.multi_reduction <add>, %438, %cst_202 [1] : vector<16x16xf32> to vector<16xf32>
    %440 = vector.shape_cast %439 : vector<16xf32> to vector<16x1xf32>
    %441 = tpu.reciprocal %440 {approx = true} : vector<16x1xf32> -> vector<16x1xf32>
    %442 = vector.broadcast %441 : vector<16x1xf32> to vector<16x16xf32>
    %443 = arith.mulf %438, %442 : vector<16x16xf32>
    %444 = arith.truncf %443 : vector<16x16xf32> to vector<16x16xbf16>
    %445 = vector.extract_strided_slice %363 {offsets = [0, 96], sizes = [16, 32], strides = [1, 1]} : vector<16x128xbf16> to vector<16x32xbf16>
    %cst_203 = arith.constant dense<0.000000e+00> : vector<16x32xf32>
    %446 = tpu.matmul %444, %445, %cst_203 {dimension_numbers = #tpu.dot_dimension_numbers<[1], [0], [0], [1], [0, 0, 1, 1], [], []>} : vector<16x16xbf16>, vector<16x32xbf16>, vector<16x32xf32> -> vector<16x32xf32>
    %447 = arith.truncf %446 : vector<16x32xf32> to vector<16x32xbf16>
    %448 = vector.extract_strided_slice %365 {offsets = [96, 0], sizes = [32, 128], strides = [1, 1]} : vector<128x128xbf16> to vector<32x128xbf16>
    %cst_204 = arith.constant dense<0.000000e+00> : vector<16x128xf32>
    %449 = tpu.matmul %447, %448, %cst_204 {dimension_numbers = #tpu.dot_dimension_numbers<[1], [0], [0], [1], [0, 0, 1, 1], [], []>} : vector<16x32xbf16>, vector<32x128xbf16>, vector<16x128xf32> -> vector<16x128xf32>
    %450 = arith.addf %429, %449 : vector<16x128xf32>
    %451 = arith.addf %300, %450 : vector<16x128xf32>
    %c1_205 = arith.constant 1 : index
    %c0_206 = arith.constant 0 : index
    %c0_207 = arith.constant 0 : index
    %452 = vector.load %arg30[%c1_205, %c0_206, %c0_207] : memref<2x1x128xf32, #tpu.memory_space<vmem>>, vector<1x1x128xf32>
    %453 = vector.shape_cast %452 : vector<1x1x128xf32> to vector<1x128xf32>
    %454 = vector.broadcast %453 : vector<1x128xf32> to vector<16x128xf32>
    %455 = arith.addf %451, %454 : vector<16x128xf32>
    %c1_208 = arith.constant 1 : index
    %c0_209 = arith.constant 0 : index
    %c0_210 = arith.constant 0 : index
    %456 = vector.load %arg31[%c1_208, %c0_209, %c0_210] : memref<2x1x128xf32, #tpu.memory_space<vmem>>, vector<1x1x128xf32>
    %457 = vector.shape_cast %456 : vector<1x1x128xf32> to vector<1x128xf32>
    %c1_211 = arith.constant 1 : index
    %c0_212 = arith.constant 0 : index
    %c0_213 = arith.constant 0 : index
    %458 = vector.load %arg32[%c1_211, %c0_212, %c0_213] : memref<2x1x128xf32, #tpu.memory_space<vmem>>, vector<1x1x128xf32>
    %459 = vector.shape_cast %458 : vector<1x1x128xf32> to vector<1x128xf32>
    %cst_214 = arith.constant dense<0.000000e+00> : vector<16xf32>
    %460 = vector.multi_reduction <add>, %455, %cst_214 [1] : vector<16x128xf32> to vector<16xf32>
    %461 = vector.shape_cast %460 : vector<16xf32> to vector<16x1xf32>
    %cst_215 = arith.constant 1.280000e+02 : f32
    %462 = vector.broadcast %cst_215 : f32 to vector<16x1xf32>
    %463 = arith.divf %461, %462 : vector<16x1xf32>
    %464 = vector.broadcast %463 : vector<16x1xf32> to vector<16x128xf32>
    %465 = arith.subf %455, %464 : vector<16x128xf32>
    %466 = arith.mulf %465, %465 : vector<16x128xf32>
    %cst_216 = arith.constant dense<0.000000e+00> : vector<16xf32>
    %467 = vector.multi_reduction <add>, %466, %cst_216 [1] : vector<16x128xf32> to vector<16xf32>
    %468 = vector.shape_cast %467 : vector<16xf32> to vector<16x1xf32>
    %cst_217 = arith.constant 1.280000e+02 : f32
    %469 = vector.broadcast %cst_217 : f32 to vector<16x1xf32>
    %470 = arith.divf %468, %469 : vector<16x1xf32>
    %cst_218 = arith.constant 9.99999974E-6 : f32
    %471 = vector.broadcast %cst_218 : f32 to vector<16x1xf32>
    %472 = arith.addf %470, %471 : vector<16x1xf32>
    %473 = math.rsqrt %472 : vector<16x1xf32>
    %474 = vector.broadcast %473 : vector<16x1xf32> to vector<16x128xf32>
    %475 = arith.mulf %465, %474 : vector<16x128xf32>
    %476 = vector.broadcast %457 : vector<1x128xf32> to vector<16x128xf32>
    %477 = arith.mulf %475, %476 : vector<16x128xf32>
    %478 = vector.broadcast %459 : vector<1x128xf32> to vector<16x128xf32>
    %479 = arith.addf %477, %478 : vector<16x128xf32>
    %480 = arith.truncf %479 : vector<16x128xf32> to vector<16x128xbf16>
    %c1_219 = arith.constant 1 : index
    %c0_220 = arith.constant 0 : index
    %c0_221 = arith.constant 0 : index
    %481 = vector.load %arg33[%c1_219, %c0_220, %c0_221] : memref<2x128x512xbf16, #tpu.memory_space<vmem>>, vector<1x128x512xbf16>
    %482 = vector.shape_cast %481 : vector<1x128x512xbf16> to vector<128x512xbf16>
    %cst_222 = arith.constant dense<0.000000e+00> : vector<16x512xf32>
    %483 = tpu.matmul %480, %482, %cst_222 {dimension_numbers = #tpu.dot_dimension_numbers<[1], [0], [0], [1], [0, 0, 1, 1], [], []>} : vector<16x128xbf16>, vector<128x512xbf16>, vector<16x512xf32> -> vector<16x512xf32>
    %c1_223 = arith.constant 1 : index
    %c0_224 = arith.constant 0 : index
    %c0_225 = arith.constant 0 : index
    %484 = vector.load %arg34[%c1_223, %c0_224, %c0_225] : memref<2x1x512xf32, #tpu.memory_space<vmem>>, vector<1x1x512xf32>
    %485 = vector.shape_cast %484 : vector<1x1x512xf32> to vector<1x512xf32>
    %486 = vector.broadcast %485 : vector<1x512xf32> to vector<16x512xf32>
    %487 = arith.addf %483, %486 : vector<16x512xf32>
    %488 = arith.mulf %487, %487 : vector<16x512xf32>
    %489 = arith.mulf %487, %488 : vector<16x512xf32>
    %cst_226 = arith.constant 4.471500e-02 : f32
    %490 = vector.broadcast %cst_226 : f32 to vector<16x512xf32>
    %491 = arith.mulf %490, %489 : vector<16x512xf32>
    %492 = arith.addf %487, %491 : vector<16x512xf32>
    %cst_227 = arith.constant 0.797884583 : f32
    %493 = vector.broadcast %cst_227 : f32 to vector<16x512xf32>
    %494 = arith.mulf %493, %492 : vector<16x512xf32>
    %495 = math.tanh %494 : vector<16x512xf32>
    %cst_228 = arith.constant 1.000000e+00 : f32
    %496 = vector.broadcast %cst_228 : f32 to vector<16x512xf32>
    %497 = arith.addf %496, %495 : vector<16x512xf32>
    %cst_229 = arith.constant 5.000000e-01 : f32
    %498 = vector.broadcast %cst_229 : f32 to vector<16x512xf32>
    %499 = arith.mulf %498, %497 : vector<16x512xf32>
    %500 = arith.mulf %487, %499 : vector<16x512xf32>
    %501 = arith.truncf %500 : vector<16x512xf32> to vector<16x512xbf16>
    %c1_230 = arith.constant 1 : index
    %c0_231 = arith.constant 0 : index
    %c0_232 = arith.constant 0 : index
    %502 = vector.load %arg35[%c1_230, %c0_231, %c0_232] : memref<2x512x128xbf16, #tpu.memory_space<vmem>>, vector<1x512x128xbf16>
    %503 = vector.shape_cast %502 : vector<1x512x128xbf16> to vector<512x128xbf16>
    %cst_233 = arith.constant dense<0.000000e+00> : vector<16x128xf32>
    %504 = tpu.matmul %501, %503, %cst_233 {dimension_numbers = #tpu.dot_dimension_numbers<[1], [0], [0], [1], [0, 0, 1, 1], [], []>} : vector<16x512xbf16>, vector<512x128xbf16>, vector<16x128xf32> -> vector<16x128xf32>
    %505 = arith.addf %455, %504 : vector<16x128xf32>
    %c1_234 = arith.constant 1 : index
    %c0_235 = arith.constant 0 : index
    %c0_236 = arith.constant 0 : index
    %506 = vector.load %arg36[%c1_234, %c0_235, %c0_236] : memref<2x1x128xf32, #tpu.memory_space<vmem>>, vector<1x1x128xf32>
    %507 = vector.shape_cast %506 : vector<1x1x128xf32> to vector<1x128xf32>
    %508 = vector.broadcast %507 : vector<1x128xf32> to vector<16x128xf32>
    %509 = arith.addf %505, %508 : vector<16x128xf32>
    %c0_237 = arith.constant 0 : index
    %c0_238 = arith.constant 0 : index
    %c0_239 = arith.constant 0 : index
    %510 = vector.load %arg41[%c0_237, %c0_238, %c0_239] : memref<1x16x128xf32, #tpu.memory_space<vmem>>, vector<1x16x128xf32>
    %511 = vector.shape_cast %510 : vector<1x16x128xf32> to vector<16x128xf32>
    %512 = vector.shape_cast %509 : vector<16x128xf32> to vector<1x16x128xf32>
    tpu.vector_store %arg41[%c0_237, %c0_238, %c0_239], %512 {strides = array<i32>} : memref<1x16x128xf32, #tpu.memory_space<vmem>>, vector<1x16x128xf32>,
    %513 = arith.truncf %509 : vector<16x128xf32> to vector<16x128xbf16>
    %c0_240 = arith.constant 0 : index
    %c0_241 = arith.constant 0 : index
    %514 = vector.load %arg37[%c0_240, %c0_241] : memref<128x384xbf16, #tpu.memory_space<vmem>>, vector<128x384xbf16>
    %cst_242 = arith.constant dense<0.000000e+00> : vector<16x384xf32>
    %515 = tpu.matmul %513, %514, %cst_242 {dimension_numbers = #tpu.dot_dimension_numbers<[1], [0], [0], [1], [0, 0, 1, 1], [], []>} : vector<16x128xbf16>, vector<128x384xbf16>, vector<16x384xf32> -> vector<16x384xf32>
    %c0_243 = arith.constant 0 : index
    %c0_244 = arith.constant 0 : index
    %516 = vector.load %arg38[%c0_243, %c0_244] : memref<1x384xf32, #tpu.memory_space<vmem>>, vector<1x384xf32>
    %517 = vector.broadcast %516 : vector<1x384xf32> to vector<16x384xf32>
    %518 = arith.addf %515, %517 : vector<16x384xf32>
    %519 = arith.mulf %518, %518 : vector<16x384xf32>
    %520 = arith.mulf %518, %519 : vector<16x384xf32>
    %cst_245 = arith.constant 4.471500e-02 : f32
    %521 = vector.broadcast %cst_245 : f32 to vector<16x384xf32>
    %522 = arith.mulf %521, %520 : vector<16x384xf32>
    %523 = arith.addf %518, %522 : vector<16x384xf32>
    %cst_246 = arith.constant 0.797884583 : f32
    %524 = vector.broadcast %cst_246 : f32 to vector<16x384xf32>
    %525 = arith.mulf %524, %523 : vector<16x384xf32>
    %526 = math.tanh %525 : vector<16x384xf32>
    %cst_247 = arith.constant 1.000000e+00 : f32
    %527 = vector.broadcast %cst_247 : f32 to vector<16x384xf32>
    %528 = arith.addf %527, %526 : vector<16x384xf32>
    %cst_248 = arith.constant 5.000000e-01 : f32
    %529 = vector.broadcast %cst_248 : f32 to vector<16x384xf32>
    %530 = arith.mulf %529, %528 : vector<16x384xf32>
    %531 = arith.mulf %518, %530 : vector<16x384xf32>
    %532 = arith.truncf %531 : vector<16x384xf32> to vector<16x384xbf16>
    %c0_249 = arith.constant 0 : index
    %c0_250 = arith.constant 0 : index
    %533 = vector.load %arg39[%c0_249, %c0_250] : memref<384x256xbf16, #tpu.memory_space<vmem>>, vector<384x256xbf16>
    %cst_251 = arith.constant dense<0.000000e+00> : vector<16x256xf32>
    %534 = tpu.matmul %532, %533, %cst_251 {dimension_numbers = #tpu.dot_dimension_numbers<[1], [0], [0], [1], [0, 0, 1, 1], [], []>} : vector<16x384xbf16>, vector<384x256xbf16>, vector<16x256xf32> -> vector<16x256xf32>
    %c0_252 = arith.constant 0 : index
    %c0_253 = arith.constant 0 : index
    %535 = vector.load %arg40[%c0_252, %c0_253] : memref<1x256xf32, #tpu.memory_space<vmem>>, vector<1x256xf32>
    %536 = vector.broadcast %535 : vector<1x256xf32> to vector<16x256xf32>
    %537 = arith.addf %534, %536 : vector<16x256xf32>
    %c0_254 = arith.constant 0 : index
    %c0_255 = arith.constant 0 : index
    %c0_256 = arith.constant 0 : index
    %538 = vector.load %arg42[%c0_254, %c0_255, %c0_256] : memref<1x16x256xf32, #tpu.memory_space<vmem>>, vector<1x16x256xf32>
    %539 = vector.shape_cast %538 : vector<1x16x256xf32> to vector<16x256xf32>
    %540 = vector.shape_cast %537 : vector<16x256xf32> to vector<1x16x256xf32>
    tpu.vector_store %arg42[%c0_254, %c0_255, %c0_256], %540 {strides = array<i32>} : memref<1x16x256xf32, #tpu.memory_space<vmem>>, vector<1x16x256xf32>,
    return
  }
  func.func @transform_0(%arg0: i32, %arg1: memref<2xi32, #tpu.memory_space<smem>>) -> (i32, i32, i32) {
    %c0_i32 = arith.constant 0 : i32
    %c0_i32_0 = arith.constant 0 : i32
    %c0_i32_1 = arith.constant 0 : i32
    return %arg0, %c0_i32, %c0_i32_0 : i32, i32, i32
  }
  func.func @transform_1(%arg0: i32, %arg1: memref<2xi32, #tpu.memory_space<smem>>) -> (i32, i32, i32) {
    %c0_i32 = arith.constant 0 : i32
    %c0_i32_0 = arith.constant 0 : i32
    %c0_i32_1 = arith.constant 0 : i32
    return %arg0, %c0_i32, %c0_i32_0 : i32, i32, i32
  }
  func.func @transform_2(%arg0: i32, %arg1: memref<2xi32, #tpu.memory_space<smem>>) -> (i32, i32, i32) {
    %c0_i32 = arith.constant 0 : i32
    %c0_i32_0 = arith.constant 0 : i32
    %c0_i32_1 = arith.constant 0 : i32
    return %arg0, %c0_i32, %c0_i32_0 : i32, i32, i32
  }
  func.func @transform_3(%arg0: i32, %arg1: memref<2xi32, #tpu.memory_space<smem>>) -> (i32, i32) {
    %c0_i32 = arith.constant 0 : i32
    %c0_i32_0 = arith.constant 0 : i32
    %c0_i32_1 = arith.constant 0 : i32
    return %c0_i32, %c0_i32_0 : i32, i32
  }
  func.func @transform_4(%arg0: i32, %arg1: memref<2xi32, #tpu.memory_space<smem>>) -> (i32, i32) {
    %c0_i32 = arith.constant 0 : i32
    %c0_i32_0 = arith.constant 0 : i32
    %c0_i32_1 = arith.constant 0 : i32
    return %c0_i32, %c0_i32_0 : i32, i32
  }
  func.func @transform_5(%arg0: i32, %arg1: memref<2xi32, #tpu.memory_space<smem>>) -> (i32, i32) {
    %c0_i32 = arith.constant 0 : i32
    %c0_i32_0 = arith.constant 0 : i32
    %c0_i32_1 = arith.constant 0 : i32
    return %c0_i32, %c0_i32_0 : i32, i32
  }
  func.func @transform_6(%arg0: i32, %arg1: memref<2xi32, #tpu.memory_space<smem>>) -> (i32, i32) {
    %c0_i32 = arith.constant 0 : i32
    %c0_i32_0 = arith.constant 0 : i32
    %c0_i32_1 = arith.constant 0 : i32
    return %c0_i32, %c0_i32_0 : i32, i32
  }
  func.func @transform_7(%arg0: i32, %arg1: memref<2xi32, #tpu.memory_space<smem>>) -> (i32, i32) {
    %c0_i32 = arith.constant 0 : i32
    %c0_i32_0 = arith.constant 0 : i32
    %c0_i32_1 = arith.constant 0 : i32
    return %c0_i32, %c0_i32_0 : i32, i32
  }
  func.func @transform_8(%arg0: i32, %arg1: memref<2xi32, #tpu.memory_space<smem>>) -> (i32, i32) {
    %c0_i32 = arith.constant 0 : i32
    %c0_i32_0 = arith.constant 0 : i32
    %c0_i32_1 = arith.constant 0 : i32
    return %c0_i32, %c0_i32_0 : i32, i32
  }
  func.func @transform_9(%arg0: i32, %arg1: memref<2xi32, #tpu.memory_space<smem>>) -> (i32, i32) {
    %c0_i32 = arith.constant 0 : i32
    %c0_i32_0 = arith.constant 0 : i32
    %c0_i32_1 = arith.constant 0 : i32
    return %c0_i32, %c0_i32_0 : i32, i32
  }
  func.func @transform_10(%arg0: i32, %arg1: memref<2xi32, #tpu.memory_space<smem>>) -> (i32, i32) {
    %c0_i32 = arith.constant 0 : i32
    %c0_i32_0 = arith.constant 0 : i32
    %c0_i32_1 = arith.constant 0 : i32
    return %c0_i32, %c0_i32_0 : i32, i32
  }
  func.func @transform_11(%arg0: i32, %arg1: memref<2xi32, #tpu.memory_space<smem>>) -> (i32, i32) {
    %c0_i32 = arith.constant 0 : i32
    %c0_i32_0 = arith.constant 0 : i32
    %c0_i32_1 = arith.constant 0 : i32
    return %c0_i32, %c0_i32_0 : i32, i32
  }
  func.func @transform_12(%arg0: i32, %arg1: memref<2xi32, #tpu.memory_space<smem>>) -> (i32, i32) {
    %c0_i32 = arith.constant 0 : i32
    %c0_i32_0 = arith.constant 0 : i32
    %c0_i32_1 = arith.constant 0 : i32
    return %c0_i32, %c0_i32_0 : i32, i32
  }
  func.func @transform_13(%arg0: i32, %arg1: memref<2xi32, #tpu.memory_space<smem>>) -> (i32, i32) {
    %c0_i32 = arith.constant 0 : i32
    %c0_i32_0 = arith.constant 0 : i32
    %c0_i32_1 = arith.constant 0 : i32
    return %c0_i32, %c0_i32_0 : i32, i32
  }
  func.func @transform_14(%arg0: i32, %arg1: memref<2xi32, #tpu.memory_space<smem>>) -> (i32, i32) {
    %c0_i32 = arith.constant 0 : i32
    %c0_i32_0 = arith.constant 0 : i32
    %c0_i32_1 = arith.constant 0 : i32
    return %c0_i32, %c0_i32_0 : i32, i32
  }
  func.func @transform_15(%arg0: i32, %arg1: memref<2xi32, #tpu.memory_space<smem>>) -> (i32, i32) {
    %c0_i32 = arith.constant 0 : i32
    %c0_i32_0 = arith.constant 0 : i32
    %c0_i32_1 = arith.constant 0 : i32
    return %c0_i32, %c0_i32_0 : i32, i32
  }
  func.func @transform_16(%arg0: i32, %arg1: memref<2xi32, #tpu.memory_space<smem>>) -> (i32, i32) {
    %c0_i32 = arith.constant 0 : i32
    %c0_i32_0 = arith.constant 0 : i32
    %c0_i32_1 = arith.constant 0 : i32
    return %c0_i32, %c0_i32_0 : i32, i32
  }
  func.func @transform_17(%arg0: i32, %arg1: memref<2xi32, #tpu.memory_space<smem>>) -> (i32, i32) {
    %c0_i32 = arith.constant 0 : i32
    %c0_i32_0 = arith.constant 0 : i32
    %c0_i32_1 = arith.constant 0 : i32
    return %c0_i32, %c0_i32_0 : i32, i32
  }
  func.func @transform_18(%arg0: i32, %arg1: memref<2xi32, #tpu.memory_space<smem>>) -> (i32, i32) {
    %c0_i32 = arith.constant 0 : i32
    %c0_i32_0 = arith.constant 0 : i32
    %c0_i32_1 = arith.constant 0 : i32
    return %c0_i32, %c0_i32_0 : i32, i32
  }
  func.func @transform_19(%arg0: i32, %arg1: memref<2xi32, #tpu.memory_space<smem>>) -> (i32, i32, i32) {
    %c0_i32 = arith.constant 0 : i32
    %c0_i32_0 = arith.constant 0 : i32
    %c0_i32_1 = arith.constant 0 : i32
    %c0_i32_2 = arith.constant 0 : i32
    return %c0_i32, %c0_i32_0, %c0_i32_1 : i32, i32, i32
  }
  func.func @transform_20(%arg0: i32, %arg1: memref<2xi32, #tpu.memory_space<smem>>) -> (i32, i32, i32) {
    %c0_i32 = arith.constant 0 : i32
    %c0_i32_0 = arith.constant 0 : i32
    %c0_i32_1 = arith.constant 0 : i32
    %c0_i32_2 = arith.constant 0 : i32
    return %c0_i32, %c0_i32_0, %c0_i32_1 : i32, i32, i32
  }
  func.func @transform_21(%arg0: i32, %arg1: memref<2xi32, #tpu.memory_space<smem>>) -> (i32, i32, i32) {
    %c0_i32 = arith.constant 0 : i32
    %c0_i32_0 = arith.constant 0 : i32
    %c0_i32_1 = arith.constant 0 : i32
    %c0_i32_2 = arith.constant 0 : i32
    return %c0_i32, %c0_i32_0, %c0_i32_1 : i32, i32, i32
  }
  func.func @transform_22(%arg0: i32, %arg1: memref<2xi32, #tpu.memory_space<smem>>) -> (i32, i32, i32) {
    %c0_i32 = arith.constant 0 : i32
    %c0_i32_0 = arith.constant 0 : i32
    %c0_i32_1 = arith.constant 0 : i32
    %c0_i32_2 = arith.constant 0 : i32
    return %c0_i32, %c0_i32_0, %c0_i32_1 : i32, i32, i32
  }
  func.func @transform_23(%arg0: i32, %arg1: memref<2xi32, #tpu.memory_space<smem>>) -> (i32, i32, i32) {
    %c0_i32 = arith.constant 0 : i32
    %c0_i32_0 = arith.constant 0 : i32
    %c0_i32_1 = arith.constant 0 : i32
    %c0_i32_2 = arith.constant 0 : i32
    return %c0_i32, %c0_i32_0, %c0_i32_1 : i32, i32, i32
  }
  func.func @transform_24(%arg0: i32, %arg1: memref<2xi32, #tpu.memory_space<smem>>) -> (i32, i32, i32) {
    %c0_i32 = arith.constant 0 : i32
    %c0_i32_0 = arith.constant 0 : i32
    %c0_i32_1 = arith.constant 0 : i32
    %c0_i32_2 = arith.constant 0 : i32
    return %c0_i32, %c0_i32_0, %c0_i32_1 : i32, i32, i32
  }
  func.func @transform_25(%arg0: i32, %arg1: memref<2xi32, #tpu.memory_space<smem>>) -> (i32, i32, i32) {
    %c0_i32 = arith.constant 0 : i32
    %c0_i32_0 = arith.constant 0 : i32
    %c0_i32_1 = arith.constant 0 : i32
    %c0_i32_2 = arith.constant 0 : i32
    return %c0_i32, %c0_i32_0, %c0_i32_1 : i32, i32, i32
  }
  func.func @transform_26(%arg0: i32, %arg1: memref<2xi32, #tpu.memory_space<smem>>) -> (i32, i32, i32) {
    %c0_i32 = arith.constant 0 : i32
    %c0_i32_0 = arith.constant 0 : i32
    %c0_i32_1 = arith.constant 0 : i32
    %c0_i32_2 = arith.constant 0 : i32
    return %c0_i32, %c0_i32_0, %c0_i32_1 : i32, i32, i32
  }
  func.func @transform_27(%arg0: i32, %arg1: memref<2xi32, #tpu.memory_space<smem>>) -> (i32, i32, i32) {
    %c0_i32 = arith.constant 0 : i32
    %c0_i32_0 = arith.constant 0 : i32
    %c0_i32_1 = arith.constant 0 : i32
    %c0_i32_2 = arith.constant 0 : i32
    return %c0_i32, %c0_i32_0, %c0_i32_1 : i32, i32, i32
  }
  func.func @transform_28(%arg0: i32, %arg1: memref<2xi32, #tpu.memory_space<smem>>) -> (i32, i32, i32) {
    %c0_i32 = arith.constant 0 : i32
    %c0_i32_0 = arith.constant 0 : i32
    %c0_i32_1 = arith.constant 0 : i32
    %c0_i32_2 = arith.constant 0 : i32
    return %c0_i32, %c0_i32_0, %c0_i32_1 : i32, i32, i32
  }
  func.func @transform_29(%arg0: i32, %arg1: memref<2xi32, #tpu.memory_space<smem>>) -> (i32, i32, i32) {
    %c0_i32 = arith.constant 0 : i32
    %c0_i32_0 = arith.constant 0 : i32
    %c0_i32_1 = arith.constant 0 : i32
    %c0_i32_2 = arith.constant 0 : i32
    return %c0_i32, %c0_i32_0, %c0_i32_1 : i32, i32, i32
  }
  func.func @transform_30(%arg0: i32, %arg1: memref<2xi32, #tpu.memory_space<smem>>) -> (i32, i32, i32) {
    %c0_i32 = arith.constant 0 : i32
    %c0_i32_0 = arith.constant 0 : i32
    %c0_i32_1 = arith.constant 0 : i32
    %c0_i32_2 = arith.constant 0 : i32
    return %c0_i32, %c0_i32_0, %c0_i32_1 : i32, i32, i32
  }
  func.func @transform_31(%arg0: i32, %arg1: memref<2xi32, #tpu.memory_space<smem>>) -> (i32, i32, i32) {
    %c0_i32 = arith.constant 0 : i32
    %c0_i32_0 = arith.constant 0 : i32
    %c0_i32_1 = arith.constant 0 : i32
    %c0_i32_2 = arith.constant 0 : i32
    return %c0_i32, %c0_i32_0, %c0_i32_1 : i32, i32, i32
  }
  func.func @transform_32(%arg0: i32, %arg1: memref<2xi32, #tpu.memory_space<smem>>) -> (i32, i32, i32) {
    %c0_i32 = arith.constant 0 : i32
    %c0_i32_0 = arith.constant 0 : i32
    %c0_i32_1 = arith.constant 0 : i32
    %c0_i32_2 = arith.constant 0 : i32
    return %c0_i32, %c0_i32_0, %c0_i32_1 : i32, i32, i32
  }
  func.func @transform_33(%arg0: i32, %arg1: memref<2xi32, #tpu.memory_space<smem>>) -> (i32, i32, i32) {
    %c0_i32 = arith.constant 0 : i32
    %c0_i32_0 = arith.constant 0 : i32
    %c0_i32_1 = arith.constant 0 : i32
    %c0_i32_2 = arith.constant 0 : i32
    return %c0_i32, %c0_i32_0, %c0_i32_1 : i32, i32, i32
  }
  func.func @transform_34(%arg0: i32, %arg1: memref<2xi32, #tpu.memory_space<smem>>) -> (i32, i32, i32) {
    %c0_i32 = arith.constant 0 : i32
    %c0_i32_0 = arith.constant 0 : i32
    %c0_i32_1 = arith.constant 0 : i32
    %c0_i32_2 = arith.constant 0 : i32
    return %c0_i32, %c0_i32_0, %c0_i32_1 : i32, i32, i32
  }
  func.func @transform_35(%arg0: i32, %arg1: memref<2xi32, #tpu.memory_space<smem>>) -> (i32, i32) {
    %c0_i32 = arith.constant 0 : i32
    %c0_i32_0 = arith.constant 0 : i32
    %c0_i32_1 = arith.constant 0 : i32
    return %c0_i32, %c0_i32_0 : i32, i32
  }
  func.func @transform_36(%arg0: i32, %arg1: memref<2xi32, #tpu.memory_space<smem>>) -> (i32, i32) {
    %c0_i32 = arith.constant 0 : i32
    %c0_i32_0 = arith.constant 0 : i32
    %c0_i32_1 = arith.constant 0 : i32
    return %c0_i32, %c0_i32_0 : i32, i32
  }
  func.func @transform_37(%arg0: i32, %arg1: memref<2xi32, #tpu.memory_space<smem>>) -> (i32, i32) {
    %c0_i32 = arith.constant 0 : i32
    %c0_i32_0 = arith.constant 0 : i32
    %c0_i32_1 = arith.constant 0 : i32
    return %c0_i32, %c0_i32_0 : i32, i32
  }
  func.func @transform_38(%arg0: i32, %arg1: memref<2xi32, #tpu.memory_space<smem>>) -> (i32, i32) {
    %c0_i32 = arith.constant 0 : i32
    %c0_i32_0 = arith.constant 0 : i32
    %c0_i32_1 = arith.constant 0 : i32
    return %c0_i32, %c0_i32_0 : i32, i32
  }
  func.func @transform_39(%arg0: i32, %arg1: memref<2xi32, #tpu.memory_space<smem>>) -> (i32, i32, i32) {
    %c0_i32 = arith.constant 0 : i32
    %c0_i32_0 = arith.constant 0 : i32
    %c0_i32_1 = arith.constant 0 : i32
    return %arg0, %c0_i32, %c0_i32_0 : i32, i32, i32
  }
  func.func @transform_40(%arg0: i32, %arg1: memref<2xi32, #tpu.memory_space<smem>>) -> (i32, i32, i32) {
    %c0_i32 = arith.constant 0 : i32
    %c0_i32_0 = arith.constant 0 : i32
    %c0_i32_1 = arith.constant 0 : i32
    return %arg0, %c0_i32, %c0_i32_0 : i32, i32, i32
  }
}

</mosaic_0001>

<bundles_post_ra>
// kernel: network_encoder_rope_forward.1
= control target key start
LH: loop header
LB: loop body
LE: loop exit
PB: predicated region body
PF: predicated region fallthrough
CT: control target
= control target key end

     0   :  { %s9764_s6 = smov 1   ;;  %s9765_s10 = smov 2   ;;  %s11202_s0 = inlined_call_operand.smem [shape: u32[42], index: -1, kind: input, shape index: {}] }
   0x1   :  { %s9853_s5 = sld [smem:[%s11202_s0]]   ;;  %s9766_s14 = smov 3  }
   0x2   :  { %s9858_s9 = sld [smem:[%s11202_s0 + %s9764_s6]]   ;;  %s9767_s18 = smov 4  }
   0x3   :  { %s9863_s13 = sld [smem:[%s11202_s0 + %s9765_s10]]   ;;  %s9768_s22 = smov 5  }
   0x4   :  { %s9868_s17 = sld [smem:[%s11202_s0 + %s9766_s14]]   ;;  %s9769_s26 = smov 6  }
   0x5   :  { %s9873_s21 = sld [smem:[%s11202_s0 + %s9767_s18]]   ;;  %s9770_s30 = smov 7  }
   0x6   :  { %s9878_s25 = sld [smem:[%s11202_s0 + %s9768_s22]]   ;;  %s9771_s4 = smov 8  }
   0x7   :  { %s9883_s29 = sld [smem:[%s11202_s0 + %s9769_s26]]   ;;  %s9772_s10 = smov 9  }
   0x8   :  { %11250 = sst [smem:[#allocation47_spill]] %s9858_s9  ;;  %s9773_s15 = smov 10  }
   0x9   :  { %11251 = sst [smem:[#allocation48_spill]] %s9863_s13  ;;  %s9774_s20 = smov 11  }
   0xa   :  { %11252 = sst [smem:[#allocation49_spill]] %s9868_s17  ;;  %s9775_s26 = smov 12  }
   0xb   :  { %11253 = sst [smem:[#allocation50_spill]] %s9873_s21  ;;  %s9776_s1 = smov 13  }
   0xc   :  { %s9888_s3 = sld [smem:[%s11202_s0 + %s9770_s30]]   ;;  %s9777_s7 = smov 14  }
   0xd   :  { %s9893_s8 = sld [smem:[%s11202_s0 + %s9771_s4]]   ;;  %s9779_s22 = smov 16  }
   0xe   :  { %s9898_s14 = sld [smem:[%s11202_s0 + %s9772_s10]]   ;;  %s9780_s28 = smov 17  }
   0xf   :  { %s9903_s19 = sld [smem:[%s11202_s0 + %s9773_s15]]   ;;  %s9778_s15 = smov 15  }
  0x10   :  { %s9908_s24 = sld [smem:[%s11202_s0 + %s9774_s20]]  }
  0x11   :  { %s9913_s30 = sld [smem:[%s11202_s0 + %s9775_s26]]  }
  0x12   :  { %11254 = sst [smem:[#allocation51_spill]] %s9888_s3 }
  0x13   :  { %11255 = sst [smem:[#allocation52_spill]] %s9893_s8 }
  0x14   :  { %11256 = sst [smem:[#allocation53_spill]] %s9898_s14 }
  0x15   :  { %11257 = sst [smem:[#allocation54_spill]] %s9903_s19 }
  0x16   :  { %s9918_s6 = sld [smem:[%s11202_s0 + %s9776_s1]]  }
  0x17   :  { %11258 = sst [smem:[#allocation55_spill]] %s9913_s30 }
  0x18   :  { %s9923_s12 = sld [smem:[%s11202_s0 + %s9777_s7]]   ;;  %s9781_s7 = smov 18  }
  0x19   :  { %s9928_s20 = sld [smem:[%s11202_s0 + %s9778_s15]]   ;;  %s9782_s15 = smov 19  }
  0x1a   :  { %s9933_s27 = sld [smem:[%s11202_s0 + %s9779_s22]]   ;;  %s9783_s22 = smov 20  }
  0x1b   :  { %s9938_s4 = sld [smem:[%s11202_s0 + %s9780_s28]]   ;;  %s9784_s28 = smov 21  }
  0x1c   :  { %11259 = sst [smem:[#allocation56_spill]] %s9918_s6 }
  0x1d   :  { %s9943_s21 = sld [smem:[%s11202_s0 + %s9781_s7]]   ;;  %s9785_s7 = smov 22  }
  0x1e   :  { %11260 = sst [smem:[#allocation57_spill]] %s9923_s12 }
  0x1f   :  { %11261 = sst [smem:[#allocation58_spill]] %s9928_s20 }
  0x20   :  { %11262 = sst [smem:[#allocation59_spill]] %s9933_s27 }
  0x21   :  { %11263 = sst [smem:[#allocation60_spill]] %s9938_s4 }
  0x22   :  { %s9948_s13 = sld [smem:[%s11202_s0 + %s9782_s15]]   ;;  %s9786_s15 = smov 23  }
  0x23   :  { %11264 = sst [smem:[#allocation61_spill]] %s9943_s21 }
  0x24   :  { %s9953_s27 = sld [smem:[%s11202_s0 + %s9783_s22]]   ;;  %s9787_s22 = smov 24  }
  0x25   :  { %s9958_s4 = sld [smem:[%s11202_s0 + %s9784_s28]]   ;;  %s9788_s28 = smov 25  }
  0x26   :  { %s9963_s21 = sld [smem:[%s11202_s0 + %s9785_s7]]   ;;  %s9789_s7 = smov 26  }
  0x27   :  { %s9983_s30 = sld [smem:[%s11202_s0 + %s9789_s7]]   ;;  %s9793_s7 = smov 30  }
  0x28   :  { %11265 = sst [smem:[#allocation62_spill]] %s9948_s13 }
  0x29   :  { %s9968_s13 = sld [smem:[%s11202_s0 + %s9786_s15]]   ;;  %s9790_s15 = smov 27  }
  0x2a   :  { %11266 = sst [smem:[#allocation63_spill]] %s9953_s27 }
  0x2b   :  { %11267 = sst [smem:[#allocation64_spill]] %s9958_s4 }
  0x2c   :  { %11268 = sst [smem:[#allocation65_spill]] %s9963_s21 }
  0x2d   :  { %s9973_s27 = sld [smem:[%s11202_s0 + %s9787_s22]]   ;;  %s9791_s22 = smov 28  }
  0x2e   :  { %s9978_s4 = sld [smem:[%s11202_s0 + %s9788_s28]]   ;;  %s9792_s28 = smov 29  }
  0x2f   :  { %11269 = sst [smem:[#allocation66_spill]] %s9968_s13 }
  0x30   :  { %s9988_s9 = sld [smem:[%s11202_s0 + %s9790_s15]]   ;;  %s9794_s15 = smov 31  }
  0x31   :  { %s9993_s17 = sld [smem:[%s11202_s0 + %s9791_s22]]   ;;  %s9795_s22 = smov 32  }
  0x32   :  { %s10003_s13 = sld [smem:[%s11202_s0 + %s9793_s7]]   ;;  %s9797_s7 = smov 34  }
  0x33   :  { %s10013_s1 = sld [smem:[%s11202_s0 + %s9795_s22]]   ;;  %s9799_s22 = smov 36  }
  0x34   :  { %11270 = sst [smem:[#allocation67_spill]] %s9978_s4 }
  0x35   :  { %s9998_s4 = sld [smem:[%s11202_s0 + %s9792_s28]]   ;;  %s9796_s28 = smov 33  }
  0x36   :  { %11271 = sst [smem:[#allocation68_spill]] %s9988_s9 }
  0x37   :  { %11272 = sst [smem:[#allocation69_spill]] %s9993_s17 }
  0x38   :  { %11274 = sst [smem:[#allocation71_spill]] %s10003_s13  ;;  %s9801_s13 = smov 38  }
  0x39   :  { %s10008_s9 = sld [smem:[%s11202_s0 + %s9794_s15]]   ;;  %s9798_s15 = smov 35  }
  0x3a   :  { %11276 = sst [smem:[#allocation73_spill]] %s10013_s1  ;;  %s89_s1 = sshll.u32 %s9853_s5, 4  ;;  %s90_s1 = int_to_ptr.vmem [resolvable:$true] %s89_s1 }
  0x3b   :  { %11273 = sst [smem:[#allocation70_spill]] %s9998_s4  ;;  %s9800_s4 = smov 37  }
  0x3c   :  { %s10018_s10 = sld [smem:[%s11202_s0 + %s9796_s28]]   ;;  %p9157_p1 = scmp.lt.s32.totalorder %s90_s1, %s90_s1 }
  0x3d   :  { %s10023_s16 = sld [smem:[%s11202_s0 + %s9797_s7]]   ;;  %s9152_s7 = scalar_lea.vmem %s90_s1, 16 }
  0x3e   :  { %s10028_s23 = sld [smem:[%s11202_s0 + %s9798_s15]]   ;;  %p9153_p0 = scmp.ne.s32.totalorder %s90_s1, %s9152_s7 }
  0x3f   :  { %11275 = sst [smem:[#allocation72_spill]] %s10008_s9  ;;  %s9802_s9 = smov 39  }
  0x40   :  { %s10033_s17 = sld [smem:[%s11202_s0 + %s9799_s22]]   ;;  %s9803_s22 = smov 40  }
  0x41   :  { %s10054_s28 = sld [smem:[%s11202_s0 + %s9803_s22]]   ;;  %p9158_p2 = scmp.lt.s32.totalorder %s9152_s7, %s9152_s7 }
  0x42   :  { %11277 = sst [smem:[#allocation74_spill]] %s10018_s10 }
  0x43   :  { %11278 = sst [smem:[#allocation75_spill]] %s10023_s16  ;;  %p9159_p3 = por %p9158_p2, %p9157_p1 }
  0x44   :  { %11279 = sst [smem:[#allocation76_spill]] %s10028_s23 }
  0x45   :  { %s10038_s10 = sld [smem:[%s11202_s0 + %s9800_s4]]   ;;  %s9804_s4 = smov 41  }
  0x46   :  { %11280 = sst [smem:[#allocation77_spill]] %s10033_s17  ;;  %p9160_p4 = pnand %p9159_p3, %p9153_p0 }
  0x47   :  { %s10043_s16 = sld [smem:[%s11202_s0 + %s9801_s13]]  }
  0x48   :  { %s10048_s23 = sld [smem:[%s11202_s0 + %s9802_s9]]  }
  0x49   :  { %s10059_s13 = sld [smem:[%s11202_s0 + %s9804_s4]]  }
  0x4b   :  { %11281 = sst [smem:[#allocation78_spill]] %s10038_s10 }
  0x4d   :  { %11282 = sst [smem:[#allocation79_spill]] %s10043_s16 }
  0x4f   :  { %11283 = sst [smem:[#allocation80_spill]] %s10059_s13 }
  0x50   :  { %9163 = shalt.err (!%p9160_p4)  }
  0x51   :  { %s9805_s5 = smov [#allocation3]  }
  0x52   :  { %92 = dma.vmem_to_smem %s90_s1, 16, %s9805_s5, [#allocation2] }
  0x53   :  { %9702 = dma.done.wait [#allocation2], 16 }
  0x54   :  { %9703 = vsyncadd [#allocation2], 4294967280 }
  0x55   :  { %94 = sfence }
  0x56   :  { %95 = vsyncpa [#allocation5], 0 }
  0x57   :  { %97 = vsyncpa [#allocation5 + $0x1], 0 }
  0x58   :  { %98 = vsyncpa [#allocation8], 0 }
  0x59   :  { %99 = vsyncpa [#allocation11], 0 }
  0x5a   :  { %100 = vsyncpa [#allocation14], 0 }
  0x5b   :  { %101 = vsyncpa [#allocation17], 0 }
  0x5c   :  { %102 = vsyncpa [#allocation20], 0 }
  0x5d   :  { %103 = vsyncpa [#allocation23], 0 }
  0x5e   :  { %104 = vsyncpa [#allocation26], 0 }
  0x5f   :  { %105 = vsyncpa [#allocation29], 0 }
  0x60   :  { %106 = vsyncpa [#allocation32], 0 }
  0x61   :  { %107 = vsyncpa [#allocation6], 0 }
  0x62   :  { %109 = vsyncpa [#allocation6 + $0x1], 0  ;;  %s10061_s0 = smov 0   ;;  %s10063_s20 = smov 0  }
  0x63   :  { %s10065_s10 = smov 0   ;;  %s10067_s11 = smov 0  }
  0x64 LB: > { %s9806_s9 = smov [#allocation7]   ;;  %s10082_s18 = sadd.s32 4294967295, %s9762_s11   ;;  %s9762_s11 = sphi %s10067_s11, %s11362_s11   ;;  %s9758_s10 = sphi %s10065_s10, %s11361_s10   ;;  %s9754_s20 = sphi %s10063_s20, %s11360_s20   ;;  %s9750_s0 = sphi %s10061_s0, %s11359_s0  }
  0x65   : > { %s1021_s15 = sshll.u32 %s9806_s9, 4  ;;  %p7231_p5 = scmp.ge.s32.totalorder %s9762_s11, 1  ;;  %s1022_s15 = int_to_ptr.vmem [resolvable:$true] %s1021_s15 }
  0x66   : > { %p11221_p6 = scmp.eq.s32.totalorder %s10082_s18, 0  ;;  %p1006_p7 = scmp.lt.s32.totalorder %s9762_s11, 3 }
  0x67   : > { %s9807_s22 = smov [#allocation10]   ;;  %s9808_s2 = smov [#allocation13]  }
  0x68   : > { %p10087_p8 = pnand %p7231_p5, %p1006_p7  ;;  %s1047_s26 = sshll.u32 %s9807_s22, 4  ;;  %s10100_s26 = int_to_ptr.vmem [resolvable:$true] %s1047_s26 }
  0x69   : > { %s1074_s7 = sshll.u32 %s9808_s2, 4  ;;  %s9175_s9 = scalar_lea.vmem %s1022_s15, 256  ;;  %s10102_s7 = int_to_ptr.vmem [resolvable:$true] %s1074_s7 }
  0x6a   : > { %s11284_s1 = scalar_select %p10087_p8, 1, 0 }
  0x6b   : > { %p8403_p10 = pneg %p10087_p8  ;;  %p9176_p13 = scmp.ne.s32.totalorder %s1022_s15, %s9175_s9 }
  0x6c   : > { %p9183_p2 = scmp.lt.s32.totalorder %s1022_s15, %s1022_s15  ;;  %p9184_p3 = scmp.lt.s32.totalorder %s9175_s9, %s9175_s9 }
  0x6d   : > { %p10096_p11 = pnand %p8403_p10, %p11221_p6 }
  0x6e   : > { %p9185_p4 = por %p9184_p3, %p9183_p2 }
  0x6f   : > { %p10106_p12 = pneg %p10096_p11 }
  0x71   : > { %p9178_p0 = pnand %p9176_p13, %p10106_p12 }
  0x73   : > { %p9179_p1 = pneg %p9178_p0 }
  0x75   : > { %p9186_p5 = pnand %p9185_p4, %p9179_p1 }
  0x77   : > { %9189 = shalt.err (!%p9186_p5)
}
  0x78   : > { %s11217_s22 = smov 128   ;;  %s11219_s2 = smov 8  }
  0x79   : > { %8406 = dma.hbm_to_vmem [thread:$0]  (!%p10096_p11), %s9878_s25, 256, %s1022_s15, [#allocation8], %s11217_s22, %s11217_s22, %s11219_s2  }
  0x7a   : > { %s9201_s13 = scalar_lea.vmem %s10100_s26, 256  ;;  %p9209_p0 = scmp.lt.s32.totalorder %s10100_s26, %s10100_s26 }
  0x7b   : > { %p9202_p7 = scmp.ne.s32.totalorder %s10100_s26, %s9201_s13  ;;  %p9210_p1 = scmp.lt.s32.totalorder %s9201_s13, %s9201_s13 }
  0x7d   : > { %p9204_p10 = pnand %p9202_p7, %p10106_p12  ;;  %p9211_p2 = por %p9210_p1, %p9209_p0 }
  0x7f   : > { %p9205_p13 = pneg %p9204_p10 }
  0x81   : > { %p9212_p3 = pnand %p9211_p2, %p9205_p13 }
  0x83   : > { %9215 = shalt.err (!%p9212_p3)
}
  0x84   : > { %s11287_s3 = sld [smem:[#allocation51_spill]]  ;;  %s9227_s15 = scalar_lea.vmem %s10102_s7, 32 }
  0x85   : > { %p9228_p4 = scmp.ne.s32.totalorder %s10102_s7, %s9227_s15  ;;  %p9235_p10 = scmp.lt.s32.totalorder %s10102_s7, %s10102_s7 }
  0x86   : > { %p9236_p13 = scmp.lt.s32.totalorder %s9227_s15, %s9227_s15 }
  0x87   : > { %p9230_p5 = pnand %p9228_p4, %p10106_p12 }
  0x88   : > { %p9237_p0 = por %p9236_p13, %p9235_p10 }
  0x89   : > { %p9231_p7 = pneg %p9230_p5 }
  0x8a   : > { %8412 = dma.hbm_to_vmem [thread:$0]  (!%p10096_p11), %s11287_s3, 256, %s10100_s26, [#allocation11], %s11217_s22, %s11217_s22, %s11219_s2  }
  0x8b   : > { %p9238_p1 = pnand %p9237_p0, %p9231_p7 }
  0x8d   : > { %9241 = shalt.err (!%p9238_p1)
}
  0x8e   : > { %s11288_s14 = sld [smem:[#allocation53_spill]]  ;;  %s9811_s13 = smov [#allocation16]  }
  0x8f   : > { %s1098_s9 = sshll.u32 %s9811_s13, 4  ;;  %s1099_s9 = int_to_ptr.vmem [resolvable:$true] %s1098_s9 }
  0x90   : > { %s9253_s26 = scalar_lea.vmem %s1099_s9, 16  ;;  %s9260_s22 = scalar_lea.vmem %s1099_s9, 32 }
  0x91   : > { %p9254_p2 = scmp.ne.s32.totalorder %s1099_s9, %s9253_s26  ;;  %p9261_p5 = scmp.lt.s32.totalorder %s1099_s9, %s1099_s9 }
  0x92   : > { %p9262_p9 = scmp.lt.s32.totalorder %s9260_s22, %s9253_s26 }
  0x93   : > { %p9256_p3 = pnand %p9254_p2, %p10106_p12 }
  0x94   : > { %8418 = dma.hbm_to_vmem [thread:$0]  (!%p10096_p11), %s11288_s14, 32, %s10102_s7, [#allocation14]  }
  0x95   : > { %p9257_p4 = pneg %p9256_p3  ;;  %p9263_p10 = por %p9262_p9, %p9261_p5 }
  0x97   : > { %p9264_p7 = pnand %p9263_p10, %p9257_p4 }
  0x99   : > { %9267 = shalt.err (!%p9264_p7)
}
  0x9a   : > { %8424 = dma.hbm_to_vmem [thread:$0]  (!%p10096_p11), %s9908_s24, 16, %s1099_s9, [#allocation17]  }
  0x9b   : > { %s9812_s7 = smov [#allocation19]   ;;  %s9813_s13 = smov [#allocation22]  }
  0x9c   : > { %s1122_s15 = sshll.u32 %s9812_s7, 4  ;;  %s1164_s2 = sshll.u32 %s9813_s13, 4  ;;  %s1123_s15 = int_to_ptr.vmem [resolvable:$true] %s1122_s15  ;;  %s1165_s2 = int_to_ptr.vmem [resolvable:$true] %s1164_s2 }
  0x9d   : > { %s9279_s3 = scalar_lea.vmem %s1123_s15, 2048  ;;  %p9287_p2 = scmp.lt.s32.totalorder %s1123_s15, %s1123_s15 }
  0x9e   : > { %p9280_p13 = scmp.ne.s32.totalorder %s1123_s15, %s9279_s3  ;;  %p9288_p9 = scmp.lt.s32.totalorder %s9279_s3, %s9279_s3 }
  0xa0   : > { %p9282_p0 = pnand %p9280_p13, %p10106_p12  ;;  %p9289_p3 = por %p9288_p9, %p9287_p2 }
  0xa2   : > { %p9283_p1 = pneg %p9282_p0 }
  0xa4   : > { %p9290_p4 = pnand %p9289_p3, %p9283_p1 }
  0xa6   : > { %9293 = shalt.err (!%p9290_p4)
}
  0xa7   : > { %s11223_s22 = smov 64   ;;  %s11289_s12 = sld [smem:[#allocation57_spill]] }
  0xa8   : > { %s11225_s9 = smov 4   ;;  %s9305_s26 = scalar_lea.vmem %s1165_s2, 2048 }
  0xa9   : > { %p9306_p5 = scmp.ne.s32.totalorder %s1165_s2, %s9305_s26  ;;  %p9313_p13 = scmp.lt.s32.totalorder %s1165_s2, %s1165_s2 }
  0xaa   : > { %p9314_p0 = scmp.lt.s32.totalorder %s9305_s26, %s9305_s26 }
  0xab   : > { %p9308_p10 = pnand %p9306_p5, %p10106_p12 }
  0xac   : > { %p9315_p2 = por %p9314_p0, %p9313_p13 }
  0xad   : > { %8430 = dma.hbm_to_vmem [thread:$0]  (!%p10096_p11), %s11289_s12, 2048, %s1123_s15, [#allocation20], %s11223_s22, %s11223_s22, %s11225_s9  }
  0xae   : > { %p9309_p7 = pneg %p9308_p10 }
  0xb0   : > { %p9316_p1 = pnand %p9315_p2, %p9309_p7 }
  0xb2   : > { %9319 = shalt.err (!%p9316_p1)
}
  0xb3   : > { %s11290_s21 = sld [smem:[#allocation65_spill]]  ;;  %s9816_s3 = smov [#allocation25]  }
  0xb4   : > { %s1190_s7 = sshll.u32 %s9816_s3, 4  ;;  %s9817_s15 = smov [#allocation28]   ;;  %s1191_s7 = int_to_ptr.vmem [resolvable:$true] %s1190_s7 }
  0xb5   : > { %s1216_s13 = sshll.u32 %s9817_s15, 4  ;;  %s9331_s12 = scalar_lea.vmem %s1191_s7, 2048  ;;  %s1217_s13 = int_to_ptr.vmem [resolvable:$true] %s1216_s13 }
  0xb6   : > { %p9332_p9 = scmp.ne.s32.totalorder %s1191_s7, %s9331_s12  ;;  %p9339_p5 = scmp.lt.s32.totalorder %s1191_s7, %s1191_s7 }
  0xb7   : > { %p9340_p10 = scmp.lt.s32.totalorder %s9331_s12, %s9331_s12 }
  0xb8   : > { %p9334_p3 = pnand %p9332_p9, %p10106_p12 }
  0xb9   : > { %8436 = dma.hbm_to_vmem [thread:$0]  (!%p10096_p11), %s11290_s21, 2048, %s1165_s2, [#allocation23], %s11223_s22, %s11223_s22, %s11225_s9  }
  0xba   : > { %p9335_p4 = pneg %p9334_p3  ;;  %p9341_p7 = por %p9340_p10, %p9339_p5 }
  0xbc   : > { %p9342_p13 = pnand %p9341_p7, %p9335_p4 }
  0xbe   : > { %9345 = shalt.err (!%p9342_p13)
}
  0xbf   : > { %8442 = dma.hbm_to_vmem [thread:$0]  (!%p10096_p11), %s9973_s27, 2048, %s1191_s7, [#allocation26], %s11223_s22, %s11223_s22, %s11225_s9  }
  0xc0   : > { %s9357_s2 = scalar_lea.vmem %s1217_s13, 2048  ;;  %p9365_p9 = scmp.lt.s32.totalorder %s1217_s13, %s1217_s13 }
  0xc1   : > { %p9358_p0 = scmp.ne.s32.totalorder %s1217_s13, %s9357_s2  ;;  %p9366_p3 = scmp.lt.s32.totalorder %s9357_s2, %s9357_s2 }
  0xc3   : > { %p9360_p2 = pnand %p9358_p0, %p10106_p12  ;;  %p9367_p6 = por %p9366_p3, %p9365_p9 }
  0xc5   : > { %p9361_p1 = pneg %p9360_p2 }
  0xc7   : > { %p9368_p8 = pnand %p9367_p6, %p9361_p1 }
  0xc9   : > { %9371 = shalt.err (!%p9368_p8)
}
  0xca   : > { %8448 = dma.hbm_to_vmem [thread:$0]  (!%p10096_p11), %s9983_s30, 2048, %s1217_s13, [#allocation29], %s11223_s22, %s11223_s22, %s11225_s9  }
  0xcb   : > { %s9818_s12 = smov [#allocation31]  }
  0xcc   : > { %s1266_s26 = sshll.u32 %s9818_s12, 4  ;;  %s1267_s26 = int_to_ptr.vmem [resolvable:$true] %s1266_s26 }
  0xcd   : > { %s9383_s3 = scalar_lea.vmem %s1267_s26, 3072  ;;  %p9391_p7 = scmp.lt.s32.totalorder %s1267_s26, %s1267_s26 }
  0xce   : > { %p9384_p4 = scmp.ne.s32.totalorder %s1267_s26, %s9383_s3  ;;  %p9392_p13 = scmp.lt.s32.totalorder %s9383_s3, %s9383_s3 }
  0xd0   : > { %p9386_p5 = pnand %p9384_p4, %p10106_p12  ;;  %p9393_p6 = por %p9392_p13, %p9391_p7 }
  0xd2   : > { %p9387_p10 = pneg %p9386_p5 }
  0xd4   : > { %p9394_p8 = pnand %p9393_p6, %p9387_p10 }
  0xd6   : > { %9397 = shalt.err (!%p9394_p8)
}
  0xd7   : > { %s9819_s7 = smov 192   ;;  %s11291_s17 = sld [smem:[#allocation77_spill]] }
  0xd8   : > { %s9820_s15 = smov 12   ;;  %s9821_s13 = smov [#allocation9]  }
  0xd9   : > { %s1034_s2 = sshll.u32 %s9821_s13, 4  ;;  %s9822_s12 = smov [#allocation12]   ;;  %s1035_s2 = int_to_ptr.vmem [resolvable:$true] %s1034_s2 }
  0xda   : > { %s1060_s22 = sshll.u32 %s9822_s12, 4  ;;  %s9409_s9 = scalar_lea.vmem %s1035_s2, 256  ;;  %s1061_s22 = int_to_ptr.vmem [resolvable:$true] %s1060_s22 }
  0xdb   : > { %p9410_p0 = scmp.ne.s32.totalorder %s1035_s2, %s9409_s9  ;;  %p9417_p9 = scmp.lt.s32.totalorder %s1035_s2, %s1035_s2 }
  0xdc   : > { %p9418_p3 = scmp.lt.s32.totalorder %s9409_s9, %s9409_s9 }
  0xdd   : > { %8454 = dma.hbm_to_vmem [thread:$0]  (!%p10096_p11), %s11291_s17, 3072, %s1267_s26, [#allocation32], %s9819_s7, %s9819_s7, %s9820_s15  }
  0xde   : > { %p9412_p2 = pnand %p9410_p0, %p10106_p12  ;;  %p9419_p4 = por %p9418_p3, %p9417_p9 }
  0xe0   : > { %p9413_p1 = pneg %p9412_p2 }
  0xe2   : > { %p9420_p5 = pnand %p9419_p4, %p9413_p1 }
  0xe4   : > { %9423 = shalt.err (!%p9420_p5)
}
  0xe5   : > { %s11292_s3 = smov 8   ;;  %s11293_s14 = smov 128  }
  0xe6   : > { %8409 = dma.hbm_to_vmem [thread:$0]  (!%p10096_p11), %s9883_s29, 256, %s1035_s2, [#allocation8], %s11293_s14, %s11293_s14, %s11292_s3  }
  0xe7   : > { %s9435_s26 = scalar_lea.vmem %s1061_s22, 1024  ;;  %p9443_p6 = scmp.lt.s32.totalorder %s1061_s22, %s1061_s22 }
  0xe8   : > { %p9436_p10 = scmp.ne.s32.totalorder %s1061_s22, %s9435_s26  ;;  %p9444_p8 = scmp.lt.s32.totalorder %s9435_s26, %s9435_s26 }
  0xea   : > { %p9438_p7 = pnand %p9436_p10, %p10106_p12  ;;  %p9445_p0 = por %p9444_p8, %p9443_p6 }
  0xec   : > { %p9439_p13 = pneg %p9438_p7 }
  0xee   : > { %p9446_p2 = pnand %p9445_p0, %p9439_p13 }
  0xf0   : > { %9449 = shalt.err (!%p9446_p2)
}
  0xf1   : > { %s11294_s8 = sld [smem:[#allocation52_spill]]  ;;  %s9823_s9 = smov [#allocation15]  }
  0xf2   : > { %s1084_s7 = sshll.u32 %s9823_s9, 4  ;;  %s9824_s15 = smov [#allocation18]   ;;  %s1085_s7 = int_to_ptr.vmem [resolvable:$true] %s1084_s7 }
  0xf3   : > { %s1112_s13 = sshll.u32 %s9824_s15, 4  ;;  %s9461_s2 = scalar_lea.vmem %s1085_s7, 2048  ;;  %s1113_s13 = int_to_ptr.vmem [resolvable:$true] %s1112_s13 }
  0xf4   : > { %p9462_p1 = scmp.ne.s32.totalorder %s1085_s7, %s9461_s2  ;;  %p9469_p4 = scmp.lt.s32.totalorder %s1085_s7, %s1085_s7 }
  0xf5   : > { %p9470_p5 = scmp.lt.s32.totalorder %s9461_s2, %s9461_s2 }
  0xf6   : > { %p9464_p9 = pnand %p9462_p1, %p10106_p12 }
  0xf7   : > { %8415 = dma.hbm_to_vmem [thread:$0]  (!%p10096_p11), %s11294_s8, 1024, %s1061_s22, [#allocation11], %s11293_s14, %s11293_s14, %s11292_s3  }
  0xf8   : > { %p9465_p3 = pneg %p9464_p9  ;;  %p9471_p10 = por %p9470_p5, %p9469_p4 }
  0xfa   : > { %p9472_p7 = pnand %p9471_p10, %p9465_p3 }
  0xfc   : > { %9475 = shalt.err (!%p9472_p7)
}
  0xfd   : > { %s11295_s12 = smov 4   ;;  %s11296_s26 = smov 64  }
  0xfe   : > { %s11297_s19 = sld [smem:[#allocation54_spill]]  ;;  %s9487_s22 = scalar_lea.vmem %s1113_s13, 32 }
  0xff   : > { %p9488_p13 = scmp.ne.s32.totalorder %s1113_s13, %s9487_s22  ;;  %p9495_p0 = scmp.lt.s32.totalorder %s1113_s13, %s1113_s13 }
 0x100   : > { %p9496_p2 = scmp.lt.s32.totalorder %s9487_s22, %s9487_s22 }
 0x101   : > { %p9490_p6 = pnand %p9488_p13, %p10106_p12 }
 0x102   : > { %p9497_p1 = por %p9496_p2, %p9495_p0 }
 0x103   : > { %p9491_p8 = pneg %p9490_p6 }
 0x104   : > { %8421 = dma.hbm_to_vmem [thread:$0]  (!%p10096_p11), %s11297_s19, 2048, %s1085_s7, [#allocation14], %s11296_s26, %s11296_s26, %s11295_s12  }
 0x105   : > { %p9498_p9 = pnand %p9497_p1, %p9491_p8 }
 0x107   : > { %9501 = shalt.err (!%p9498_p9)
}
 0x108   : > { %s11298_s6 = sld [smem:[#allocation56_spill]]  ;;  %s9825_s9 = smov [#allocation21]  }
 0x109   : > { %s1136_s15 = sshll.u32 %s9825_s9, 4  ;;  %s9826_s7 = smov [#allocation24]   ;;  %s1137_s15 = int_to_ptr.vmem [resolvable:$true] %s1136_s15 }
 0x10a   : > { %s1177_s2 = sshll.u32 %s9826_s7, 4  ;;  %s9513_s8 = scalar_lea.vmem %s1137_s15, 16  ;;  %s1178_s2 = int_to_ptr.vmem [resolvable:$true] %s1177_s2 }
 0x10b   : > { %p9514_p3 = scmp.ne.s32.totalorder %s1137_s15, %s9513_s8  ;;  %s9520_s17 = scalar_lea.vmem %s1137_s15, 32 }
 0x10c   : > { %p9521_p10 = scmp.lt.s32.totalorder %s1137_s15, %s1137_s15  ;;  %p9522_p7 = scmp.lt.s32.totalorder %s9520_s17, %s9513_s8 }
 0x10d   : > { %p9516_p4 = pnand %p9514_p3, %p10106_p12 }
 0x10e   : > { %8427 = dma.hbm_to_vmem [thread:$0]  (!%p10096_p11), %s11298_s6, 32, %s1113_s13, [#allocation17]  }
 0x10f   : > { %p9517_p5 = pneg %p9516_p4  ;;  %p9523_p13 = por %p9522_p7, %p9521_p10 }
 0x111   : > { %p9524_p6 = pnand %p9523_p13, %p9517_p5 }
 0x113   : > { %9527 = shalt.err (!%p9524_p6)
}
 0x114   : > { %s11299_s22 = sld [smem:[#allocation58_spill]]  ;;  %s9539_s13 = scalar_lea.vmem %s1178_s2, 32 }
 0x115   : > { %p9540_p8 = scmp.ne.s32.totalorder %s1178_s2, %s9539_s13  ;;  %p9547_p1 = scmp.lt.s32.totalorder %s1178_s2, %s1178_s2 }
 0x116   : > { %p9548_p9 = scmp.lt.s32.totalorder %s9539_s13, %s9539_s13 }
 0x117   : > { %p9542_p0 = pnand %p9540_p8, %p10106_p12 }
 0x118   : > { %p9549_p3 = por %p9548_p9, %p9547_p1 }
 0x119   : > { %p9543_p2 = pneg %p9542_p0 }
 0x11a   : > { %8433 = dma.hbm_to_vmem [thread:$0]  (!%p10096_p11), %s11299_s22, 16, %s1137_s15, [#allocation20]  }
 0x11b   : > { %p9550_p4 = pnand %p9549_p3, %p9543_p2 }
 0x11d   : > { %9553 = shalt.err (!%p9550_p4)
}
 0x11e   : > { %s9827_s17 = smov 16   ;;  %s11300_s8 = sld [smem:[#allocation66_spill]] }
 0x11f   : > { %s9828_s9 = smov 1   ;;  %s9829_s7 = smov [#allocation27]  }
 0x120   : > { %s1203_s15 = sshll.u32 %s9829_s7, 4  ;;  %s9830_s22 = smov [#allocation30]   ;;  %s1204_s15 = int_to_ptr.vmem [resolvable:$true] %s1203_s15 }
 0x121   : > { %s1232_s6 = sshll.u32 %s9830_s22, 4  ;;  %s9565_s19 = scalar_lea.vmem %s1204_s15, 32  ;;  %s1233_s6 = int_to_ptr.vmem [resolvable:$true] %s1232_s6 }
 0x122   : > { %p9566_p5 = scmp.ne.s32.totalorder %s1204_s15, %s9565_s19  ;;  %p9573_p13 = scmp.lt.s32.totalorder %s1204_s15, %s1204_s15 }
 0x123   : > { %p9574_p6 = scmp.lt.s32.totalorder %s9565_s19, %s9565_s19 }
 0x124   : > { %8439 = dma.hbm_to_vmem [thread:$0]  (!%p10096_p11), %s11300_s8, 32, %s1178_s2, [#allocation23], %s9827_s17, %s9827_s17, %s9828_s9  }
 0x125   : > { %p9568_p10 = pnand %p9566_p5, %p10106_p12  ;;  %p9575_p8 = por %p9574_p6, %p9573_p13 }
 0x127   : > { %p9569_p7 = pneg %p9568_p10 }
 0x129   : > { %p9576_p0 = pnand %p9575_p8, %p9569_p7 }
 0x12b   : > { %9579 = shalt.err (!%p9576_p0)
}
 0x12c   : > { %s11301_s13 = sld [smem:[#allocation67_spill]]  ;;  %s9591_s2 = scalar_lea.vmem %s1233_s6, 2048 }
 0x12d   : > { %p9592_p2 = scmp.ne.s32.totalorder %s1233_s6, %s9591_s2  ;;  %p9599_p3 = scmp.lt.s32.totalorder %s1233_s6, %s1233_s6 }
 0x12e   : > { %p9600_p4 = scmp.lt.s32.totalorder %s9591_s2, %s9591_s2 }
 0x12f   : > { %p9594_p1 = pnand %p9592_p2, %p10106_p12 }
 0x130   : > { %p9601_p5 = por %p9600_p4, %p9599_p3 }
 0x131   : > { %p9595_p9 = pneg %p9594_p1 }
 0x132   : > { %8445 = dma.hbm_to_vmem [thread:$0]  (!%p10096_p11), %s11301_s13, 32, %s1204_s15, [#allocation26], %s9827_s17, %s9827_s17, %s9828_s9  }
 0x133   : > { %p9602_p10 = pnand %p9601_p5, %p9595_p9 }
 0x135   : > { %9605 = shalt.err (!%p9602_p10)
}
 0x136   : > { %s11302_s19 = sld [smem:[#allocation69_spill]]  ;;  %s9831_s17 = smov [#allocation33]  }
 0x137   : > { %s1282_s8 = sshll.u32 %s9831_s17, 4  ;;  %s1283_s8 = int_to_ptr.vmem [resolvable:$true] %s1282_s8 }
 0x138   : > { %s9617_s9 = scalar_lea.vmem %s1283_s8, 6144  ;;  %p9625_p8 = scmp.lt.s32.totalorder %s1283_s8, %s1283_s8 }
 0x139   : > { %p9618_p7 = scmp.ne.s32.totalorder %s1283_s8, %s9617_s9  ;;  %p9626_p0 = scmp.lt.s32.totalorder %s9617_s9, %s9617_s9 }
 0x13b   : > { %p9620_p13 = pnand %p9618_p7, %p10106_p12  ;;  %p9627_p2 = por %p9626_p0, %p9625_p8 }
 0x13c   : > { %8451 = dma.hbm_to_vmem [thread:$0]  (!%p10096_p11), %s11302_s19, 2048, %s1233_s6, [#allocation29], %s11296_s26, %s11296_s26, %s11295_s12  }
 0x13d   : > { %p9621_p6 = pneg %p9620_p13 }
 0x13f   : > { %p9628_p1 = pnand %p9627_p2, %p9621_p6 }
 0x141   : > { %9631 = shalt.err (!%p9628_p1)
}
 0x142   : > { %s11303_s16 = sld [smem:[#allocation79_spill]]  ;;  %s7230_s6 = sadd.s32 4294967294, %s9762_s11  }
 0x143   : > { %s10245_s4 = sadd.s32 1, %s9762_s11   ;;  %s174_s12 = sadd.s32 1, %s9758_s10 }
 0x144   : > { %s171_s5 = ssub.s32 %s9762_s11, %s10245_s4  ;;  %s11304_s26 = sld [smem:[#allocation49_spill]] }
 0x145   : > { %p172_p12 = scmp.eq.s32.totalorder %s171_s5, 0  ;;  %p181_p9 = scmp.ne.s32.totalorder %s9758_s10, %s9754_s20 }
 0x146   : > { %p182_p3 = scmp.eq.s32.totalorder %s9762_s11, 0  ;;  %p187_p4 = scmp.ne.s32.totalorder %s9754_s20, %s9750_s0 }
 0x147   : > { %s10256_s7 = scalar_select %p172_p12, %s9758_s10, %s174_s12  }
 0x148   : > { %8457 = dma.hbm_to_vmem [thread:$0]  (!%p10096_p11), %s11303_s16, 6144, %s1283_s8, [#allocation32], %s11293_s14, %s11293_s14, %s11292_s3  }
 0x149   : > { %p10258_p5 = por %p182_p3, %p181_p9  ;;  %p11306_p10 = scmp.eq.s32.totalorder %s10082_s18, 0 }
 0x14a   : > { %p967_p7 = scmp.eq.s32.totalorder %s10082_s18, 1  ;;  %p973_p13 = scmp.eq.s32.totalorder %s7230_s6, 1 }
 0x14b   : > { %p10264_p11 = por %p11306_p10, %p187_p4  ;;  %p8484_p6 = scmp.lt.s32.totalorder %s9762_s11, 2 }
 0x14c   : > { %s1315_s13 = sand.u32 1, %s9758_s10   ;;  %p10271_p8 = por %p967_p7, %p181_p9 }
 0x14d   : > { %s11307_s22 = scalar_select %p10264_p11, 1, 0 }
 0x14e   : > { %s11308_s2 = scalar_select %p10271_p8, 1, 0 }
 0x14f   : > { %p10275_p0 = por %p973_p13, %p187_p4  ;;  %s7251_s17 = sshll.u32 %s1315_s13, 4 }
 0x150   : > { %s7754_s8 = sshll.u32 %s9762_s11, 8  ;;  %s1319_s6 = scalar_lea.vmem [#allocation4], %s7251_s17 }
 0x151   : > { %s11309_s19 = scalar_select %p10275_p0, 1, 0 }
 0x152   : > { %s10281_s9 = scalar_lea.hbm %s11304_s26, %s7754_s8  ;;  %s1326_s5 = sshll.u32 %s1319_s6, 4  ;;  %s10283_s5 = int_to_ptr.vmem [resolvable:$true] %s1326_s5 }
 0x153   : > { %p10287_p2 = pnand %p8484_p6, %p10258_p5  ;;  %s10291_s16 = scalar_lea.sflag [#allocation5], %s1315_s13 }
 0x154   : > { %s9632_s21 = scalar_lea.hbm %s10281_s9, 256  ;;  %s9637_s8 = scalar_lea.hbm %s11304_s26, 512 }
 0x155   : > { %p9633_p1 = scmp.ne.s32.totalorder %s10281_s9, %s9632_s21  ;;  %p9634_p12 = pneg %p10287_p2 }
 0x156   : > { %p9638_p4 = scmp.lt.s32.totalorder %s10281_s9, %s11304_s26  ;;  %p9639_p10 = scmp.lt.s32.totalorder %s9637_s8, %s9632_s21 }
 0x157   : > { %p9635_p9 = pnand %p9634_p12, %p9633_p1 }
 0x158   : > { %p9640_p7 = por %p9639_p10, %p9638_p4 }
 0x159   : > { %p9636_p3 = pneg %p9635_p9 }
 0x15b   : > { %p9641_p13 = pnand %p9640_p7, %p9636_p3 }
 0x15d   : > { %9644 = shalt.err (!%p9641_p13)
}
 0x15e   : > { %s9645_s15 = scalar_lea.vmem %s10283_s5, 256  ;;  %s9832_s13 = smov [#allocation4]  }
 0x15f   : > { %p9646_p5 = scmp.ne.s32.totalorder %s10283_s5, %s9645_s15  ;;  %s9650_s17 = sshll.u32 %s9832_s13, 4  ;;  %s9651_s17 = int_to_ptr.vmem [resolvable:$false] %s9650_s17 }
 0x160   : > { %s9652_s6 = scalar_lea.vmem %s9651_s17, 512  ;;  %p9653_p8 = scmp.lt.s32.totalorder %s10283_s5, %s9651_s17 }
 0x161   : > { %p9648_p6 = pnand %p9646_p5, %p9634_p12  ;;  %p9654_p1 = scmp.lt.s32.totalorder %s9652_s6, %s9645_s15 }
 0x163   : > { %p9649_p0 = pneg %p9648_p6  ;;  %p9655_p9 = por %p9654_p1, %p9653_p8 }
 0x165   : > { %p9656_p11 = pnand %p9655_p9, %p9649_p0 }
 0x167   : > { %9659 = shalt.err (!%p9656_p11)
}
 0x168   : > { %8461 = dma.hbm_to_vmem [thread:$0]  (!%p10287_p2), %s10281_s9, 256, %s10283_s5, %s10291_s16, %s11293_s14, %s11293_s14, %s11292_s3  }
 0x169   : > { %p11311_p12 = scmp.ne.s32.totalorder %s11284_s1, 0 }
 0x16a   : > { %s10314_s21 = sand.u32 (!%p11311_p12), 1, %s9754_s20   ;;  %p11312_p11 = scmp.ne.s32.totalorder (!%p11311_p12), %s11307_s22, 0 }
 0x16b   : > { %1338 = sbr.rel (%p11311_p12) target bundleno = 9498 (0x251a), region = 176  ;;  %s11229_s8 = sshll.u32 (!%p11311_p12), %s10314_s21, 4 }
 0x16c   : > { %s1341_s15 = scalar_lea.sflag (!%p11311_p12), [#allocation5], %s10314_s21  ;;  %s1344_s12 = scalar_lea.vmem (!%p11311_p12), [#allocation4], %s11229_s8 }
 0x170   : > { %9705 = dma.done.wait (%p11312_p11), %s1341_s15, 256  }
 0x171   : > { %9707 = vsyncadd (%p11312_p11), %s1341_s15, 4294967040  ;;  %p11313_p8 = scmp.eq.s32.totalorder %s10082_s18, 0 }
 0x173   : > { %9709 = dma.done.wait (%p11313_p8), [#allocation8], 512   ;;  %p11314_p0 = pmov %p11313_p8 }
 0x175   : > { %9711 = vsyncadd (%p11314_p0), [#allocation8], 4294966784  ;;  %p11315_p2 = pmov %p11314_p0 }
 0x176   : > { %p11316_p3 = pmov %p11314_p0 }
 0x177   : > { %9713 = dma.done.wait (%p11315_p2), [#allocation11], 1280  }
 0x178   : > { %9715 = vsyncadd (%p11316_p3), [#allocation11], 4294966016  ;;  %p11317_p4 = pmov %p11314_p0 }
 0x179   : > { %p11318_p10 = pmov %p11314_p0 }
 0x17a   : > { %9717 = dma.done.wait (%p11317_p4), [#allocation14], 2080  }
 0x17b   : > { %9719 = vsyncadd (%p11318_p10), [#allocation14], 4294965216  ;;  %p11319_p7 = pmov %p11314_p0 }
 0x17c   : > { %p11320_p13 = pmov %p11314_p0 }
 0x17d   : > { %9721 = dma.done.wait (%p11319_p7), [#allocation17], 48  }
 0x17e   : > { %9723 = vsyncadd (%p11320_p13), [#allocation17], 4294967248  ;;  %p11321_p5 = pmov %p11314_p0 }
 0x17f   : > { %p11322_p6 = pmov %p11314_p0 }
 0x180   : > { %9725 = dma.done.wait (%p11321_p5), [#allocation20], 2064  }
 0x181   : > { %9727 = vsyncadd (%p11322_p6), [#allocation20], 4294965232  ;;  %p11323_p1 = pmov %p11314_p0 }
 0x182   : > { %p11324_p9 = pmov %p11314_p0 }
 0x183   : > { %9729 = dma.done.wait (%p11323_p1), [#allocation23], 2080  }
 0x184   : > { %9731 = vsyncadd (%p11324_p9), [#allocation23], 4294965216  ;;  %p11325_p12 = pmov %p11314_p0 }
 0x185   : > { %p11326_p11 = pmov %p11314_p0 }
 0x186   : > { %9733 = dma.done.wait (%p11325_p12), [#allocation26], 2080  }
 0x187   : > { %9735 = vsyncadd (%p11326_p11), [#allocation26], 4294965216  ;;  %p11327_p8 = pmov %p11314_p0 }
 0x189   : > { %9737 = dma.done.wait (%p11327_p8), [#allocation29], 4096  }
 0x18a   : > { %9739 = vsyncadd (%p11314_p0), [#allocation29], 4294963200  ;;  %p11328_p2 = pmov %p11314_p0 }
 0x18b   : > { %p11329_p3 = pmov %p11314_p0 }
 0x18c   : > { %9741 = dma.done.wait (%p11328_p2), [#allocation32], 9216  }
 0x18d   : > { %9743 = vsyncadd (%p11329_p3), [#allocation32], 4294958080  ;;  %v9833_v0 = vmov 0   ;;  %p1528_p4 = scmp.lt.s32.totalorder %s10082_s18, 1  ;;  %vm1607_vm0 = vcmask 523264   ;;  %v10362_v1 = vld [vmem:[%s1344_s12] sm:$0xff] }
 0x18e   : > { %1643 = vmatprep.mubr.bf16.mxu0 %v9833_v0  ;;  %s11330_s14 = sld [smem:[#allocation47_spill]]  ;;  %v2156_v2 = vsel %vm1607_vm0, %v10362_v1, 0.0  ;;  %v8615_v3 = vld [vmem:[#allocation12 + $0x34] ss:$8 sps:$4 sm:$0xff]   ;;  %v8617_v4 = vld [vmem:[#allocation12 + $0x30] ss:$8 sps:$4 sm:$0xff]  }
 0x18f   : > { %s10365_s16 = scalar_select %p1528_p4, %s10082_s18, 1  ;;  %v10369_v5 = vld [vmem:[%s1344_s12 + $0x8] sm:$0xff]  ;;  %2157 = vadd.xlane.f32.xlu0 %v2156_v2  ;;  %1619 = vmatprep.subr.bf16.mxu0 %v8615_v3  ;;  %vm1895_vm1 = vcmask 130048   ;;  %v9834_v63 = vmov 0.0   ;;  %vm9835_vm2 = vmmov 0   ;;  %vm2736_vm3 = vcmask 261120  }
 0x190   : > { %v8618_v6 = vld [vmem:[#allocation12 + $0x24] ss:$8 sps:$4 sm:$0xff]   ;;  %s11331_s1 = sld [smem:[#allocation55_spill]]  ;;  %v2159_v7 = vsel %vm1607_vm0, %v10369_v5, 0.0  ;;  %1620 = vmatpush1.bf16.msra.mxu0 %v8617_v4  ;;  %v8620_v8 = vld [vmem:[#allocation12 + $0x20] ss:$8 sps:$4 sm:$0xff]  }
 0x191   : > { %s7755_s3 = sshll.u32 %s10365_s16, 4  ;;  %s11332_s22 = sld [smem:[#allocation48_spill]]  ;;  %1621 = vmatprep.subr.bf16.mxu0 %v8618_v6  ;;  %v8621_v9 = vld [vmem:[#allocation12 + $0x14] ss:$8 sps:$4 sm:$0xff]   ;;  %v8623_v10 = vld [vmem:[#allocation12 + $0x10] ss:$8 sps:$4 sm:$0xff]  }
 0x192   : > { %v8624_v11 = vld [vmem:[#allocation12 + $0x4] ss:$8 sps:$4 sm:$0xff]   ;;  %v8626_v12 = vld [vmem:[#allocation12] ss:$8 sps:$4 sm:$0xff]   ;;  %v8632_v23 = vld [vmem:[#allocation15 + $0x70] sm:$0xff]   ;;  %s11333_s13 = sld [smem:[#allocation61_spill]] }
 0x193   : > { %2160 = vadd.xlane.f32.xlu0 %v2159_v7  ;;  %v8630_v21 = vld [vmem:[#allocation15 + $0x78] sm:$0xff]   ;;  %v8633_v24 = vld [vmem:[#allocation15 + $0x30] sm:$0xff]   ;;  %v8634_v25 = vld [vmem:[#allocation15 + $0x68] sm:$0xff]   ;;  %s11334_s17 = sld [smem:[#allocation59_spill]]  ;;  %p11355_p7 = scmp.ne.s32.totalorder %s11308_s2, 0 }
 0x194   : > { %s1532_s9 = scalar_lea.vmem %s11330_s14, %s7755_s3  ;;  %1622 = vmatpush1.bf16.msra.mxu0 %v8620_v8  ;;  %v8631_v22 = vld [vmem:[#allocation15 + $0x38] sm:$0xff]   ;;  %7759 = vmatprep.subr.bf16.mxu1 %v8630_v21  ;;  %v8635_v26 = vld [vmem:[#allocation15 + $0x28] sm:$0xff]   ;;  %v8636_v27 = vld [vmem:[#allocation15 + $0x60] sm:$0xff]   ;;  %s11335_s6 = sld [smem:[#allocation60_spill]] }
 0x195   : > { %1623 = vmatprep.subr.bf16.mxu0 %v8621_v9  ;;  %v1544_v13 = vld [vmem:[%s1532_s9] sm:$0xff]  ;;  %v1545_v14 = vld [vmem:[%s1532_s9 + $0x8] sm:$0xff]  ;;  %7760 = vmatpush3.bf16.msra.mxu1 %v8631_v22  ;;  %v8638_v29 = vld [vmem:[#allocation15 + $0x20] sm:$0xff]   ;;  %s11336_s15 = sld [smem:[#allocation62_spill]] }
 0x196   : > { %v8629_v15 = vld [vmem:[%s11331_s1 + $0x4] ss:$8 sps:$4 sm:$0xff]   ;;  %v8627_v16 = vld [vmem:[%s11331_s1] ss:$8 sps:$4 sm:$0xff]   ;;  %v1546_v17 = vpack.c.bf16 %v1545_v14, %v1544_v13  ;;  %7761 = vmatprep.subr.bf16.mxu1 %v8632_v23  ;;  %v8649_v40 = vld [vmem:[#allocation19 + $0x60] sm:$0xff]   ;;  %s11337_s12 = sld [smem:[#allocation63_spill]] }
 0x197   : > { %s1537_s5 = scalar_lea.vmem %s11332_s22, %s7755_s3  ;;  %v8637_v28 = vld [vmem:[#allocation19 + $0x78] sm:$0xff]   ;;  %v8641_v32 = vld [vmem:[#allocation19 + $0x70] sm:$0xff]   ;;  %v8645_v36 = vld [vmem:[#allocation19 + $0x68] sm:$0xff]   ;;  %s11338_s14 = sld [smem:[#allocation64_spill]] }
 0x198   : > { %1624 = vmatpush1.bf16.msra.mxu0 %v8623_v10  ;;  %v1868_v18 = vld [vmem:[%s1537_s5] sm:$0xff]  ;;  %v1869_v19 = vld [vmem:[%s1537_s5 + $0x8] sm:$0xff]  ;;  %v8651_v42 = vld [vmem:[#allocation19 + $0x20] sm:$0xff]   ;;  %s11236_s3 = smov 16   ;;  %s11238_s22 = smov 112  }
 0x199   : > { %1625 = vmatprep.subr.bf16.mxu0 %v8624_v11  ;;  %v1870_v20 = vpack.c.bf16 %v1869_v19, %v1868_v18  ;;  %7762 = vmatpush3.bf16.msra.mxu1 %v8633_v24  ;;  %v8639_v30 = vld [vmem:[#allocation19 + $0x38] sm:$0xff]   ;;  %v8643_v34 = vld [vmem:[#allocation19 + $0x30] sm:$0xff]   ;;  %v8647_v38 = vld [vmem:[#allocation19 + $0x28] sm:$0xff]   ;;  %s11339_s9 = sld [smem:[#allocation68_spill]] }
 0x19a   : > { %7763 = vmatprep.subr.bf16.mxu1 %v8634_v25  ;;  %v8640_v31 = vld [vmem:[#allocation15 + $0x58] sm:$0xff]   ;;  %v8644_v35 = vld [vmem:[#allocation15 + $0x50] sm:$0xff]   ;;  %v8648_v39 = vld [vmem:[#allocation15 + $0x48] sm:$0xff]   ;;  %s11340_s5 = sld [smem:[#allocation50_spill]] }
 0x19b   : > { %v8642_v33 = vld [vmem:[#allocation15 + $0x18] sm:$0xff]   ;;  %v8646_v37 = vld [vmem:[#allocation15 + $0x10] sm:$0xff]   ;;  %v8650_v41 = vld [vmem:[#allocation15 + $0x8] sm:$0xff]   ;;  %s11341_s8 = sld [smem:[#allocation70_spill]] }
 0x19c   : > { %1626 = vmatpush1.bf16.msra.mxu0 %v8626_v12  ;;  %v8652_v43 = vld [vmem:[#allocation15 + $0x40] sm:$0xff]   ;;  %v8656_v47 = vld [vmem:[#allocation19 + $0x50] sm:$0xff]   ;;  %v8658_v49 = vld [vmem:[#allocation19 + $0x48] sm:$0xff]   ;;  %s11347_s1 = sld [smem:[#allocation76_spill]] }
 0x19d   : > { %1913 = vmatprep.subr.bf16.mxu0 %v8629_v15  ;;  %7764 = vmatpush3.bf16.msra.mxu1 %v8635_v26  ;;  %v8653_v44 = vld [vmem:[#allocation19 + $0x58] sm:$0xff]   ;;  %v8657_v48 = vld [vmem:[#allocation19 + $0x10] sm:$0xff]   ;;  %v8659_v50 = vld [vmem:[#allocation19 + $0x8] sm:$0xff]  }
 0x19e   : > { %7765 = vmatprep.subr.bf16.mxu1 %v8636_v27  ;;  %v8654_v45 = vld [vmem:[#allocation15] sm:$0xff]   ;;  %v1555_v4 = vld [vmem:[#allocation13] sm:$0x3] }
 0x19f   : > { %7289 = vmatmul.mubr.msk.bf16.vlgmr.msra.gmra.mxu0 %vm1607_vm0, %v1546_v17  ;;  %v8655_v46 = vld [vmem:[#allocation19 + $0x18] sm:$0xff]   ;;  %v8660_v51 = vld [vmem:[#allocation19 + $0x40] sm:$0xff]  }
 0x1a0   : > { %1914 = vmatpush1.bf16.msra.mxu0 %v8627_v16  ;;  %1931 = vmatprep.mubr.bf16.mxu0 %v9833_v0  ;;  %v8661_v52 = vld [vmem:[#allocation19] sm:$0xff]   ;;  %v1873_v13 = vld [vmem:[#allocation18] sm:$0x3] }
 0x1a1   : > { %7781 = vmatprep.subr.bf16.mxu0 %v8637_v28  ;;  %7766 = vmatpush3.bf16.msra.mxu1 %v8638_v29 }
 0x1a2   : > { %7767 = vmatprep.subr.bf16.mxu1 %v8640_v31 }
 0x1a5   : > { %7768 = vmatpush3.bf16.msra.mxu1 %v8642_v33 }
 0x1a6   : > { %7769 = vmatprep.subr.bf16.mxu1 %v8644_v35 }
 0x1a7   : > { %7309 = vmatmul.mubr.msk.bf16.vlgmr.msra.gmra.mxu0 %vm1895_vm1, %v1870_v20 }
 0x1a8   : > { %7782 = vmatpush3.bf16.msra.mxu0 %v8639_v30 }
 0x1a9   : > { %7783 = vmatprep.subr.bf16.mxu0 %v8641_v32  ;;  %7770 = vmatpush3.bf16.msra.mxu1 %v8646_v37 }
 0x1aa   : > { %7771 = vmatprep.subr.bf16.mxu1 %v8648_v39 }
 0x1ac   : > { %7784 = vmatpush3.bf16.msra.mxu0 %v8643_v34 }
 0x1ad   : > { %7785 = vmatprep.subr.bf16.mxu0 %v8645_v36  ;;  %7772 = vmatpush3.bf16.msra.mxu1 %v8650_v41 }
 0x1ae   : > { %7773 = vmatprep.subr.bf16.mxu1 %v8652_v43 }
 0x1b0   : > { %7786 = vmatpush3.bf16.msra.mxu0 %v8647_v38 }
 0x1b1   : > { %7787 = vmatprep.subr.bf16.mxu0 %v8649_v40  ;;  %7774 = vmatpush3.bf16.msra.mxu1 %v8654_v45 }
 0x1b2   : > { %8027 = vmatprep.subr.bf16.mxu1 %v9834_v63 }
 0x1b4   : > { %7788 = vmatpush3.bf16.msra.mxu0 %v8651_v42 }
 0x1b5   : > { %7789 = vmatprep.subr.bf16.mxu0 %v8653_v44 }
 0x1b8   : > { %7790 = vmatpush3.bf16.msra.mxu0 %v8655_v46 }
 0x1b9   : > { %7791 = vmatprep.subr.bf16.mxu0 %v8656_v47 }
 0x1bc   : > { %7792 = vmatpush3.bf16.msra.mxu0 %v8657_v48 }
 0x1bd   : > { %7793 = vmatprep.subr.bf16.mxu0 %v8658_v49 }
 0x1c0   : > { %7794 = vmatpush3.bf16.msra.mxu0 %v8659_v50 }
 0x1c1   : > { %7795 = vmatprep.subr.bf16.mxu0 %v8660_v51 }
 0x1c4   : > { %7796 = vmatpush3.bf16.msra.mxu0 %v8661_v52 }
 0x1c5   : > { %8015 = vmatprep.subr.bf16.mxu0 %v9834_v63 }
 0x218   : > { %v2158_v53 = vpop.xlane.xlu0 %2157 }
 0x219   : > { %v2163_v54 = vmul.f32 0.015625, %v2158_v53 }
 0x21b   : > { %v10382_v55 = vsub.f32 %v10362_v1, %v2163_v54  ;;  %v1557_v1 = vlaneseq }
 0x21c   : > { %v2161_v56 = vpop.xlane.xlu0 %2160 }
 0x21d   : > { %v2164_v57 = vmul.f32 0.015625, %v2161_v56  ;;  %v2167_v58 = vmul.f32 %v10382_v55, %v10382_v55  ;;  %v10396_v2 = vshrl.u32 %v1557_v1, 7 }
 0x21f   : > { %v10387_v59 = vsub.f32 %v10369_v5, %v2164_v57  ;;  %v2169_v60 = vsel %vm1607_vm0, %v2167_v58, 0.0  ;;  %v10399_v3 = vsub.s32 0, %v10396_v2  ;;  %v10402_v5 = vsub.s32 1, %v10396_v2 }
 0x220   : > { %2170 = vadd.xlane.f32.xlu1 %v2169_v60 }
 0x221   : > { %v2168_v61 = vmul.f32 %v10387_v59, %v10387_v59  ;;  %v1560_v6 = vrot.slane %v1555_v4, %v10399_v3  ;;  %v1564_v7 = vrot.slane %v1555_v4, %v10402_v5  ;;  %v1878_v19 = vrot.slane %v1873_v13, %v10399_v3 }
 0x222   : > { %v1882_v25 = vrot.slane %v1873_v13, %v10402_v5 }
 0x223   : > { %v2172_v62 = vsel %vm1607_vm0, %v2168_v61, 0.0 }
 0x224   : > { %2173 = vadd.xlane.f32.xlu1 %v2172_v62 }
 0x25f   : > { %v1645_v8 = vpop.f32.mrf.mxu0 }
 0x260   : > { %v10406_v9 = vadd.f32 %v1645_v8, %v1560_v6 }
 0x261   : > { %v1647_v10 = vpop.f32.mrf.mxu0 }
 0x262   : > { %v1654_v11 = vmul.f32 %v10406_v9, %v10406_v9  ;;  %v10410_v12 = vadd.f32 %v1647_v10, %v1564_v7 }
 0x263   : > { %v1649_v14 = vpop.f32.mrf.mxu0 }
 0x264   : > { %v1658_v15 = vmul.f32 %v1654_v11, %v10406_v9  ;;  %v1655_v16 = vmul.f32 %v10410_v12, %v10410_v12  ;;  %v10415_v17 = vadd.f32 %v1649_v14, %v1560_v6 }
 0x265   : > { %v1651_v18 = vpop.f32.mrf.mxu0 }
 0x266   : > { %v1662_v20 = vmul.f32 0.044715, %v1658_v15  ;;  %v1659_v21 = vmul.f32 %v1655_v16, %v10410_v12  ;;  %v1656_v22 = vmul.f32 %v10415_v17, %v10415_v17  ;;  %v10421_v23 = vadd.f32 %v1651_v18, %v1564_v7 }
 0x267   : > { %v1933_v24 = vpop.f32.mrf.mxu0 }
 0x268   : > { %v1666_v26 = vadd.f32 %v1662_v20, %v10406_v9  ;;  %v1663_v27 = vmul.f32 0.044715, %v1659_v21  ;;  %v1660_v28 = vmul.f32 %v1656_v22, %v10415_v17  ;;  %v1657_v29 = vmul.f32 %v10421_v23, %v10421_v23 }
 0x269   : > { %v10428_v30 = vadd.f32 %v1933_v24, %v1878_v19  ;;  %v1935_v31 = vpop.f32.mrf.mxu0 }
 0x26a   : > { %v1670_v32 = vmul.f32 0.7978846, %v1666_v26  ;;  %v1664_v33 = vmul.f32 0.044715, %v1660_v28  ;;  %v1661_v34 = vmul.f32 %v1657_v29, %v10421_v23  ;;  %v1667_v35 = vadd.f32 %v1663_v27, %v10410_v12 }
 0x26b   : > { %v7310_v36 = vmul.f32 -1.442695, %v10428_v30  ;;  %v1936_v37 = vadd.f32 %v1935_v31, %v1882_v25  ;;  %v1937_v38 = vpop.f32.mrf.mxu0  ;;  %v8662_v31 = vld [vmem:[%s11333_s13 + $0x18] sm:$0xff]  }
 0x26c   : > { %8994 = vtanh.f32 %v1670_v32  ;;  %v1668_v39 = vadd.f32 %v1664_v33, %v10415_v17  ;;  %v1665_v40 = vmul.f32 0.044715, %v1661_v34  ;;  %v1938_v41 = vadd.f32 %v1937_v38, %v1878_v19  ;;  %v8663_v33 = vld [vmem:[%s11333_s13 + $0x10] sm:$0xff]   ;;  %v8664_v34 = vld [vmem:[%s11333_s13 + $0x8] sm:$0xff]  }
 0x26d   : > { %8996 = vpow2.f32 %v7310_v36  ;;  %v7311_v42 = vmul.f32 -1.442695, %v1936_v37  ;;  %v1939_v43 = vpop.f32.mrf.mxu0  ;;  %v1671_v48 = vmul.f32 0.7978846, %v1667_v35 }
 0x26e   : > { %v1672_v44 = vmul.f32 0.7978846, %v1668_v39  ;;  %v1669_v45 = vadd.f32 %v1665_v40, %v10421_v23  ;;  %v7312_v46 = vmul.f32 -1.442695, %v1938_v41  ;;  %v1940_v47 = vadd.f32 %v1939_v43, %v1882_v25  ;;  %v7331_v43 = vld [vmem:[%s11334_s17] ss:$0 sm:$0xff] }
 0x26f   : > { %8998 = vpow2.f32 %v7311_v42  ;;  %s2289_s17 = sld [smem:[#allocation3 + %s10082_s18]] }
 0x270   : > { %9000 = vtanh.f32 %v1672_v44  ;;  %v7313_v49 = vmul.f32 -1.442695, %v1940_v47  ;;  %v1673_v50 = vmul.f32 0.7978846, %v1669_v45 }
 0x271   : > { %9002 = vpow2.f32 %v7312_v46 }
 0x272   : > { %9004 = vpow2.f32 %v7313_v49 }
 0x273   : > { %9006 = vtanh.f32 %v1671_v48 }
 0x274   : > { %9008 = vtanh.f32 %v1673_v50 }
 0x279   : > { %v8995_v51 = vpop.eup %8994 }
 0x27a   : > { %v8997_v52 = vpop.eup %8996  ;;  %v1678_v54 = vadd.f32 1.0, %v8995_v51 }
 0x27b   : > { %v1954_v53 = vadd.f32 1.0, %v8997_v52 }
 0x27c   : > { %v8999_v56 = vpop.eup %8998  ;;  %v1682_v6 = vmul.f32 0.5, %v1678_v54 }
 0x27d   : > { %v9001_v57 = vpop.eup %9000  ;;  %v1955_v58 = vadd.f32 1.0, %v8999_v56  ;;  %9010 = vrcp.f32 %v1954_v53 }
 0x27e   : > { %v9003_v60 = vpop.eup %9002  ;;  %v1680_v61 = vadd.f32 1.0, %v9001_v57  ;;  %v1686_v16 = vmul.f32 %v1682_v6, %v10406_v9 }
 0x27f   : > { %v9005_v62 = vpop.eup %9004  ;;  %v1956_v4 = vadd.f32 1.0, %v9003_v60  ;;  %9012 = vrcp.f32 %v1955_v58 }
 0x280   : > { %v9007_v7 = vpop.eup %9006  ;;  %v1957_v8 = vadd.f32 1.0, %v9005_v62  ;;  %v1684_v10 = vmul.f32 0.5, %v1680_v61 }
 0x281   : > { %v9009_v11 = vpop.eup %9008  ;;  %9014 = vrcp.f32 %v1956_v4  ;;  %v1679_v13 = vadd.f32 1.0, %v9007_v7 }
 0x282   : > { %9016 = vrcp.f32 %v1957_v8  ;;  %v1681_v14 = vadd.f32 1.0, %v9009_v11  ;;  %v1688_v18 = vmul.f32 %v1684_v10, %v10415_v17  ;;  %v7330_v10 = vld [vmem:[#allocation21] ss:$0 sm:$0xff] }
 0x283   : > { %v1683_v15 = vmul.f32 0.5, %v1679_v13 }
 0x284   : > { %v1685_v19 = vmul.f32 0.5, %v1681_v14  ;;  %v1690_v22 = vpack.c.bf16 %v1688_v18, %v1686_v16  ;;  %v7338_v16 = vld [vmem:[%s11336_s15] ss:$0 sm:$0xff]  ;;  %s11232_s15 = smov 64  }
 0x285   : > { %v1687_v20 = vmul.f32 %v1683_v15, %v10410_v12 }
 0x286   : > { %v1689_v21 = vmul.f32 %v1685_v19, %v10421_v23 }
 0x288   : > { %v1691_v24 = vpack.c.bf16 %v1689_v21, %v1687_v20 }
 0x28a   : > { %1859 = vmatprep.mubr.bf16.mxu1 %v1691_v24  ;;  %v9011_v25 = vpop.eup %9010 }
 0x28b   : > { %1860 = vmatmul.mubr.bf16.vlgmr.msra.gmra.mxu1 %v1690_v22  ;;  %v1966_v27 = vmul.f32 %v9011_v25, %v10428_v30  ;;  %v8665_v30 = vld [vmem:[%s11333_s13] sm:$0xff]  }
 0x28c   : > { %8043 = vmatprep.mubr.msk.bf16.mxu1 %vm9835_vm2, %v9834_v63  ;;  %v9013_v26 = vpop.eup %9012 }
 0x28d   : > { %v1967_v23 = vmul.f32 %v9013_v26, %v1936_v37 }
 0x28e   : > { %v9015_v9 = vpop.eup %9014 }
 0x28f   : > { %v9017_v17 = vpop.eup %9016  ;;  %v1968_v12 = vmul.f32 %v9015_v9, %v1938_v41  ;;  %v8666_v9 = vld [vmem:[#allocation22 + $0x38] sm:$0xff]  }
 0x290   : > { %v1969_v28 = vmul.f32 %v9017_v17, %v1940_v47  ;;  %v7332_v47 = vld [vmem:[%s11335_s6] ss:$0 sm:$0xff]  ;;  %v8667_v17 = vld [vmem:[#allocation25 + $0x38] sm:$0xff]   ;;  %8028 = vmatpush3.bf16.msra.mxu1 %v8666_v9  ;;  %s11234_s6 = smov 96  }
 0x291   : > { %v1970_v32 = vpack.c.bf16 %v1968_v12, %v1966_v27  ;;  %8029 = vmatprep.subr.bf16.mxu1 %v9834_v63 }
 0x292   : > { %v1971_v29 = vpack.c.bf16 %v1969_v28, %v1967_v23 }
 0x294   : > { %2132 = vmatprep.mubr.bf16.mxu0 %v1971_v29 }
 0x295   : > { %2133 = vmatmul.mubr.bf16.vlgmr.msra.gmra.mxu0 %v1970_v32 }
 0x296   : > { %8016 = vmatpush3.bf16.msra.mxu0 %v8662_v31  ;;  %8023 = vmatprep.mubr.msk.bf16.mxu0 %vm9835_vm2, %v9834_v63 }
 0x297   : > { %8017 = vmatprep.subr.bf16.mxu0 %v9834_v63 }
 0x29a   : > { %8018 = vmatpush3.bf16.msra.mxu0 %v8663_v33 }
 0x29b   : > { %8019 = vmatprep.subr.bf16.mxu0 %v9834_v63 }
 0x29e   : > { %8020 = vmatpush3.bf16.msra.mxu0 %v8664_v34  ;;  %v8668_v34 = vld [vmem:[#allocation22 + $0x30] sm:$0xff]  }
 0x29f   : > { %8021 = vmatprep.subr.bf16.mxu0 %v9834_v63  ;;  %8030 = vmatpush3.bf16.msra.mxu1 %v8668_v34 }
 0x2a0   : > { %8031 = vmatprep.subr.bf16.mxu1 %v9834_v63 }
 0x2a2   : > { %8022 = vmatpush3.bf16.msra.mxu0 %v8665_v30  ;;  %v8669_v30 = vld [vmem:[#allocation25 + $0x30] sm:$0xff]  }
 0x2a3   : > { %8047 = vmatprep.subr.bf16.mxu0 %v9834_v63 }
 0x2a9   : > { %v2171_v35 = vpop.xlane.xlu1 %2170 }
 0x2aa   : > { %v2175_v36 = vmul.f32 0.015625, %v2171_v35  ;;  %v8670_v35 = vld [vmem:[#allocation22 + $0x28] sm:$0xff]  }
 0x2ab   : > { %8032 = vmatpush3.bf16.msra.mxu1 %v8670_v35 }
 0x2ac   : > { %v2177_v37 = vadd.f32 1e-05, %v2175_v36  ;;  %v8671_v36 = vld [vmem:[#allocation25 + $0x28] sm:$0xff]   ;;  %8033 = vmatprep.subr.bf16.mxu1 %v9834_v63 }
 0x2ad   : > { %v2174_v38 = vpop.xlane.xlu1 %2173 }
 0x2ae   : > { %9018 = vrsqrt.f32 %v2177_v37  ;;  %v2176_v39 = vmul.f32 0.015625, %v2174_v38  ;;  %v8672_v37 = vld [vmem:[#allocation22 + $0x20] sm:$0xff]  }
 0x2af   : > { %v8673_v38 = vld [vmem:[#allocation25 + $0x20] sm:$0xff]   ;;  %8034 = vmatpush3.bf16.msra.mxu1 %v8672_v37 }
 0x2b0   : > { %v2178_v40 = vadd.f32 1e-05, %v2176_v39  ;;  %v8674_v39 = vld [vmem:[#allocation22 + $0x18] sm:$0xff]   ;;  %8035 = vmatprep.subr.bf16.mxu1 %v9834_v63 }
 0x2b2   : > { %9020 = vrsqrt.f32 %v2178_v40  ;;  %v8675_v40 = vld [vmem:[#allocation25 + $0x18] sm:$0xff]  }
 0x2b3   : > { %8036 = vmatpush3.bf16.msra.mxu1 %v8674_v39  ;;  %v2299_v39 = vld [vmem:[#allocation9] sm:$0xff] }
 0x2b4   : > { %8037 = vmatprep.subr.bf16.mxu1 %v9834_v63 }
 0x2bb   : > { %v9019_v41 = vpop.eup %9018 }
 0x2bc   : > { %v2181_v42 = vmul.f32 %v9019_v41, %v10382_v55  ;;  %v8676_v41 = vld [vmem:[#allocation22 + $0x10] sm:$0xff]  }
 0x2bd   : > { %8038 = vmatpush3.bf16.msra.mxu1 %v8676_v41  ;;  %v2297_v41 = vld [vmem:[#allocation7] sm:$0xff] }
 0x2be   : > { %v2189_v46 = vmul.f32 %v7331_v43, %v2181_v42  ;;  %v8677_v42 = vld [vmem:[#allocation25 + $0x10] sm:$0xff]   ;;  %8039 = vmatprep.subr.bf16.mxu1 %v9834_v63 }
 0x2bf   : > { %v9021_v44 = vpop.eup %9020 }
 0x2c0   : > { %v2182_v45 = vmul.f32 %v9021_v44, %v10387_v59  ;;  %v2197_v49 = vadd.f32 %v7332_v47, %v2189_v46  ;;  %v7290_v59 = vld [vmem:[#allocation16] ss:$0 sm:$0xff]  ;;  %v8679_v44 = vld [vmem:[#allocation25 + $0x8] sm:$0xff]   ;;  %v8681_v46 = vld [vmem:[#allocation25] sm:$0xff]  }
 0x2c2   : > { %v2190_v48 = vmul.f32 %v7331_v43, %v2182_v45  ;;  %v8678_v43 = vld [vmem:[#allocation22 + $0x8] sm:$0xff]   ;;  %v8680_v45 = vld [vmem:[#allocation22] sm:$0xff]  }
 0x2c3   : > { %8040 = vmatpush3.bf16.msra.mxu1 %v8678_v43 }
 0x2c4   : > { %v2198_v50 = vadd.f32 %v7332_v47, %v2190_v48  ;;  %8041 = vmatprep.subr.bf16.mxu1 %v9834_v63 }
 0x2c6   : > { %v2199_v51 = vpack.c.bf16 %v2198_v50, %v2197_v49 }
 0x2c7   : > { %8042 = vmatpush3.bf16.msra.mxu1 %v8680_v45 }
 0x2c8   : > { %8024 = vmatmul.mubr.msk.bf16.vlgmr.msra.gmra.mxu0 %vm1607_vm0, %v2199_v51  ;;  %8067 = vmatprep.subr.bf16.mxu1 %v9834_v63 }
 0x2c9   : > { %8063 = vmatprep.mubr.msk.bf16.mxu0 %vm9835_vm2, %v9834_v63  ;;  %8048 = vmatpush3.bf16.msra.mxu0 %v8667_v17 }
 0x2ca   : > { %8049 = vmatprep.subr.bf16.mxu0 %v9834_v63 }
 0x2cd   : > { %8050 = vmatpush3.bf16.msra.mxu0 %v8669_v30 }
 0x2ce   : > { %8051 = vmatprep.subr.bf16.mxu0 %v9834_v63 }
 0x2d1   : > { %8052 = vmatpush3.bf16.msra.mxu0 %v8671_v36 }
 0x2d2   : > { %8053 = vmatprep.subr.bf16.mxu0 %v9834_v63 }
 0x2d5   : > { %8054 = vmatpush3.bf16.msra.mxu0 %v8673_v38 }
 0x2d6   : > { %8055 = vmatprep.subr.bf16.mxu0 %v9834_v63 }
 0x2d9   : > { %8056 = vmatpush3.bf16.msra.mxu0 %v8675_v40 }
 0x2da   : > { %8057 = vmatprep.subr.bf16.mxu0 %v9834_v63 }
 0x2dd   : > { %8058 = vmatpush3.bf16.msra.mxu0 %v8677_v42  ;;  %v2300_v42 = vld [vmem:[#allocation9 + $0x8] sm:$0xff] }
 0x2de   : > { %8059 = vmatprep.subr.bf16.mxu0 %v9834_v63 }
 0x2e1   : > { %8060 = vmatpush3.bf16.msra.mxu0 %v8679_v44  ;;  %v2298_v44 = vld [vmem:[#allocation7 + $0x8] sm:$0xff] }
 0x2e2   : > { %8061 = vmatprep.subr.bf16.mxu0 %v9834_v63 }
 0x2e5   : > { %8062 = vmatpush3.bf16.msra.mxu0 %v8681_v46 }
 0x2e6   : > { %8087 = vmatprep.subr.bf16.mxu0 %v9834_v63 }
 0x34b   : > { %v7775_v52 = vpop.f32.mrf.mxu1 }
 0x34d   : > { %v7776_v54 = vpop.f32.mrf.mxu1 }
 0x34e   : > { %v7777_v58 = vadd.f32 %v7776_v54, %v7775_v52 }
 0x34f   : > { %v7778_v55 = vpop.f32.mrf.mxu1 }
 0x350   : > { %v1862_v4 = vadd.f32 %v7777_v58, %v7290_v59 }
 0x351   : > { %v7779_v60 = vpop.f32.mrf.mxu1 }
 0x352   : > { %v7780_v6 = vadd.f32 %v7779_v60, %v7778_v55 }
 0x354   : > { %v1865_v11 = vadd.f32 %v7780_v6, %v7290_v59  ;;  %v7340_v59 = vld [vmem:[%s11338_s14] ss:$0 sm:$0xff] }
 0x355   : > { %v7797_v53 = vpop.f32.mrf.mxu0 }
 0x357   : > { %v7798_v56 = vpop.f32.mrf.mxu0 }
 0x358   : > { %v7799_v61 = vadd.f32 %v7798_v56, %v7797_v53  ;;  %v7339_v56 = vld [vmem:[%s11337_s12] ss:$0 sm:$0xff] }
 0x359   : > { %v7800_v57 = vpop.f32.mrf.mxu0 }
 0x35a   : > { %v2141_v7 = vadd.f32 %v7799_v61, %v1862_v4  ;;  %v8682_v4 = vld [vmem:[#allocation28 + $0x38] sm:$0xff]  }
 0x35b   : > { %v7801_v62 = vpop.f32.mrf.mxu0 }
 0x35c   : > { %v7802_v8 = vadd.f32 %v7801_v62, %v7800_v57  ;;  %v2150_v14 = vadd.f32 %v7330_v10, %v2141_v7  ;;  %v8683_v7 = vld [vmem:[#allocation28 + $0x30] sm:$0xff]  }
 0x35e   : > { %v2142_v13 = vadd.f32 %v7802_v8, %v1865_v11  ;;  %v8684_v8 = vld [vmem:[#allocation28 + $0x28] sm:$0xff]   ;;  %v8686_v11 = vld [vmem:[#allocation28 + $0x18] sm:$0xff]  }
 0x360   : > { %v2151_v21 = vadd.f32 %v7330_v10, %v2142_v13  ;;  %v8685_v10 = vld [vmem:[#allocation28 + $0x20] sm:$0xff]   ;;  %v8687_v13 = vld [vmem:[#allocation28 + $0x10] sm:$0xff]  }
 0x388   : > { %v2269_v15 = vpop.f32.mrf.mxu0 }
 0x389   : > { %v2276_v18 = vadd.f32 %v2269_v15, %v2150_v14  ;;  %v8688_v14 = vld [vmem:[#allocation28 + $0x8] sm:$0xff]   ;;  %v8689_v15 = vld [vmem:[#allocation28] sm:$0xff]  }
 0x38a   : > { %v8025_v19 = vpop.f32.mrf.mxu0 }
 0x38b   : > { %v10460_v20 = vadd.f32 %v7338_v16, %v2276_v18 }
 0x38c   : > { %v2272_v22 = vpop.f32.mrf.mxu0 }
 0x38d   : > { %v2277_v24 = vadd.f32 %v2272_v22, %v2151_v21  ;;  %2305 = vadd.xlane.f32.xlu0 %v10460_v20  ;;  %v7341_v22 = vld [vmem:[#allocation24] ss:$0 sm:$0xff] }
 0x38e   : > { %v8026_v25 = vpop.f32.mrf.mxu0 }
 0x38f   : > { %v10463_v26 = vadd.f32 %v7338_v16, %v2277_v24  ;;  %v7350_v16 = vld [vmem:[#allocation27] ss:$0 sm:$0xff] }
 0x391   : > { %2307 = vadd.xlane.f32.xlu1 %v10463_v26 }
 0x416   : > { %v2306_v27 = vpop.xlane.xlu0 %2305 }
 0x417   : > { %v2310_v12 = vmul.f32 0.0078125, %v2306_v27 }
 0x419   : > { %v2312_v23 = vsub.f32 %v10460_v20, %v2310_v12 }
 0x41a   : > { %v2308_v28 = vpop.xlane.xlu1 %2307 }
 0x41b   : > { %v2311_v29 = vmul.f32 0.0078125, %v2308_v28  ;;  %v2314_v31 = vmul.f32 %v2312_v23, %v2312_v23 }
 0x41d   : > { %v2313_v32 = vsub.f32 %v10463_v26, %v2311_v29  ;;  %2316 = vadd.xlane.f32.xlu0 %v2314_v31 }
 0x41f   : > { %v2315_v33 = vmul.f32 %v2313_v32, %v2313_v32 }
 0x421   : > { %2318 = vadd.xlane.f32.xlu1 %v2315_v33 }
 0x4a6   : > { %v2317_v47 = vpop.xlane.xlu0 %2316 }
 0x4a7   : > { %v2320_v48 = vmul.f32 0.0078125, %v2317_v47 }
 0x4a9   : > { %v2322_v49 = vadd.f32 1e-05, %v2320_v48  ;;  %v2301_v48 = vld [vmem:[#allocation10] sm:$0xff] }
 0x4aa   : > { %v2319_v50 = vpop.xlane.xlu1 %2318 }
 0x4ab   : > { %9022 = vrsqrt.f32 %v2322_v49  ;;  %v2321_v51 = vmul.f32 0.0078125, %v2319_v50  ;;  %v2302_v50 = vld [vmem:[#allocation10 + $0x8] sm:$0xff] }
 0x4ad   : > { %v2323_v52 = vadd.f32 1e-05, %v2321_v51 }
 0x4af   : > { %9024 = vrsqrt.f32 %v2323_v52 }
 0x4b8   : > { %v9023_v53 = vpop.eup %9022 }
 0x4b9   : > { %v2326_v54 = vmul.f32 %v9023_v53, %v2312_v23 }
 0x4bb   : > { %v2334_v58 = vmul.f32 %v7339_v56, %v2326_v54 }
 0x4bc   : > { %v9025_v55 = vpop.eup %9024 }
 0x4bd   : > { %v2327_v57 = vmul.f32 %v9025_v55, %v2313_v32  ;;  %v2342_v61 = vadd.f32 %v7340_v59, %v2334_v58  ;;  %v7359_v32 = vld [vmem:[%s11339_s9] ss:$0 sm:$0xff] }
 0x4bf   : > { %v2335_v60 = vmul.f32 %v7339_v56, %v2327_v57 }
 0x4c1   : > { %v2343_v62 = vadd.f32 %v7340_v59, %v2335_v60 }
 0x4c3   : > { %v2344_v6 = vpack.c.bf16 %v2343_v62, %v2342_v61 }
 0x4c5   : > { %8044 = vmatmul.mubr.bf16.vlgmr.msra.gmra.mxu1 %v2344_v6  ;;  %8064 = vmatmul.mubr.bf16.vlgmr.msra.gmra.mxu0 %v2344_v6 }
 0x4c6   : > { %8068 = vmatpush3.bf16.msra.mxu1 %v8682_v4  ;;  %8083 = vmatprep.mubr.msk.bf16.mxu1 %vm9835_vm2, %v9834_v63 }
 0x4c7   : > { %8069 = vmatprep.subr.bf16.mxu1 %v9834_v63  ;;  %8089 = vmatprep.mubr.msk.bf16.mxu0 %vm9835_vm2, %v9834_v63 }
 0x4ca   : > { %8070 = vmatpush3.bf16.msra.mxu1 %v8683_v7 }
 0x4cb   : > { %8071 = vmatprep.subr.bf16.mxu1 %v9834_v63 }
 0x4ce   : > { %8072 = vmatpush3.bf16.msra.mxu1 %v8684_v8 }
 0x4cf   : > { %8073 = vmatprep.subr.bf16.mxu1 %v9834_v63 }
 0x4d2   : > { %8074 = vmatpush3.bf16.msra.mxu1 %v8685_v10 }
 0x4d3   : > { %8075 = vmatprep.subr.bf16.mxu1 %v9834_v63 }
 0x4d6   : > { %8076 = vmatpush3.bf16.msra.mxu1 %v8686_v11 }
 0x4d7   : > { %8077 = vmatprep.subr.bf16.mxu1 %v9834_v63 }
 0x4da   : > { %8078 = vmatpush3.bf16.msra.mxu1 %v8687_v13 }
 0x4db   : > { %8079 = vmatprep.subr.bf16.mxu1 %v9834_v63 }
 0x4de   : > { %8080 = vmatpush3.bf16.msra.mxu1 %v8688_v14 }
 0x4df   : > { %8081 = vmatprep.subr.bf16.mxu1 %v9834_v63 }
 0x4e2   : > { %8082 = vmatpush3.bf16.msra.mxu1 %v8689_v15 }
 0x4e3   : > { %8111 = vmatprep.subr.bf16.mxu1 %v9834_v63 }
 0x4e5   : > { %8084 = vmatmul.mubr.bf16.vlgmr.msra.gmra.mxu1 %v2344_v6 }
 0x4e6   : > { %8115 = vmatprep.mubr.msk.bf16.mxu1 %vm9835_vm2, %v9834_v63 }
 0x585   : > { %v2450_v18 = vpop.f32.mrf.mxu1  ;;  %v2562_v19 = vpop.f32.mrf.mxu0 }
 0x586   : > { %v2563_v21 = vadd.f32 %v7350_v16, %v2562_v19  ;;  %v2451_v27 = vadd.f32 %v7341_v22, %v2450_v18 }
 0x587   : > { %v8045_v24 = vpop.f32.mrf.mxu1  ;;  %v8065_v25 = vpop.f32.mrf.mxu0 }
 0x588   : > { %2598 = vrot.lane.b32.xlu1 %v2563_v21, %s11236_s3  ;;  %2590 = vrot.lane.b32.xlu0 %v2563_v21, %s11238_s22  ;;  %v2588_v46 = vmul.f32 %v2563_v21, %v2297_v41  ;;  %v2569_v6 = vmul.f32 %v2451_v27, %v2297_v41  ;;  %v2288_v21 = vand.u32 127, %v1557_v1  ;;  %v9838_v24 = vmov -1e+09  }
 0x589   : > { %v2453_v9 = vpop.f32.mrf.mxu1  ;;  %v2565_v17 = vpop.f32.mrf.mxu0 }
 0x58a   : > { %v2566_v12 = vadd.f32 %v7350_v16, %v2565_v17  ;;  %v2454_v29 = vadd.f32 %v7341_v22, %v2453_v9  ;;  %v2290_v22 = vstv %s2289_s17  ;;  %v2293_v9 = vld [vmem:[%s11340_s5] sm:$0xff]  ;;  %s11230_s17 = smov 32  }
 0x58b   : > { %v8046_v23 = vpop.f32.mrf.mxu1  ;;  %v8066_v28 = vpop.f32.mrf.mxu0  ;;  %vm2291_vm4 = vcmp.lt.s32.totalorder %v2288_v21, %v2290_v22 }
 0x58c   : > { %2592 = vrot.lane.b32.xlu1 %v2566_v12, %s11238_s22  ;;  %2571 = vrot.lane.b32.xlu0 %v2451_v27, %s11238_s22  ;;  %v2589_v52 = vmul.f32 %v2566_v12, %v2298_v44  ;;  %v2570_v8 = vmul.f32 %v2454_v29, %v2298_v44  ;;  %v2292_v25 = vsel %vm2291_vm4, 0.0, %v9838_v24 }
 0x58d   : > { %v10527_v17 = vadd.f32 %v2293_v9, %v2292_v25 }
 0x590   : > { %2600 = vrot.lane.b32.xlu1 %v2566_v12, %s11236_s3  ;;  %2579 = vrot.lane.b32.xlu0 %v2451_v27, %s11236_s3  ;;  %v2294_v27 = vld [vmem:[%s11340_s5 + $0x8] sm:$0xff]  ;;  %s11348_s5 = smov 112  }
 0x591   : > { %v10531_v28 = vadd.f32 %v2294_v27, %v2292_v25  ;;  %v8692_v27 = vld [vmem:[#allocation30 + $0x18] sm:$0xff]  }
 0x592   : > { %8112 = vmatpush3.bf16.msra.mxu1 %v8692_v27 }
 0x593   : > { %8113 = vmatprep.subr.bf16.mxu1 %v9834_v63 }
 0x594   : > { %2573 = vrot.lane.b32.xlu1 %v2454_v29, %s11238_s22  ;;  %s11346_s22 = sld [smem:[#allocation74_spill]] }
 0x598   : > { %2581 = vrot.lane.b32.xlu1 %v2454_v29, %s11236_s3  ;;  %s11345_s3 = sld [smem:[#allocation75_spill]] }
 0x5a5   : > { %v2712_v31 = vpop.f32.mrf.mxu1 }
 0x5a6   : > { %v2713_v30 = vadd.f32 %v7359_v32, %v2712_v31 }
 0x5a7   : > { %v8085_v33 = vpop.f32.mrf.mxu1 }
 0x5a9   : > { %v2715_v34 = vpop.f32.mrf.mxu1 }
 0x5aa   : > { %v2716_v35 = vadd.f32 %v7359_v32, %v2715_v34 }
 0x5ab   : > { %v8086_v36 = vpop.f32.mrf.mxu1 }
 0x5ac   : > { %v10509_v37 = vpack.c.bf16 %v2716_v35, %v2713_v30 }
 0x5fa   : > { %v2599_v38 = vpop.permute.xlu1 %2598  ;;  %v2591_v40 = vpop.permute.xlu0 %2590 }
 0x5fb   : > { %v2594_v43 = vmul.f32 %v2591_v40, %v2299_v39  ;;  %v2602_v54 = vmul.f32 %v2599_v38, %v2301_v48 }
 0x5fd   : > { %v2596_v51 = vadd.f32 %v2594_v43, %v2588_v46 }
 0x5fe   : > { %v2593_v45 = vpop.permute.xlu1 %2592  ;;  %v2572_v49 = vpop.permute.xlu0 %2571 }
 0x5ff   : > { %v2595_v47 = vmul.f32 %v2593_v45, %v2300_v42  ;;  %v2604_v57 = vadd.f32 %v2602_v54, %v2596_v51  ;;  %v2575_v61 = vmul.f32 %v2572_v49, %v2299_v39 }
 0x601   : > { %v2597_v56 = vadd.f32 %v2595_v47, %v2589_v52  ;;  %v2577_v13 = vadd.f32 %v2575_v61, %v2569_v6 }
 0x602   : > { %v2601_v53 = vpop.permute.xlu1 %2600  ;;  %v2580_v59 = vpop.permute.xlu0 %2579 }
 0x603   : > { %v2603_v55 = vmul.f32 %v2601_v53, %v2302_v50  ;;  %v2583_v7 = vmul.f32 %v2580_v59, %v2301_v48 }
 0x605   : > { %v2605_v58 = vadd.f32 %v2603_v55, %v2597_v56  ;;  %v2585_v16 = vadd.f32 %v2583_v7, %v2577_v13 }
 0x606   : > { %v2574_v60 = vpop.permute.xlu1 %2573 }
 0x607   : > { %v10511_v62 = vpack.c.bf16 %v2605_v58, %v2604_v57  ;;  %v2576_v4 = vmul.f32 %v2574_v60, %v2300_v42 }
 0x609   : > { %v2741_v10 = vsel %vm2736_vm3, %v10511_v62, 0  ;;  %v2578_v14 = vadd.f32 %v2576_v4, %v2570_v8 }
 0x60a   : > { %8088 = vmatpush3.bf16.xpose.msra.mxu0 %v2741_v10  ;;  %v2582_v11 = vpop.permute.xlu1 %2581 }
 0x60b   : > { %v2584_v15 = vmul.f32 %v2582_v11, %v2302_v50  ;;  %8093 = vmatprep.subr.bf16.mxu0 %v9834_v63 }
 0x60d   : > { %v2586_v18 = vadd.f32 %v2584_v15, %v2578_v14 }
 0x60f   : > { %v10516_v19 = vpack.c.bf16 %v2586_v18, %v2585_v16 }
 0x611   : > { %8090 = vmatmul.mubr.msk.bf16.vlgmr.msra.gmra.mxu0 %vm2736_vm3, %v10516_v19 }
 0x612   : > { %8094 = vmatpush3.bf16.msra.mxu0 %v10509_v37  ;;  %8095 = vmatprep.mubr.msk.bf16.mxu0 %vm9835_vm2, %v9834_v63 }
 0x613   : > { %8099 = vmatprep.subr.bf16.mxu0 %v9834_v63 }
 0x6d1   : > { %v2777_v12 = vpop.f32.mrf.mxu0 }
 0x6d2   : > { %v2778_v23 = vadd.f32 %v2777_v12, %v10527_v17 }
 0x6d3   : > { %v8091_v29 = vpop.f32.mrf.mxu0 }
 0x6d4   : > { %v2784_v31 = vsel %vm1895_vm1, %v2778_v23, -inf }
 0x6d5   : > { %2785 = vmax.xlane.f32.xlu0 %v2784_v31  ;;  %v2780_v32 = vpop.f32.mrf.mxu0 }
 0x6d6   : > { %v2781_v1 = vadd.f32 %v2780_v32, %v10531_v28 }
 0x6d7   : > { %v8092_v33 = vpop.f32.mrf.mxu0 }
 0x6d8   : > { %v2787_v34 = vsel %vm1895_vm1, %v2781_v1, -inf }
 0x6d9   : > { %2788 = vmax.xlane.f32.xlu1 %v2787_v34  ;;  %v8690_v34 = vld [vmem:[#allocation30 + $0x8] sm:$0xff]  }
 0x6ea   : > { %2853 = vrot.lane.b32.xlu1 %v10516_v19, %s11234_s6 }
 0x75e   : > { %v2786_v30 = vpop.xlane.xlu0 %2785 }
 0x75f   : > { %v2790_v35 = vsub.f32 %v2778_v23, %v2786_v30 }
 0x761   : > { %v2792_v36 = vmul.f32 1.442695, %v2790_v35  ;;  %v8691_v35 = vld [vmem:[#allocation30] sm:$0xff]  }
 0x762   : > { %v2789_v38 = vpop.xlane.xlu1 %2788 }
 0x763   : > { %9026 = vpow2.f32 %v2792_v36  ;;  %v2791_v39 = vsub.f32 %v2781_v1, %v2789_v38  ;;  %v8693_v36 = vld [vmem:[#allocation30 + $0x10] sm:$0xff]  }
 0x764   : > { %8114 = vmatpush3.bf16.msra.mxu1 %v8693_v36 }
 0x765   : > { %v2794_v40 = vmul.f32 1.442695, %v2791_v39  ;;  %8127 = vmatprep.subr.bf16.mxu1 %v9834_v63 }
 0x766   : > { %v2854_v54 = vpop.permute.xlu1 %2853 }
 0x767   : > { %9028 = vpow2.f32 %v2794_v40 }
 0x770   : > { %v9027_v41 = vpop.eup %9026 }
 0x771   : > { %v2796_v42 = vsel %vm1895_vm1, %v9027_v41, 0.0 }
 0x772   : > { %2797 = vadd.xlane.f32.xlu0 %v2796_v42 }
 0x774   : > { %v9029_v43 = vpop.eup %9028 }
 0x775   : > { %v2799_v44 = vsel %vm1895_vm1, %v9029_v43, 0.0 }
 0x776   : > { %2800 = vadd.xlane.f32.xlu0 %v2799_v44 }
 0x78c   : > { %2856 = vrot.lane.b32.xlu0 %v10511_v62, %s11234_s6 }
 0x7fb   : > { %v2798_v45 = vpop.xlane.xlu0 %2797 }
 0x7fc   : > { %9030 = vrcp.f32 %v2798_v45 }
 0x7ff   : > { %v2801_v46 = vpop.xlane.xlu0 %2800 }
 0x800   : > { %9032 = vrcp.f32 %v2801_v46 }
 0x803   : > { %v2857_v51 = vpop.permute.xlu0 %2856 }
 0x804   : > { %v2862_v53 = vsel %vm2736_vm3, %v2857_v51, 0 }
 0x809   : > { %v9031_v47 = vpop.eup %9030 }
 0x80a   : > { %v2804_v49 = vmul.f32 %v9031_v47, %v9027_v41 }
 0x80d   : > { %v9033_v48 = vpop.eup %9032 }
 0x80e   : > { %v2805_v50 = vmul.f32 %v9033_v48, %v9029_v43 }
 0x810   : > { %v2806_v52 = vpack.c.bf16 %v2805_v50, %v2804_v49 }
 0x812   : > { %8096 = vmatmul.mubr.msk.bf16.vlgmr.msra.gmra.mxu0 %vm1895_vm1, %v2806_v52 }
 0x813   : > { %8100 = vmatpush3.bf16.xpose.msra.mxu0 %v2862_v53  ;;  %8101 = vmatprep.mubr.msk.bf16.mxu0 %vm9835_vm2, %v9834_v63 }
 0x814   : > { %8105 = vmatprep.subr.bf16.mxu0 %v9834_v63 }
 0x81a   : > { %8102 = vmatmul.mubr.msk.bf16.vlgmr.msra.gmra.mxu0 %vm2736_vm3, %v2854_v54 }
 0x81b   : > { %8107 = vmatprep.mubr.msk.bf16.mxu0 %vm9835_vm2, %v9834_v63 }
 0x8d2   : > { %v2844_v56 = vpop.f32.mrf.mxu0 }
 0x8d4   : > { %v8097_v55 = vpop.f32.mrf.mxu0 }
 0x8d6   : > { %v2847_v57 = vpop.f32.mrf.mxu0 }
 0x8d7   : > { %v2851_v58 = vpack.c.bf16 %v2847_v57, %v2844_v56 }
 0x8d8   : > { %v8098_v59 = vpop.f32.mrf.mxu0 }
 0x8da   : > { %v2898_v60 = vpop.f32.mrf.mxu0 }
 0x8db   : > { %v2899_v61 = vadd.f32 %v2898_v60, %v10527_v17 }
 0x8dc   : > { %v8103_v4 = vpop.f32.mrf.mxu0 }
 0x8dd   : > { %v2905_v6 = vsel %vm1895_vm1, %v2899_v61, -inf }
 0x8de   : > { %2906 = vmax.xlane.f32.xlu1 %v2905_v6  ;;  %v2901_v7 = vpop.f32.mrf.mxu0 }
 0x8df   : > { %v2902_v8 = vadd.f32 %v2901_v7, %v10531_v28 }
 0x8e0   : > { %v8104_v10 = vpop.f32.mrf.mxu0 }
 0x8e1   : > { %v2908_v11 = vsel %vm1895_vm1, %v2902_v8, -inf }
 0x8e2   : > { %2909 = vmax.xlane.f32.xlu0 %v2908_v11 }
 0x967   : > { %v2907_v13 = vpop.xlane.xlu1 %2906 }
 0x968   : > { %v2911_v14 = vsub.f32 %v2899_v61, %v2907_v13 }
 0x96a   : > { %v2913_v15 = vmul.f32 1.442695, %v2911_v14 }
 0x96b   : > { %v2910_v16 = vpop.xlane.xlu0 %2909 }
 0x96c   : > { %9034 = vpow2.f32 %v2913_v15  ;;  %v2912_v18 = vsub.f32 %v2902_v8, %v2910_v16 }
 0x96e   : > { %v2915_v21 = vmul.f32 1.442695, %v2912_v18 }
 0x970   : > { %9036 = vpow2.f32 %v2915_v21 }
 0x979   : > { %v9035_v22 = vpop.eup %9034 }
 0x97a   : > { %v2917_v24 = vsel %vm1895_vm1, %v9035_v22, 0.0 }
 0x97b   : > { %2918 = vadd.xlane.f32.xlu0 %v2917_v24 }
 0x97d   : > { %v9037_v25 = vpop.eup %9036 }
 0x97e   : > { %v2920_v9 = vsel %vm1895_vm1, %v9037_v25, 0.0 }
 0x97f   : > { %2921 = vadd.xlane.f32.xlu1 %v2920_v9 }
 0x990   : > { %3091 = vrot.lane.b32.xlu1 %v10511_v62, %s11232_s15 }
 0x991   : > { %2929 = vrot.lane.b32.xlu0 %v10509_v37, %s11234_s6  ;;  %s11344_s6 = sld [smem:[#allocation72_spill]] }
 0x994   : > { %3089 = vrot.lane.b32.xlu1 %v10516_v19, %s11232_s15 }
 0xa04   : > { %v2919_v12 = vpop.xlane.xlu0 %2918 }
 0xa05   : > { %9038 = vrcp.f32 %v2919_v12 }
 0xa08   : > { %v2922_v23 = vpop.xlane.xlu1 %2921  ;;  %v2930_v29 = vpop.permute.xlu0 %2929 }
 0xa09   : > { %9040 = vrcp.f32 %v2922_v23  ;;  %8106 = vmatpush3.bf16.msra.mxu0 %v2930_v29  ;;  %v8694_v29 = vld [vmem:[#allocation30 + $0x28] sm:$0xff]  }
 0xa0a   : > { %8119 = vmatprep.subr.bf16.mxu0 %v9834_v63 }
 0xa0c   : > { %v3092_v40 = vpop.permute.xlu1 %3091 }
 0xa0d   : > { %v3097_v44 = vsel %vm2736_vm3, %v3092_v40, 0 }
 0xa10   : > { %v3090_v48 = vpop.permute.xlu1 %3089 }
 0xa12   : > { %v9039_v31 = vpop.eup %9038 }
 0xa13   : > { %v2925_v1 = vmul.f32 %v9039_v31, %v9035_v22  ;;  %v8695_v31 = vld [vmem:[#allocation30 + $0x20] sm:$0xff]  }
 0xa16   : > { %v9041_v32 = vpop.eup %9040 }
 0xa17   : > { %v2926_v33 = vmul.f32 %v9041_v32, %v9037_v25 }
 0xa19   : > { %v2927_v30 = vpack.c.bf16 %v2926_v33, %v2925_v1 }
 0xa1b   : > { %8108 = vmatmul.mubr.msk.bf16.vlgmr.msra.gmra.mxu0 %vm1895_vm1, %v2927_v30 }
 0xa1c   : > { %8120 = vmatpush3.bf16.msra.mxu0 %v8690_v34  ;;  %8123 = vmatprep.mubr.msk.bf16.mxu0 %vm9835_vm2, %v9834_v63 }
 0xa1d   : > { %8121 = vmatprep.subr.bf16.mxu0 %v9834_v63 }
 0xa20   : > { %8122 = vmatpush3.bf16.msra.mxu0 %v8691_v35 }
 0xa21   : > { %8133 = vmatprep.subr.bf16.mxu0 %v9834_v63 }
 0xa23   : > { %8124 = vmatmul.mubr.msk.bf16.vlgmr.msra.gmra.mxu0 %vm2736_vm3, %v2851_v58 }
 0xa24   : > { %8135 = vmatprep.mubr.msk.bf16.mxu0 %vm9835_vm2, %v9834_v63 }
 0xadb   : > { %v2969_v38 = vpop.f32.mrf.mxu0 }
 0xadd   : > { %v8109_v39 = vpop.f32.mrf.mxu0 }
 0xadf   : > { %v2972_v41 = vpop.f32.mrf.mxu0 }
 0xae0   : > { %v2976_v42 = vpack.c.bf16 %v2972_v41, %v2969_v38 }
 0xae1   : > { %v8110_v43 = vpop.f32.mrf.mxu0 }
 0xae2   : > { %8116 = vmatmul.mubr.msk.bf16.vlgmr.msra.gmra.mxu1 %vm2736_vm3, %v2976_v42 }
 0xae3   : > { %8128 = vmatpush3.bf16.xpose.msra.mxu1 %v3097_v44  ;;  %v10575_v45 = vpop.f32.mrf.mxu0  ;;  %8129 = vmatprep.mubr.msk.bf16.mxu1 %vm9835_vm2, %v9834_v63 }
 0xae4   : > { %8139 = vmatprep.subr.bf16.mxu1 %v9834_v63 }
 0xae5   : > { %v8125_v46 = vpop.f32.mrf.mxu0 }
 0xae7   : > { %v10580_v47 = vpop.f32.mrf.mxu0 }
 0xae9   : > { %v8126_v49 = vpop.f32.mrf.mxu0 }
 0xaea   : > { %8130 = vmatmul.mubr.msk.bf16.vlgmr.msra.gmra.mxu1 %vm2736_vm3, %v3090_v48 }
 0xaeb   : > { %8143 = vmatprep.mubr.msk.bf16.mxu1 %vm9835_vm2, %v9834_v63  ;;  %8140 = vmatpush3.bf16.msra.mxu1 %v8694_v29 }
 0xaec   : > { %8141 = vmatprep.subr.bf16.mxu1 %v9834_v63 }
 0xaef   : > { %8142 = vmatpush3.bf16.msra.mxu1 %v8695_v31 }
 0xaf0   : > { %8153 = vmatprep.subr.bf16.mxu1 %v9834_v63 }
 0xba2   : > { %v10585_v50 = vpop.f32.mrf.mxu1 }
 0xba4   : > { %v8117_v51 = vpop.f32.mrf.mxu1 }
 0xba6   : > { %v10587_v52 = vpop.f32.mrf.mxu1 }
 0xba8   : > { %v8118_v53 = vpop.f32.mrf.mxu1 }
 0xbaa   : > { %v3133_v54 = vpop.f32.mrf.mxu1 }
 0xbab   : > { %v3134_v56 = vadd.f32 %v3133_v54, %v10527_v17 }
 0xbac   : > { %v8131_v55 = vpop.f32.mrf.mxu1 }
 0xbad   : > { %v3140_v57 = vsel %vm1895_vm1, %v3134_v56, -inf }
 0xbae   : > { %3141 = vmax.xlane.f32.xlu1 %v3140_v57  ;;  %v3136_v58 = vpop.f32.mrf.mxu1 }
 0xbaf   : > { %v3137_v59 = vadd.f32 %v3136_v58, %v10531_v28  ;;  %v3083_v58 = vadd.f32 %v10575_v45, %v10585_v50  ;;  %v8697_v50 = vld [vmem:[#allocation30 + $0x30] sm:$0xff]  }
 0xbb0   : > { %v8132_v60 = vpop.f32.mrf.mxu1 }
 0xbb1   : > { %v3143_v61 = vsel %vm1895_vm1, %v3137_v59, -inf }
 0xbb2   : > { %3144 = vmax.xlane.f32.xlu0 %v3143_v61 }
 0xbbf   : > { %3163 = vrot.lane.b32.xlu1 %v10509_v37, %s11232_s15  ;;  %s11343_s15 = sld [smem:[#allocation71_spill]] }
 0xbc3   : > { %3269 = vrot.lane.b32.xlu1 %v10516_v19, %s11230_s17 }
 0xc37   : > { %v3142_v4 = vpop.xlane.xlu1 %3141 }
 0xc38   : > { %v3146_v6 = vsub.f32 %v3134_v56, %v3142_v4  ;;  %v3086_v4 = vadd.f32 %v10580_v47, %v10587_v52  ;;  %v8696_v47 = vld [vmem:[#allocation30 + $0x38] sm:$0xff]  }
 0xc3a   : > { %v3148_v7 = vmul.f32 1.442695, %v3146_v6 }
 0xc3b   : > { %v3164_v8 = vpop.permute.xlu1 %3163  ;;  %v3145_v10 = vpop.xlane.xlu0 %3144 }
 0xc3c   : > { %9042 = vpow2.f32 %v3148_v7  ;;  %v3147_v11 = vsub.f32 %v3137_v59, %v3145_v10  ;;  %8134 = vmatpush3.bf16.msra.mxu0 %v3164_v8 }
 0xc3d   : > { %8147 = vmatprep.subr.bf16.mxu0 %v9834_v63 }
 0xc3e   : > { %v3150_v13 = vmul.f32 1.442695, %v3147_v11 }
 0xc40   : > { %9044 = vpow2.f32 %v3150_v13 }
 0xc49   : > { %v9043_v14 = vpop.eup %9042 }
 0xc4a   : > { %v3152_v15 = vsel %vm1895_vm1, %v9043_v14, 0.0 }
 0xc4b   : > { %3153 = vadd.xlane.f32.xlu0 %v3152_v15 }
 0xc4d   : > { %v9045_v16 = vpop.eup %9044 }
 0xc4e   : > { %v3155_v18 = vsel %vm1895_vm1, %v9045_v16, 0.0 }
 0xc4f   : > { %3156 = vadd.xlane.f32.xlu0 %v3155_v18 }
 0xc65   : > { %3271 = vrot.lane.b32.xlu0 %v10511_v62, %s11230_s17  ;;  %v3270_v62 = vpop.permute.xlu1 %3269 }
 0xcd4   : > { %v3154_v19 = vpop.xlane.xlu0 %3153 }
 0xcd5   : > { %9046 = vrcp.f32 %v3154_v19 }
 0xcd8   : > { %v3157_v21 = vpop.xlane.xlu0 %3156 }
 0xcd9   : > { %9048 = vrcp.f32 %v3157_v21 }
 0xcdc   : > { %v3272_v27 = vpop.permute.xlu0 %3271 }
 0xcdd   : > { %v3277_v23 = vsel %vm2736_vm3, %v3272_v27, 0  ;;  %v7388_v27 = vld [vmem:[%s11341_s8] ss:$0 sm:$0xff] }
 0xce2   : > { %v9047_v22 = vpop.eup %9046 }
 0xce3   : > { %v3160_v25 = vmul.f32 %v9047_v22, %v9043_v14 }
 0xce6   : > { %v9049_v24 = vpop.eup %9048 }
 0xce7   : > { %v3161_v9 = vmul.f32 %v9049_v24, %v9045_v16 }
 0xce9   : > { %v3162_v12 = vpack.c.bf16 %v3161_v9, %v3160_v25 }
 0xceb   : > { %8136 = vmatmul.mubr.msk.bf16.vlgmr.msra.gmra.mxu0 %vm1895_vm1, %v3162_v12 }
 0xcec   : > { %8148 = vmatpush3.bf16.xpose.msra.mxu0 %v3277_v23  ;;  %8149 = vmatprep.mubr.msk.bf16.mxu0 %vm9835_vm2, %v9834_v63 }
 0xced   : > { %8159 = vmatprep.subr.bf16.mxu0 %v9834_v63 }
 0xcf3   : > { %8150 = vmatmul.mubr.msk.bf16.vlgmr.msra.gmra.mxu0 %vm2736_vm3, %v3270_v62 }
 0xcf4   : > { %8163 = vmatprep.mubr.msk.bf16.mxu0 %vm9835_vm2, %v9834_v63  ;;  %8160 = vmatpush3.bf16.msra.mxu0 %v8696_v47 }
 0xcf5   : > { %8161 = vmatprep.subr.bf16.mxu0 %v9834_v63 }
 0xcf8   : > { %8162 = vmatpush3.bf16.msra.mxu0 %v8697_v50 }
 0xdab   : > { %v3203_v32 = vpop.f32.mrf.mxu0 }
 0xdad   : > { %v8137_v1 = vpop.f32.mrf.mxu0 }
 0xdaf   : > { %v3206_v33 = vpop.f32.mrf.mxu0 }
 0xdb0   : > { %v3210_v34 = vpack.c.bf16 %v3206_v33, %v3203_v32 }
 0xdb1   : > { %v8138_v30 = vpop.f32.mrf.mxu0 }
 0xdb2   : > { %8144 = vmatmul.mubr.msk.bf16.vlgmr.msra.gmra.mxu1 %vm2736_vm3, %v3210_v34 }
 0xdb3   : > { %v3313_v35 = vpop.f32.mrf.mxu0  ;;  %8155 = vmatprep.mubr.msk.bf16.mxu1 %vm9835_vm2, %v9834_v63 }
 0xdb4   : > { %v3314_v36 = vadd.f32 %v3313_v35, %v10527_v17 }
 0xdb5   : > { %v8151_v38 = vpop.f32.mrf.mxu0 }
 0xdb6   : > { %v3320_v39 = vsel %vm1895_vm1, %v3314_v36, -inf }
 0xdb7   : > { %3321 = vmax.xlane.f32.xlu1 %v3320_v39  ;;  %v3316_v40 = vpop.f32.mrf.mxu0 }
 0xdb8   : > { %v3317_v41 = vadd.f32 %v3316_v40, %v10531_v28 }
 0xdb9   : > { %v8152_v42 = vpop.f32.mrf.mxu0 }
 0xdba   : > { %v3323_v43 = vsel %vm1895_vm1, %v3317_v41, -inf }
 0xdbb   : > { %3324 = vmax.xlane.f32.xlu0 %v3323_v43 }
 0xe40   : > { %v3322_v44 = vpop.xlane.xlu1 %3321 }
 0xe41   : > { %v3326_v46 = vsub.f32 %v3314_v36, %v3322_v44 }
 0xe43   : > { %v3328_v48 = vmul.f32 1.442695, %v3326_v46 }
 0xe44   : > { %v3325_v49 = vpop.xlane.xlu0 %3324 }
 0xe45   : > { %9050 = vpow2.f32 %v3328_v48  ;;  %v3327_v51 = vsub.f32 %v3317_v41, %v3325_v49 }
 0xe47   : > { %v3330_v53 = vmul.f32 1.442695, %v3327_v51 }
 0xe49   : > { %9052 = vpow2.f32 %v3330_v53 }
 0xe52   : > { %v9051_v54 = vpop.eup %9050 }
 0xe53   : > { %v3332_v56 = vsel %vm1895_vm1, %v9051_v54, 0.0 }
 0xe54   : > { %3333 = vadd.xlane.f32.xlu0 %v3332_v56 }
 0xe56   : > { %v9053_v55 = vpop.eup %9052 }
 0xe57   : > { %v3335_v57 = vsel %vm1895_vm1, %v9053_v55, 0.0 }
 0xe58   : > { %3336 = vadd.xlane.f32.xlu1 %v3335_v57 }
 0xe6a   : > { %3343 = vrot.lane.b32.xlu0 %v10509_v37, %s11230_s17  ;;  %s11342_s17 = sld [smem:[#allocation73_spill]] }
 0xe70   : > { %v8698_v33 = vld [vmem:[%s11342_s17 + $0xe0] ss:$16 sps:$4 sm:$0xff]   ;;  %v8700_v34 = vld [vmem:[%s11342_s17 + $0xe4] ss:$16 sps:$4 sm:$0xff]   ;;  %v8701_v30 = vld [vmem:[%s11342_s17 + $0xe8] ss:$16 sps:$4 sm:$0xff]  }
 0xe71   : > { %v8703_v35 = vld [vmem:[%s11342_s17 + $0xec] ss:$16 sps:$4 sm:$0xff]   ;;  %v8706_v43 = vld [vmem:[%s11342_s17 + $0xc4] ss:$16 sps:$4 sm:$0xff]   ;;  %v8704_v46 = vld [vmem:[%s11342_s17 + $0xc0] ss:$16 sps:$4 sm:$0xff]  }
 0xe72   : > { %v3260_v59 = vpop.f32.mrf.mxu1  ;;  %3758 = vmatprep.subr.bf16.mxu0 %v8703_v35  ;;  %v8709_v44 = vld [vmem:[%s11342_s17 + $0xcc] ss:$16 sps:$4 sm:$0xff]   ;;  %v8707_v48 = vld [vmem:[%s11342_s17 + $0xc8] ss:$16 sps:$4 sm:$0xff]   ;;  %v8712_v49 = vld [vmem:[%s11342_s17 + $0xa4] ss:$16 sps:$4 sm:$0xff]  }
 0xe73   : > { %v3267_v60 = vadd.f32 %v3260_v59, %v3083_v58  ;;  %v8715_v51 = vld [vmem:[%s11342_s17 + $0xac] ss:$16 sps:$4 sm:$0xff]   ;;  %v8710_v53 = vld [vmem:[%s11342_s17 + $0xa0] ss:$16 sps:$4 sm:$0xff]   ;;  %v8718_v56 = vld [vmem:[%s11342_s17 + $0x84] ss:$16 sps:$4 sm:$0xff]  }
 0xe74   : > { %v8145_v61 = vpop.f32.mrf.mxu1  ;;  %v8716_v57 = vld [vmem:[%s11342_s17 + $0x80] ss:$16 sps:$4 sm:$0xff]   ;;  %v8719_v58 = vld [vmem:[%s11342_s17 + $0x88] ss:$16 sps:$4 sm:$0xff]   ;;  %v8724_v59 = vld [vmem:[%s11342_s17 + $0x64] ss:$16 sps:$4 sm:$0xff]  }
 0xe75   : > { %v8722_v61 = vld [vmem:[%s11342_s17 + $0x60] ss:$16 sps:$4 sm:$0xff]   ;;  %v8743_v47 = vld [vmem:[%s11342_s17 + $0x8] ss:$16 sps:$4 sm:$0xff]  }
 0xe76   : > { %v3263_v6 = vpop.f32.mrf.mxu1  ;;  %v8747_v35 = vld [vmem:[%s11345_s3 + $0xf8] sm:$0xff]  }
 0xe77   : > { %v3268_v7 = vadd.f32 %v3263_v6, %v3086_v4  ;;  %v8725_v4 = vld [vmem:[%s11342_s17 + $0x68] ss:$16 sps:$4 sm:$0xff]   ;;  %v8730_v6 = vld [vmem:[%s11342_s17 + $0x44] ss:$16 sps:$4 sm:$0xff]  }
 0xe78   : > { %v8146_v8 = vpop.f32.mrf.mxu1 }
 0xe79   : > { %v8728_v8 = vld [vmem:[%s11342_s17 + $0x40] ss:$16 sps:$4 sm:$0xff]  }
 0xedd   : > { %v3334_v10 = vpop.xlane.xlu0 %3333 }
 0xede   : > { %9054 = vrcp.f32 %v3334_v10  ;;  %v8731_v10 = vld [vmem:[%s11342_s17 + $0x48] ss:$16 sps:$4 sm:$0xff]  }
 0xee1   : > { %v3337_v11 = vpop.xlane.xlu1 %3336  ;;  %v3344_v13 = vpop.permute.xlu0 %3343 }
 0xee2   : > { %9056 = vrcp.f32 %v3337_v11  ;;  %8154 = vmatpush3.bf16.msra.mxu1 %v3344_v13  ;;  %v8736_v11 = vld [vmem:[%s11342_s17 + $0x24] ss:$16 sps:$4 sm:$0xff]   ;;  %v8739_v13 = vld [vmem:[%s11342_s17 + $0x2c] ss:$16 sps:$4 sm:$0xff]  }
 0xee3   : > { %3715 = vmatprep.subr.bf16.mxu1 %v8700_v34 }
 0xeeb   : > { %v9055_v14 = vpop.eup %9054 }
 0xeec   : > { %v3340_v15 = vmul.f32 %v9055_v14, %v9051_v54  ;;  %v8713_v54 = vld [vmem:[%s11342_s17 + $0xa8] ss:$16 sps:$4 sm:$0xff]   ;;  %v8734_v14 = vld [vmem:[%s11342_s17 + $0x20] ss:$16 sps:$4 sm:$0xff]  }
 0xeef   : > { %v9057_v37 = vpop.eup %9056 }
 0xef0   : > { %v3341_v16 = vmul.f32 %v9057_v37, %v9053_v55  ;;  %v8721_v55 = vld [vmem:[%s11342_s17 + $0x8c] ss:$16 sps:$4 sm:$0xff]   ;;  %v8737_v37 = vld [vmem:[%s11342_s17 + $0x28] ss:$16 sps:$4 sm:$0xff]  }
 0xef2   : > { %v3342_v45 = vpack.c.bf16 %v3341_v16, %v3340_v15  ;;  %v8742_v15 = vld [vmem:[%s11342_s17 + $0x4] ss:$16 sps:$4 sm:$0xff]   ;;  %v8745_v16 = vld [vmem:[%s11342_s17 + $0xc] ss:$16 sps:$4 sm:$0xff]  }
 0xef4   : > { %8156 = vmatmul.mubr.msk.bf16.vlgmr.msra.gmra.mxu1 %vm1895_vm1, %v3342_v45  ;;  %v8740_v45 = vld [vmem:[%s11342_s17] ss:$16 sps:$4 sm:$0xff]  }
 0xef5   : > { %3747 = vmatprep.mubr.bf16.mxu1 %v9833_v0  ;;  %3716 = vmatpush1.bf16.msra.mxu1 %v8698_v33 }
 0xef6   : > { %3717 = vmatprep.subr.bf16.mxu1 %v8706_v43  ;;  %v8756_v43 = vld [vmem:[%s11345_s3 + $0x28] sm:$0xff]  }
 0xef9   : > { %3718 = vmatpush1.bf16.msra.mxu1 %v8704_v46  ;;  %v8758_v46 = vld [vmem:[%s11345_s3 + $0x60] sm:$0xff]  }
 0xefa   : > { %3719 = vmatprep.subr.bf16.mxu1 %v8712_v49  ;;  %v8760_v49 = vld [vmem:[%s11345_s3 + $0x20] sm:$0xff]  }
 0xefd   : > { %3720 = vmatpush1.bf16.msra.mxu1 %v8710_v53  ;;  %v8762_v53 = vld [vmem:[%s11345_s3 + $0x58] sm:$0xff]  }
 0xefe   : > { %3721 = vmatprep.subr.bf16.mxu1 %v8718_v56  ;;  %v8764_v56 = vld [vmem:[%s11345_s3 + $0x18] sm:$0xff]  }
 0xf01   : > { %3722 = vmatpush1.bf16.msra.mxu1 %v8716_v57  ;;  %v8766_v57 = vld [vmem:[%s11345_s3 + $0x50] sm:$0xff]  }
 0xf02   : > { %3723 = vmatprep.subr.bf16.mxu1 %v8724_v59  ;;  %v8768_v59 = vld [vmem:[%s11345_s3 + $0x10] sm:$0xff]  }
 0xf05   : > { %3724 = vmatpush1.bf16.msra.mxu1 %v8722_v61  ;;  %v8770_v61 = vld [vmem:[%s11345_s3 + $0x48] sm:$0xff]  }
 0xf06   : > { %3725 = vmatprep.subr.bf16.mxu1 %v8730_v6  ;;  %v8772_v6 = vld [vmem:[%s11345_s3 + $0x8] sm:$0xff]  }
 0xf09   : > { %3726 = vmatpush1.bf16.msra.mxu1 %v8728_v8  ;;  %v8774_v8 = vld [vmem:[%s11345_s3 + $0x40] sm:$0xff]  }
 0xf0a   : > { %3727 = vmatprep.subr.bf16.mxu1 %v8736_v11  ;;  %v8776_v11 = vld [vmem:[%s11345_s3] sm:$0xff]  }
 0xf0d   : > { %3728 = vmatpush1.bf16.msra.mxu1 %v8734_v14  ;;  %v10722_v14 = vsub.s32 2, %v10396_v2 }
 0xf0e   : > { %3729 = vmatprep.subr.bf16.mxu1 %v8742_v15  ;;  %v3549_v15 = vsub.s32 3, %v10396_v2 }
 0xf11   : > { %3730 = vmatpush1.bf16.msra.mxu1 %v8740_v45 }
 0xfb4   : > { %v3383_v52 = vpop.f32.mrf.mxu1 }
 0xfb6   : > { %v8157_v18 = vpop.f32.mrf.mxu1 }
 0xfb8   : > { %v3386_v19 = vpop.f32.mrf.mxu1 }
 0xfb9   : > { %v3390_v21 = vpack.c.bf16 %v3386_v19, %v3383_v52 }
 0xfba   : > { %v8158_v22 = vpop.f32.mrf.mxu1 }
 0xfbb   : > { %8164 = vmatmul.mubr.msk.bf16.vlgmr.msra.gmra.mxu0 %vm2736_vm3, %v3390_v21 }
 0xfbc   : > { %3790 = vmatprep.mubr.bf16.mxu0 %v9833_v0  ;;  %3759 = vmatpush1.bf16.msra.mxu0 %v8701_v30  ;;  %v8746_v30 = vld [vmem:[%s11345_s3 + $0x78] sm:$0xff]  }
 0xfbd   : > { %3760 = vmatprep.subr.bf16.mxu0 %v8709_v44  ;;  %7863 = vmatprep.subr.bf16.mxu1 %v8746_v30  ;;  %v8757_v44 = vld [vmem:[%s11345_s3 + $0xa8] sm:$0xff]  }
 0xfc0   : > { %3761 = vmatpush1.bf16.msra.mxu0 %v8707_v48  ;;  %v8759_v48 = vld [vmem:[%s11345_s3 + $0xe0] sm:$0xff]  }
 0xfc1   : > { %3762 = vmatprep.subr.bf16.mxu0 %v8715_v51  ;;  %v8761_v51 = vld [vmem:[%s11345_s3 + $0xa0] sm:$0xff]  }
 0xfc4   : > { %3763 = vmatpush1.bf16.msra.mxu0 %v8713_v54  ;;  %v8763_v54 = vld [vmem:[%s11345_s3 + $0xd8] sm:$0xff]  }
 0xfc5   : > { %3764 = vmatprep.subr.bf16.mxu0 %v8721_v55  ;;  %v8765_v55 = vld [vmem:[%s11345_s3 + $0x98] sm:$0xff]  }
 0xfc8   : > { %3765 = vmatpush1.bf16.msra.mxu0 %v8719_v58  ;;  %v8767_v58 = vld [vmem:[%s11345_s3 + $0xd0] sm:$0xff]  }
0x107b   : > { %v3440_v24 = vpop.f32.mrf.mxu0 }
0x107c   : > { %v3447_v25 = vadd.f32 %v3440_v24, %v3267_v60  ;;  %v8727_v60 = vld [vmem:[%s11342_s17 + $0x6c] ss:$16 sps:$4 sm:$0xff]  }
0x107d   : > { %v8165_v9 = vpop.f32.mrf.mxu0  ;;  %3766 = vmatprep.subr.bf16.mxu0 %v8727_v60  ;;  %v8769_v60 = vld [vmem:[%s11345_s3 + $0x90] sm:$0xff]  }
0x107e   : > { %v3449_v12 = vadd.f32 %v3447_v25, %v10460_v20  ;;  %3767 = vmatpush1.bf16.msra.mxu0 %v8725_v4  ;;  %v7389_v9 = vld [vmem:[%s11343_s15] ss:$0 sm:$0xff]  ;;  %v8771_v4 = vld [vmem:[%s11345_s3 + $0xc8] sm:$0xff]  }
0x107f   : > { %v3443_v23 = vpop.f32.mrf.mxu0 }
0x1080   : > { %v3448_v62 = vadd.f32 %v3443_v23, %v3268_v7  ;;  %v10634_v29 = vadd.f32 %v7388_v27, %v3449_v12  ;;  %v8733_v7 = vld [vmem:[%s11342_s17 + $0x4c] ss:$16 sps:$4 sm:$0xff]  }
0x1081   : > { %v8166_v31 = vpop.f32.mrf.mxu0  ;;  %3768 = vmatprep.subr.bf16.mxu0 %v8733_v7  ;;  %v8773_v7 = vld [vmem:[%s11345_s3 + $0x88] sm:$0xff]  }
0x1082   : > { %v3450_v32 = vadd.f32 %v3448_v62, %v10463_v26  ;;  %3462 = vadd.xlane.f32.xlu1 %v10634_v29  ;;  %3769 = vmatpush1.bf16.msra.mxu0 %v8731_v10  ;;  %v7390_v62 = vld [vmem:[%s11344_s6] ss:$0 sm:$0xff] }
0x1083   : > { %3770 = vmatprep.subr.bf16.mxu0 %v8739_v13  ;;  %v8775_v10 = vld [vmem:[%s11345_s3 + $0xc0] sm:$0xff]  }
0x1084   : > { %v10638_v1 = vadd.f32 %v7388_v27, %v3450_v32  ;;  %v8777_v13 = vld [vmem:[%s11345_s3 + $0x80] sm:$0xff]  }
0x1086   : > { %3464 = vadd.xlane.f32.xlu1 %v10638_v1  ;;  %3771 = vmatpush1.bf16.msra.mxu0 %v8737_v37  ;;  %v3533_v37 = vld [vmem:[%s11346_s22] sm:$0xf] }
0x1087   : > { %3772 = vmatprep.subr.bf16.mxu0 %v8745_v16  ;;  %v3538_v16 = vrot.slane %v3533_v37, %v10399_v3  ;;  %v3546_v45 = vrot.slane %v3533_v37, %v10722_v14 }
0x108a   : > { %3773 = vmatpush1.bf16.msra.mxu0 %v8743_v47  ;;  %v3542_v47 = vrot.slane %v3533_v37, %v10402_v5 }
0x108b   : > { %7885 = vmatprep.subr.bf16.mxu0 %v8747_v35 }
0x110b   : > { %v3463_v20 = vpop.xlane.xlu1 %3462 }
0x110c   : > { %v3466_v26 = vmul.f32 0.0078125, %v3463_v20  ;;  %v8748_v20 = vld [vmem:[%s11345_s3 + $0x38] sm:$0xff]  }
0x110e   : > { %v10646_v36 = vsub.f32 %v10634_v29, %v3466_v26  ;;  %v8749_v26 = vld [vmem:[%s11345_s3 + $0xb8] sm:$0xff]  }
0x110f   : > { %v3465_v38 = vpop.xlane.xlu1 %3464 }
0x1110   : > { %v3467_v39 = vmul.f32 0.0078125, %v3465_v38  ;;  %v3470_v40 = vmul.f32 %v10646_v36, %v10646_v36  ;;  %v8751_v38 = vld [vmem:[%s11345_s3 + $0xf0] sm:$0xff]  }
0x1112   : > { %v10651_v41 = vsub.f32 %v10638_v1, %v3467_v39  ;;  %3472 = vadd.xlane.f32.xlu1 %v3470_v40  ;;  %v8752_v39 = vld [vmem:[%s11345_s3 + $0x30] sm:$0xff]  }
0x1113   : > { %v8753_v40 = vld [vmem:[%s11345_s3 + $0xb0] sm:$0xff]  }
0x1114   : > { %v3471_v42 = vmul.f32 %v10651_v41, %v10651_v41 }
0x1116   : > { %3474 = vadd.xlane.f32.xlu1 %v3471_v42  ;;  %v8755_v42 = vld [vmem:[%s11345_s3 + $0xe8] sm:$0xff]  }
0x119b   : > { %v3473_v50 = vpop.xlane.xlu1 %3472 }
0x119c   : > { %v3476_v52 = vmul.f32 0.0078125, %v3473_v50  ;;  %v3550_v50 = vrot.slane %v3533_v37, %v3549_v15 }
0x119e   : > { %v3478_v18 = vadd.f32 1e-05, %v3476_v52 }
0x119f   : > { %v3475_v19 = vpop.xlane.xlu1 %3474 }
0x11a0   : > { %9058 = vrsqrt.f32 %v3478_v18  ;;  %v3477_v21 = vmul.f32 0.0078125, %v3475_v19 }
0x11a2   : > { %v3479_v22 = vadd.f32 1e-05, %v3477_v21 }
0x11a4   : > { %9060 = vrsqrt.f32 %v3479_v22 }
0x11ad   : > { %v9059_v24 = vpop.eup %9058 }
0x11ae   : > { %v3482_v25 = vmul.f32 %v9059_v24, %v10646_v36  ;;  %v8750_v36 = vld [vmem:[%s11345_s3 + $0x70] sm:$0xff]  }
0x11b0   : > { %v3490_v23 = vmul.f32 %v7389_v9, %v3482_v25 }
0x11b1   : > { %v9061_v27 = vpop.eup %9060 }
0x11b2   : > { %v3483_v12 = vmul.f32 %v9061_v27, %v10651_v41  ;;  %v3498_v32 = vadd.f32 %v7390_v62, %v3490_v23  ;;  %v8754_v41 = vld [vmem:[%s11345_s3 + $0x68] sm:$0xff]  }
0x11b4   : > { %v3491_v31 = vmul.f32 %v7389_v9, %v3483_v12 }
0x11b6   : > { %v3499_v33 = vadd.f32 %v7390_v62, %v3491_v31 }
0x11b8   : > { %v3500_v34 = vpack.c.bf16 %v3499_v33, %v3498_v32 }
0x11ba   : > { %3748 = vmatmul.mubr.bf16.vlgmr.msra.gmra.mxu1 %v3500_v34  ;;  %3791 = vmatmul.mubr.bf16.vlgmr.msra.gmra.mxu0 %v3500_v34 }
0x11bb   : > { %7864 = vmatpush3.bf16.msra.mxu1 %v8748_v20  ;;  %7886 = vmatpush3.bf16.msra.mxu0 %v8749_v26 }
0x11bc   : > { %7865 = vmatprep.subr.bf16.mxu1 %v8750_v36  ;;  %7887 = vmatprep.subr.bf16.mxu0 %v8751_v38 }
0x11bf   : > { %7866 = vmatpush3.bf16.msra.mxu1 %v8752_v39  ;;  %7888 = vmatpush3.bf16.msra.mxu0 %v8753_v40 }
0x11c0   : > { %7867 = vmatprep.subr.bf16.mxu1 %v8754_v41  ;;  %7889 = vmatprep.subr.bf16.mxu0 %v8755_v42 }
0x11c3   : > { %7868 = vmatpush3.bf16.msra.mxu1 %v8756_v43  ;;  %7890 = vmatpush3.bf16.msra.mxu0 %v8757_v44 }
0x11c4   : > { %7869 = vmatprep.subr.bf16.mxu1 %v8758_v46  ;;  %7891 = vmatprep.subr.bf16.mxu0 %v8759_v48 }
0x11c7   : > { %7870 = vmatpush3.bf16.msra.mxu1 %v8760_v49  ;;  %7892 = vmatpush3.bf16.msra.mxu0 %v8761_v51 }
0x11c8   : > { %7871 = vmatprep.subr.bf16.mxu1 %v8762_v53  ;;  %7893 = vmatprep.subr.bf16.mxu0 %v8763_v54 }
0x11cb   : > { %7872 = vmatpush3.bf16.msra.mxu1 %v8764_v56  ;;  %7894 = vmatpush3.bf16.msra.mxu0 %v8765_v55 }
0x11cc   : > { %7873 = vmatprep.subr.bf16.mxu1 %v8766_v57  ;;  %7895 = vmatprep.subr.bf16.mxu0 %v8767_v58 }
0x11cf   : > { %7874 = vmatpush3.bf16.msra.mxu1 %v8768_v59  ;;  %7896 = vmatpush3.bf16.msra.mxu0 %v8769_v60 }
0x11d0   : > { %7875 = vmatprep.subr.bf16.mxu1 %v8770_v61  ;;  %7897 = vmatprep.subr.bf16.mxu0 %v8771_v4 }
0x11d3   : > { %7876 = vmatpush3.bf16.msra.mxu1 %v8772_v6  ;;  %7898 = vmatpush3.bf16.msra.mxu0 %v8773_v7 }
0x11d4   : > { %7877 = vmatprep.subr.bf16.mxu1 %v8774_v8  ;;  %7899 = vmatprep.subr.bf16.mxu0 %v8775_v10 }
0x11d7   : > { %7878 = vmatpush3.bf16.msra.mxu1 %v8776_v11  ;;  %7900 = vmatpush3.bf16.msra.mxu0 %v8777_v13 }
0x11d8   : > { %8167 = vmatprep.subr.bf16.mxu1 %v9834_v63  ;;  %8187 = vmatprep.subr.bf16.mxu0 %v9834_v63 }
0x127a   : > { %v3749_v52 = vpop.f32.mrf.mxu1  ;;  %v3792_v18 = vpop.f32.mrf.mxu0 }
0x127b   : > { %v10731_v19 = vadd.f32 %v3749_v52, %v3538_v16  ;;  %v10733_v21 = vadd.f32 %v3792_v18, %v3546_v45 }
0x127c   : > { %v3751_v22 = vpop.f32.mrf.mxu1  ;;  %v3794_v24 = vpop.f32.mrf.mxu0 }
0x127d   : > { %v3801_v25 = vmul.f32 %v10731_v19, %v10731_v19  ;;  %v3803_v9 = vmul.f32 %v10733_v21, %v10733_v21  ;;  %v10739_v27 = vadd.f32 %v3751_v22, %v3542_v47  ;;  %v10741_v12 = vadd.f32 %v3794_v24, %v3550_v50 }
0x127e   : > { %v3753_v23 = vpop.f32.mrf.mxu1  ;;  %v3796_v62 = vpop.f32.mrf.mxu0 }
0x127f   : > { %v3809_v31 = vmul.f32 %v3801_v25, %v10731_v19  ;;  %v3811_v32 = vmul.f32 %v3803_v9, %v10733_v21  ;;  %v3802_v33 = vmul.f32 %v10739_v27, %v10739_v27  ;;  %v3804_v34 = vmul.f32 %v10741_v12, %v10741_v12 }
0x1280   : > { %v10749_v30 = vadd.f32 %v3753_v23, %v3538_v16  ;;  %v10751_v35 = vadd.f32 %v3796_v62, %v3546_v45  ;;  %v3755_v20 = vpop.f32.mrf.mxu1  ;;  %v3798_v26 = vpop.f32.mrf.mxu0 }
0x1281   : > { %v3817_v36 = vmul.f32 0.044715, %v3809_v31  ;;  %v3819_v38 = vmul.f32 0.044715, %v3811_v32  ;;  %v3810_v39 = vmul.f32 %v3802_v33, %v10739_v27  ;;  %v3812_v40 = vmul.f32 %v3804_v34, %v10741_v12 }
0x1282   : > { %v3805_v41 = vmul.f32 %v10749_v30, %v10749_v30  ;;  %v3807_v42 = vmul.f32 %v10751_v35, %v10751_v35  ;;  %v10759_v43 = vadd.f32 %v3755_v20, %v3542_v47  ;;  %v10761_v44 = vadd.f32 %v3798_v26, %v3550_v50 }
0x1283   : > { %v3825_v46 = vadd.f32 %v3817_v36, %v10731_v19  ;;  %v3827_v48 = vadd.f32 %v3819_v38, %v10733_v21  ;;  %v3818_v49 = vmul.f32 0.044715, %v3810_v39  ;;  %v3820_v51 = vmul.f32 0.044715, %v3812_v40 }
0x1284   : > { %v3813_v53 = vmul.f32 %v3805_v41, %v10749_v30  ;;  %v3815_v54 = vmul.f32 %v3807_v42, %v10751_v35  ;;  %v3806_v56 = vmul.f32 %v10759_v43, %v10759_v43  ;;  %v3808_v55 = vmul.f32 %v10761_v44, %v10761_v44 }
0x1285   : > { %v3833_v57 = vmul.f32 0.7978846, %v3825_v46  ;;  %v3835_v58 = vmul.f32 0.7978846, %v3827_v48  ;;  %v3826_v59 = vadd.f32 %v3818_v49, %v10739_v27  ;;  %v3828_v60 = vadd.f32 %v3820_v51, %v10741_v12 }
0x1286   : > { %v3821_v61 = vmul.f32 0.044715, %v3813_v53  ;;  %v3823_v4 = vmul.f32 0.044715, %v3815_v54  ;;  %v3814_v6 = vmul.f32 %v3806_v56, %v10759_v43  ;;  %v3816_v7 = vmul.f32 %v3808_v55, %v10761_v44 }
0x1287   : > { %9062 = vtanh.f32 %v3833_v57  ;;  %v3834_v8 = vmul.f32 0.7978846, %v3826_v59  ;;  %v3836_v10 = vmul.f32 0.7978846, %v3828_v60 }
0x1288   : > { %9064 = vtanh.f32 %v3835_v58  ;;  %v3829_v11 = vadd.f32 %v3821_v61, %v10749_v30  ;;  %v3831_v13 = vadd.f32 %v3823_v4, %v10751_v35  ;;  %v3822_v37 = vmul.f32 0.044715, %v3814_v6 }
0x1289   : > { %9066 = vtanh.f32 %v3834_v8  ;;  %v3824_v16 = vmul.f32 0.044715, %v3816_v7 }
0x128a   : > { %9068 = vtanh.f32 %v3836_v10  ;;  %v3837_v45 = vmul.f32 0.7978846, %v3829_v11  ;;  %v3839_v47 = vmul.f32 0.7978846, %v3831_v13  ;;  %v3830_v50 = vadd.f32 %v3822_v37, %v10759_v43 }
0x128b   : > { %v3832_v52 = vadd.f32 %v3824_v16, %v10761_v44 }
0x128c   : > { %9070 = vtanh.f32 %v3837_v45  ;;  %v3838_v18 = vmul.f32 0.7978846, %v3830_v50 }
0x128d   : > { %9072 = vtanh.f32 %v3839_v47  ;;  %v3840_v22 = vmul.f32 0.7978846, %v3832_v52  ;;  %v7455_v47 = vld [vmem:[%s11347_s1] ss:$0 sm:$0xff] }
0x128e   : > { %9074 = vtanh.f32 %v3838_v18 }
0x128f   : > { %9076 = vtanh.f32 %v3840_v22 }
0x1294   : > { %v9063_v24 = vpop.eup %9062 }
0x1295   : > { %v9065_v25 = vpop.eup %9064  ;;  %v3849_v32 = vadd.f32 1.0, %v9063_v24 }
0x1296   : > { %v9067_v9 = vpop.eup %9066  ;;  %v3851_v20 = vadd.f32 1.0, %v9065_v25 }
0x1297   : > { %v9069_v23 = vpop.eup %9068  ;;  %v3850_v62 = vadd.f32 1.0, %v9067_v9  ;;  %v3857_v46 = vmul.f32 0.5, %v3849_v32  ;;  %v8778_v9 = vld [vmem:[#allocation22 + $0x78] sm:$0xff]  }
0x1298   : > { %v3852_v33 = vadd.f32 1.0, %v9069_v23  ;;  %v3859_v53 = vmul.f32 0.5, %v3851_v20  ;;  %v8779_v23 = vld [vmem:[#allocation25 + $0x78] sm:$0xff]  }
0x1299   : > { %v9071_v31 = vpop.eup %9070  ;;  %v3858_v42 = vmul.f32 0.5, %v3850_v62  ;;  %v3865_v60 = vmul.f32 %v3857_v46, %v10731_v19  ;;  %v8787_v46 = vld [vmem:[#allocation25 + $0x58] sm:$0xff]  }
0x129a   : > { %v9073_v34 = vpop.eup %9072  ;;  %v3853_v26 = vadd.f32 1.0, %v9071_v31  ;;  %v3860_v51 = vmul.f32 0.5, %v3852_v33  ;;  %v3867_v6 = vmul.f32 %v3859_v53, %v10733_v21  ;;  %v8791_v53 = vld [vmem:[#allocation25 + $0x48] sm:$0xff]  }
0x129b   : > { %v9075_v36 = vpop.eup %9074  ;;  %v3855_v38 = vadd.f32 1.0, %v9073_v34  ;;  %v3866_v58 = vmul.f32 %v3858_v42, %v10739_v27  ;;  %v8786_v42 = vld [vmem:[#allocation22 + $0x58] sm:$0xff]  }
0x129c   : > { %v9077_v39 = vpop.eup %9076  ;;  %v3861_v40 = vmul.f32 0.5, %v3853_v26  ;;  %v3854_v41 = vadd.f32 1.0, %v9075_v36  ;;  %v3868_v61 = vmul.f32 %v3860_v51, %v10741_v12  ;;  %v8780_v26 = vld [vmem:[#allocation22 + $0x70] sm:$0xff]   ;;  %v8790_v51 = vld [vmem:[#allocation22 + $0x48] sm:$0xff]  }
0x129d   : > { %v3863_v48 = vmul.f32 0.5, %v3855_v38  ;;  %v3856_v49 = vadd.f32 1.0, %v9077_v39  ;;  %v8781_v36 = vld [vmem:[#allocation25 + $0x70] sm:$0xff]   ;;  %v8782_v38 = vld [vmem:[#allocation22 + $0x68] sm:$0xff]  }
0x129e   : > { %v3862_v54 = vmul.f32 0.5, %v3854_v41  ;;  %v3869_v56 = vmul.f32 %v3861_v40, %v10749_v30  ;;  %v8783_v39 = vld [vmem:[#allocation25 + $0x68] sm:$0xff]   ;;  %v8784_v40 = vld [vmem:[#allocation22 + $0x60] sm:$0xff]  }
0x129f   : > { %v3864_v55 = vmul.f32 0.5, %v3856_v49  ;;  %v3871_v57 = vmul.f32 %v3863_v48, %v10751_v35  ;;  %v8785_v41 = vld [vmem:[#allocation25 + $0x60] sm:$0xff]   ;;  %v8788_v48 = vld [vmem:[#allocation22 + $0x50] sm:$0xff]  }
0x12a0   : > { %v3870_v59 = vmul.f32 %v3862_v54, %v10759_v43  ;;  %v3873_v10 = vpack.c.bf16 %v3869_v56, %v3865_v60  ;;  %v8789_v49 = vld [vmem:[#allocation25 + $0x50] sm:$0xff]   ;;  %v8792_v54 = vld [vmem:[#allocation22 + $0x40] sm:$0xff]  }
0x12a1   : > { %v3872_v4 = vmul.f32 %v3864_v55, %v10761_v44  ;;  %v3875_v30 = vpack.c.bf16 %v3871_v57, %v3867_v6  ;;  %v8793_v56 = vld [vmem:[#allocation25 + $0x40] sm:$0xff]  }
0x12a2   : > { %v3874_v7 = vpack.c.bf16 %v3870_v59, %v3866_v58 }
0x12a3   : > { %v3876_v8 = vpack.c.bf16 %v3872_v4, %v3868_v61 }
0x12a4   : > { %4165 = vmatprep.mubr.bf16.mxu1 %v3874_v7  ;;  %v7458_v7 = vld [vmem:[%s11337_s12 + $0x1] ss:$0 sm:$0xff]  ;;  %s11349_s12 = smov 16  }
0x12a5   : > { %4206 = vmatprep.mubr.bf16.mxu0 %v3876_v8  ;;  %4166 = vmatmul.mubr.bf16.vlgmr.msra.gmra.mxu1 %v3873_v10 }
0x12a6   : > { %4207 = vmatmul.mubr.bf16.vlgmr.msra.gmra.mxu0 %v3875_v30  ;;  %8183 = vmatprep.mubr.msk.bf16.mxu1 %vm9835_vm2, %v9834_v63 }
0x12a7   : > { %8203 = vmatprep.mubr.msk.bf16.mxu0 %vm9835_vm2, %v9834_v63  ;;  %8168 = vmatpush3.bf16.msra.mxu1 %v8778_v9 }
0x12a8   : > { %8188 = vmatpush3.bf16.msra.mxu0 %v8779_v23  ;;  %8169 = vmatprep.subr.bf16.mxu1 %v9834_v63 }
0x12a9   : > { %8189 = vmatprep.subr.bf16.mxu0 %v9834_v63 }
0x12ab   : > { %8170 = vmatpush3.bf16.msra.mxu1 %v8780_v26 }
0x12ac   : > { %8190 = vmatpush3.bf16.msra.mxu0 %v8781_v36  ;;  %8171 = vmatprep.subr.bf16.mxu1 %v9834_v63  ;;  %v7479_v36 = vld [vmem:[%s11339_s9 + $0x1] ss:$0 sm:$0xff]  ;;  %s9842_s9 = smov [#allocation34]  }
0x12ad   : > { %8191 = vmatprep.subr.bf16.mxu0 %v9834_v63  ;;  %s9664_s13 = sshll.u32 %s9842_s9, 4  ;;  %s9665_s13 = int_to_ptr.vmem [resolvable:$false] %s9664_s13 }
0x12af   : > { %8172 = vmatpush3.bf16.msra.mxu1 %v8782_v38 }
0x12b0   : > { %8192 = vmatpush3.bf16.msra.mxu0 %v8783_v39  ;;  %8173 = vmatprep.subr.bf16.mxu1 %v9834_v63 }
0x12b1   : > { %8193 = vmatprep.subr.bf16.mxu0 %v9834_v63 }
0x12b3   : > { %8174 = vmatpush3.bf16.msra.mxu1 %v8784_v40 }
0x12b4   : > { %8194 = vmatpush3.bf16.msra.mxu0 %v8785_v41  ;;  %8175 = vmatprep.subr.bf16.mxu1 %v9834_v63 }
0x12b5   : > { %8195 = vmatprep.subr.bf16.mxu0 %v9834_v63 }
0x12b7   : > { %8176 = vmatpush3.bf16.msra.mxu1 %v8786_v42 }
0x12b8   : > { %8196 = vmatpush3.bf16.msra.mxu0 %v8787_v46  ;;  %8177 = vmatprep.subr.bf16.mxu1 %v9834_v63 }
0x12b9   : > { %8197 = vmatprep.subr.bf16.mxu0 %v9834_v63 }
0x12bb   : > { %8178 = vmatpush3.bf16.msra.mxu1 %v8788_v48 }
0x12bc   : > { %8198 = vmatpush3.bf16.msra.mxu0 %v8789_v49  ;;  %8179 = vmatprep.subr.bf16.mxu1 %v9834_v63 }
0x12bd   : > { %8199 = vmatprep.subr.bf16.mxu0 %v9834_v63 }
0x12bf   : > { %8180 = vmatpush3.bf16.msra.mxu1 %v8790_v51  ;;  %v9146_v51 = vld [vmem:[#allocation9] sm:$0xff] }
0x12c0   : > { %8200 = vmatpush3.bf16.msra.mxu0 %v8791_v53  ;;  %8181 = vmatprep.subr.bf16.mxu1 %v9834_v63 }
0x12c1   : > { %8201 = vmatprep.subr.bf16.mxu0 %v9834_v63 }
0x12c3   : > { %8182 = vmatpush3.bf16.msra.mxu1 %v8792_v54 }
0x12c4   : > { %8202 = vmatpush3.bf16.msra.mxu0 %v8793_v56  ;;  %8207 = vmatprep.subr.bf16.mxu1 %v9834_v63 }
0x12c5   : > { %8227 = vmatprep.subr.bf16.mxu0 %v9834_v63 }
0x1365   : > { %v7879_v19 = vpop.f32.mrf.mxu1 }
0x1366   : > { %v7901_v27 = vpop.f32.mrf.mxu0 }
0x1367   : > { %v7880_v12 = vpop.f32.mrf.mxu1 }
0x1368   : > { %v7881_v35 = vadd.f32 %v7880_v12, %v7879_v19  ;;  %v7902_v21 = vpop.f32.mrf.mxu0  ;;  %v7459_v19 = vld [vmem:[%s11338_s14 + $0x1] ss:$0 sm:$0xff]  ;;  %s9666_s14 = scalar_lea.vmem %s9665_s13, 512 }
0x1369   : > { %v7903_v43 = vadd.f32 %v7902_v21, %v7901_v27  ;;  %v7882_v44 = vpop.f32.mrf.mxu1  ;;  %v8794_v21 = vld [vmem:[#allocation28 + $0x78] sm:$0xff]  }
0x136a   : > { %v7904_v11 = vpop.f32.mrf.mxu0 }
0x136b   : > { %v4209_v13 = vadd.f32 %v7903_v43, %v7881_v35  ;;  %v7883_v37 = vpop.f32.mrf.mxu1 }
0x136c   : > { %v7884_v16 = vadd.f32 %v7883_v37, %v7882_v44  ;;  %v7905_v45 = vpop.f32.mrf.mxu0  ;;  %v8795_v44 = vld [vmem:[#allocation28 + $0x70] sm:$0xff]   ;;  %v8798_v37 = vld [vmem:[#allocation28 + $0x58] sm:$0xff]  }
0x136d   : > { %v4215_v50 = vadd.f32 %v4209_v13, %v10634_v29  ;;  %v7906_v52 = vadd.f32 %v7905_v45, %v7904_v11  ;;  %v8796_v11 = vld [vmem:[#allocation28 + $0x68] sm:$0xff]   ;;  %v8797_v13 = vld [vmem:[#allocation28 + $0x60] sm:$0xff]  }
0x136e   : > { %v8800_v45 = vld [vmem:[#allocation28 + $0x48] sm:$0xff]  }
0x136f   : > { %v4212_v18 = vadd.f32 %v7906_v52, %v7884_v16  ;;  %v10793_v22 = vadd.f32 %v7455_v47, %v4215_v50  ;;  %v8799_v16 = vld [vmem:[#allocation28 + $0x50] sm:$0xff]   ;;  %v7469_v50 = vld [vmem:[#allocation27 + $0x1] ss:$0 sm:$0xff] }
0x1371   : > { %v4216_v24 = vadd.f32 %v4212_v18, %v10638_v1  ;;  %4230 = vadd.xlane.f32.xlu1 %v10793_v22 }
0x1373   : > { %v10797_v25 = vadd.f32 %v7455_v47, %v4216_v24  ;;  %v8801_v47 = vld [vmem:[#allocation28 + $0x40] sm:$0xff]  }
0x1375   : > { %4232 = vadd.xlane.f32.xlu1 %v10797_v25 }
0x13fa   : > { %v4231_v29 = vpop.xlane.xlu1 %4230 }
0x13fb   : > { %v4234_v62 = vmul.f32 0.0078125, %v4231_v29 }
0x13fd   : > { %v4236_v31 = vsub.f32 %v10793_v22, %v4234_v62 }
0x13fe   : > { %v4233_v32 = vpop.xlane.xlu1 %4232 }
0x13ff   : > { %v4235_v1 = vmul.f32 0.0078125, %v4233_v32  ;;  %v4238_v33 = vmul.f32 %v4236_v31, %v4236_v31 }
0x1401   : > { %v4237_v34 = vsub.f32 %v10797_v25, %v4235_v1  ;;  %4240 = vadd.xlane.f32.xlu0 %v4238_v33  ;;  %v7460_v33 = vld [vmem:[#allocation24 + $0x1] ss:$0 sm:$0xff] }
0x1403   : > { %v4239_v20 = vmul.f32 %v4237_v34, %v4237_v34 }
0x1405   : > { %4242 = vadd.xlane.f32.xlu1 %v4239_v20 }
0x148a   : > { %v4241_v55 = vpop.xlane.xlu0 %4240 }
0x148b   : > { %v4244_v57 = vmul.f32 0.0078125, %v4241_v55  ;;  %v9147_v55 = vld [vmem:[#allocation7] sm:$0xff] }
0x148d   : > { %v4246_v58 = vadd.f32 1e-05, %v4244_v57 }
0x148e   : > { %v4243_v59 = vpop.xlane.xlu1 %4242 }
0x148f   : > { %9078 = vrsqrt.f32 %v4246_v58  ;;  %v4245_v60 = vmul.f32 0.0078125, %v4243_v59  ;;  %v9148_v58 = vld [vmem:[#allocation10] sm:$0xff] }
0x1491   : > { %v4247_v61 = vadd.f32 1e-05, %v4245_v60  ;;  %v9149_v60 = vld [vmem:[#allocation7 + $0x8] sm:$0xff] }
0x1493   : > { %9080 = vrsqrt.f32 %v4247_v61 }
0x149c   : > { %v9079_v4 = vpop.eup %9078 }
0x149d   : > { %v4250_v6 = vmul.f32 %v9079_v4, %v4236_v31  ;;  %v9150_v4 = vld [vmem:[#allocation9 + $0x8] sm:$0xff] }
0x149f   : > { %v4258_v30 = vmul.f32 %v7458_v7, %v4250_v6 }
0x14a0   : > { %v9081_v8 = vpop.eup %9080 }
0x14a1   : > { %v4251_v10 = vmul.f32 %v9081_v8, %v4237_v34  ;;  %v4266_v12 = vadd.f32 %v7459_v19, %v4258_v30  ;;  %v9151_v8 = vld [vmem:[#allocation10 + $0x8] sm:$0xff] }
0x14a3   : > { %v4259_v27 = vmul.f32 %v7458_v7, %v4251_v10 }
0x14a5   : > { %v4267_v35 = vadd.f32 %v7459_v19, %v4259_v27 }
0x14a7   : > { %v4268_v43 = vpack.c.bf16 %v4267_v35, %v4266_v12 }
0x14a9   : > { %8184 = vmatmul.mubr.bf16.vlgmr.msra.gmra.mxu1 %v4268_v43  ;;  %8204 = vmatmul.mubr.bf16.vlgmr.msra.gmra.mxu0 %v4268_v43 }
0x14aa   : > { %8208 = vmatpush3.bf16.msra.mxu1 %v8794_v21  ;;  %8223 = vmatprep.mubr.msk.bf16.mxu1 %vm9835_vm2, %v9834_v63 }
0x14ab   : > { %8209 = vmatprep.subr.bf16.mxu1 %v9834_v63  ;;  %8229 = vmatprep.mubr.msk.bf16.mxu0 %vm9835_vm2, %v9834_v63 }
0x14ae   : > { %8210 = vmatpush3.bf16.msra.mxu1 %v8795_v44 }
0x14af   : > { %8211 = vmatprep.subr.bf16.mxu1 %v9834_v63 }
0x14b2   : > { %8212 = vmatpush3.bf16.msra.mxu1 %v8796_v11 }
0x14b3   : > { %8213 = vmatprep.subr.bf16.mxu1 %v9834_v63 }
0x14b6   : > { %8214 = vmatpush3.bf16.msra.mxu1 %v8797_v13 }
0x14b7   : > { %8215 = vmatprep.subr.bf16.mxu1 %v9834_v63 }
0x14ba   : > { %8216 = vmatpush3.bf16.msra.mxu1 %v8798_v37 }
0x14bb   : > { %8217 = vmatprep.subr.bf16.mxu1 %v9834_v63 }
0x14be   : > { %8218 = vmatpush3.bf16.msra.mxu1 %v8799_v16 }
0x14bf   : > { %8219 = vmatprep.subr.bf16.mxu1 %v9834_v63 }
0x14c2   : > { %8220 = vmatpush3.bf16.msra.mxu1 %v8800_v45 }
0x14c3   : > { %8221 = vmatprep.subr.bf16.mxu1 %v9834_v63 }
0x14c6   : > { %8222 = vmatpush3.bf16.msra.mxu1 %v8801_v47 }
0x14c7   : > { %8251 = vmatprep.subr.bf16.mxu1 %v9834_v63 }
0x14c9   : > { %8224 = vmatmul.mubr.bf16.vlgmr.msra.gmra.mxu1 %v4268_v43 }
0x14ca   : > { %8255 = vmatprep.mubr.msk.bf16.mxu1 %vm9835_vm2, %v9834_v63 }
0x1569   : > { %v4376_v52 = vpop.f32.mrf.mxu1  ;;  %v4490_v18 = vpop.f32.mrf.mxu0 }
0x156a   : > { %v4491_v24 = vadd.f32 %v7469_v50, %v4490_v18  ;;  %v4377_v34 = vadd.f32 %v7460_v33, %v4376_v52 }
0x156b   : > { %v8185_v9 = vpop.f32.mrf.mxu1  ;;  %v8205_v23 = vpop.f32.mrf.mxu0 }
0x156c   : > { %4518 = vrot.lane.b32.xlu1 %v4491_v24, %s11348_s5  ;;  %v4516_v57 = vmul.f32 %v9147_v55, %v4491_v24  ;;  %v4497_v37 = vmul.f32 %v9147_v55, %v4377_v34 }
0x156d   : > { %v4379_v29 = vpop.f32.mrf.mxu1  ;;  %v4493_v62 = vpop.f32.mrf.mxu0 }
0x156e   : > { %v4494_v31 = vadd.f32 %v7469_v50, %v4493_v62  ;;  %v4380_v20 = vadd.f32 %v7460_v33, %v4379_v29 }
0x156f   : > { %v8186_v32 = vpop.f32.mrf.mxu1  ;;  %v8206_v1 = vpop.f32.mrf.mxu0 }
0x1570   : > { %4526 = vrot.lane.b32.xlu1 %v4491_v24, %s11349_s12  ;;  %4528 = vrot.lane.b32.xlu0 %v4494_v31, %s11349_s12  ;;  %v4517_v61 = vmul.f32 %v9149_v60, %v4494_v31  ;;  %v4498_v45 = vmul.f32 %v9149_v60, %v4380_v20 }
0x1574   : > { %4520 = vrot.lane.b32.xlu1 %v4494_v31, %s11348_s5 }
0x1578   : > { %4499 = vrot.lane.b32.xlu1 %v4377_v34, %s11348_s5 }
0x157c   : > { %4507 = vrot.lane.b32.xlu1 %v4377_v34, %s11349_s12 }
0x1580   : > { %4501 = vrot.lane.b32.xlu1 %v4380_v20, %s11348_s5  ;;  %s11351_s5 = smov 64  }
0x1584   : > { %4509 = vrot.lane.b32.xlu1 %v4380_v20, %s11349_s12  ;;  %s11350_s12 = smov 96  }
0x1589   : > { %v4642_v26 = vpop.f32.mrf.mxu1 }
0x158a   : > { %v4643_v40 = vadd.f32 %v7479_v36, %v4642_v26 }
0x158b   : > { %v8225_v38 = vpop.f32.mrf.mxu1 }
0x158d   : > { %v4645_v39 = vpop.f32.mrf.mxu1 }
0x158e   : > { %v4646_v41 = vadd.f32 %v7479_v36, %v4645_v39 }
0x158f   : > { %v8226_v42 = vpop.f32.mrf.mxu1 }
0x1590   : > { %v10843_v46 = vpack.c.bf16 %v4646_v41, %v4643_v40 }
0x15de   : > { %v4519_v48 = vpop.permute.xlu1 %4518 }
0x15df   : > { %v4522_v53 = vmul.f32 %v9146_v51, %v4519_v48 }
0x15e1   : > { %v4524_v7 = vadd.f32 %v4522_v53, %v4516_v57 }
0x15e2   : > { %v4527_v49 = vpop.permute.xlu1 %4526  ;;  %v4529_v54 = vpop.permute.xlu0 %4528 }
0x15e3   : > { %v4530_v59 = vmul.f32 %v9148_v58, %v4527_v49  ;;  %v4531_v10 = vmul.f32 %v9151_v8, %v4529_v54 }
0x15e5   : > { %v4532_v27 = vadd.f32 %v4530_v59, %v4524_v7 }
0x15e6   : > { %v4521_v56 = vpop.permute.xlu1 %4520 }
0x15e7   : > { %v4523_v6 = vmul.f32 %v9150_v4, %v4521_v56 }
0x15e9   : > { %v4525_v30 = vadd.f32 %v4523_v6, %v4517_v61 }
0x15ea   : > { %v4500_v19 = vpop.permute.xlu1 %4499 }
0x15eb   : > { %v4533_v12 = vadd.f32 %v4531_v10, %v4525_v30  ;;  %v4503_v11 = vmul.f32 %v9146_v51, %v4500_v19 }
0x15ed   : > { %v10845_v35 = vpack.c.bf16 %v4533_v12, %v4532_v27  ;;  %v4505_v50 = vadd.f32 %v4503_v11, %v4497_v37 }
0x15ee   : > { %v4508_v21 = vpop.permute.xlu1 %4507 }
0x15ef   : > { %v4671_v43 = vsel %vm2736_vm3, %v10845_v35, 0  ;;  %v4511_v16 = vmul.f32 %v9148_v58, %v4508_v21 }
0x15f0   : > { %8228 = vmatpush3.bf16.xpose.msra.mxu0 %v4671_v43 }
0x15f1   : > { %8233 = vmatprep.subr.bf16.mxu0 %v9834_v63  ;;  %v4513_v24 = vadd.f32 %v4511_v16, %v4505_v50 }
0x15f2   : > { %v4502_v44 = vpop.permute.xlu1 %4501 }
0x15f3   : > { %v4504_v13 = vmul.f32 %v9150_v4, %v4502_v44 }
0x15f5   : > { %v4506_v52 = vadd.f32 %v4504_v13, %v4498_v45 }
0x15f6   : > { %v4510_v47 = vpop.permute.xlu1 %4509 }
0x15f7   : > { %v4512_v18 = vmul.f32 %v9151_v8, %v4510_v47 }
0x15f9   : > { %v4514_v9 = vadd.f32 %v4512_v18, %v4506_v52 }
0x15fb   : > { %v10850_v23 = vpack.c.bf16 %v4514_v9, %v4513_v24 }
0x15fd   : > { %8230 = vmatmul.mubr.msk.bf16.vlgmr.msra.gmra.mxu0 %vm2736_vm3, %v10850_v23 }
0x15fe   : > { %8234 = vmatpush3.bf16.msra.mxu0 %v10843_v46  ;;  %8235 = vmatprep.mubr.msk.bf16.mxu0 %vm9835_vm2, %v9834_v63 }
0x15ff   : > { %8239 = vmatprep.subr.bf16.mxu0 %v9834_v63 }
0x16bd   : > { %v4707_v29 = vpop.f32.mrf.mxu0 }
0x16be   : > { %v4708_v62 = vadd.f32 %v4707_v29, %v10527_v17 }
0x16bf   : > { %v8231_v31 = vpop.f32.mrf.mxu0 }
0x16c0   : > { %v4714_v32 = vsel %vm1895_vm1, %v4708_v62, -inf }
0x16c1   : > { %4715 = vmax.xlane.f32.xlu1 %v4714_v32  ;;  %v4710_v1 = vpop.f32.mrf.mxu0 }
0x16c2   : > { %v4711_v33 = vadd.f32 %v4710_v1, %v10531_v28 }
0x16c3   : > { %v8232_v34 = vpop.f32.mrf.mxu0 }
0x16c4   : > { %v4717_v20 = vsel %vm1895_vm1, %v4711_v33, -inf }
0x16c5   : > { %4718 = vmax.xlane.f32.xlu0 %v4717_v20 }
0x174a   : > { %v4716_v26 = vpop.xlane.xlu1 %4715 }
0x174b   : > { %v4720_v36 = vsub.f32 %v4708_v62, %v4716_v26  ;;  %v8804_v62 = vld [vmem:[#allocation30 + $0x58] sm:$0xff]  }
0x174c   : > { %8252 = vmatpush3.bf16.msra.mxu1 %v8804_v62 }
0x174d   : > { %v4722_v38 = vmul.f32 1.442695, %v4720_v36  ;;  %8253 = vmatprep.subr.bf16.mxu1 %v9834_v63  ;;  %v8802_v36 = vld [vmem:[#allocation30 + $0x48] sm:$0xff]  }
0x174e   : > { %v4719_v39 = vpop.xlane.xlu0 %4718 }
0x174f   : > { %9082 = vpow2.f32 %v4722_v38  ;;  %v4721_v40 = vsub.f32 %v4711_v33, %v4719_v39  ;;  %v8803_v39 = vld [vmem:[#allocation30 + $0x40] sm:$0xff]  }
0x1751   : > { %v4724_v41 = vmul.f32 1.442695, %v4721_v40  ;;  %v8805_v40 = vld [vmem:[#allocation30 + $0x50] sm:$0xff]  }
0x1752   : > { %8254 = vmatpush3.bf16.msra.mxu1 %v8805_v40 }
0x1753   : > { %9084 = vpow2.f32 %v4724_v41  ;;  %8267 = vmatprep.subr.bf16.mxu1 %v9834_v63 }
0x175c   : > { %v9083_v42 = vpop.eup %9082 }
0x175d   : > { %v4726_v48 = vsel %vm1895_vm1, %v9083_v42, 0.0 }
0x175e   : > { %4727 = vadd.xlane.f32.xlu1 %v4726_v48 }
0x1760   : > { %v9085_v49 = vpop.eup %9084 }
0x1761   : > { %v4729_v51 = vsel %vm1895_vm1, %v9085_v49, 0.0 }
0x1762   : > { %4730 = vadd.xlane.f32.xlu0 %v4729_v51 }
0x176f   : > { %4786 = vrot.lane.b32.xlu1 %v10845_v35, %s11350_s12 }
0x1778   : > { %4783 = vrot.lane.b32.xlu0 %v10850_v23, %s11350_s12 }
0x17e7   : > { %v4728_v53 = vpop.xlane.xlu1 %4727 }
0x17e8   : > { %9086 = vrcp.f32 %v4728_v53 }
0x17eb   : > { %v4731_v54 = vpop.xlane.xlu0 %4730  ;;  %v4787_v59 = vpop.permute.xlu1 %4786 }
0x17ec   : > { %9088 = vrcp.f32 %v4731_v54  ;;  %v4792_v61 = vsel %vm2736_vm3, %v4787_v59, 0 }
0x17ef   : > { %v4784_v4 = vpop.permute.xlu0 %4783 }
0x17f5   : > { %v9087_v56 = vpop.eup %9086 }
0x17f6   : > { %v4734_v57 = vmul.f32 %v9087_v56, %v9083_v42 }
0x17f9   : > { %v9089_v55 = vpop.eup %9088 }
0x17fa   : > { %v4735_v58 = vmul.f32 %v9089_v55, %v9085_v49 }
0x17fc   : > { %v4736_v60 = vpack.c.bf16 %v4735_v58, %v4734_v57 }
0x17fe   : > { %8236 = vmatmul.mubr.msk.bf16.vlgmr.msra.gmra.mxu0 %vm1895_vm1, %v4736_v60 }
0x17ff   : > { %8240 = vmatpush3.bf16.xpose.msra.mxu0 %v4792_v61  ;;  %8241 = vmatprep.mubr.msk.bf16.mxu0 %vm9835_vm2, %v9834_v63 }
0x1800   : > { %8245 = vmatprep.subr.bf16.mxu0 %v9834_v63 }
0x1806   : > { %8242 = vmatmul.mubr.msk.bf16.vlgmr.msra.gmra.mxu0 %vm2736_vm3, %v4784_v4 }
0x1807   : > { %8247 = vmatprep.mubr.msk.bf16.mxu0 %vm9835_vm2, %v9834_v63 }
0x18be   : > { %v4774_v6 = vpop.f32.mrf.mxu0 }
0x18c0   : > { %v8237_v7 = vpop.f32.mrf.mxu0 }
0x18c2   : > { %v4777_v8 = vpop.f32.mrf.mxu0 }
0x18c3   : > { %v4781_v10 = vpack.c.bf16 %v4777_v8, %v4774_v6 }
0x18c4   : > { %v8238_v30 = vpop.f32.mrf.mxu0 }
0x18c6   : > { %v4828_v19 = vpop.f32.mrf.mxu0 }
0x18c7   : > { %v4829_v27 = vadd.f32 %v4828_v19, %v10527_v17 }
0x18c8   : > { %v8243_v12 = vpop.f32.mrf.mxu0 }
0x18c9   : > { %v4835_v21 = vsel %vm1895_vm1, %v4829_v27, -inf }
0x18ca   : > { %4836 = vmax.xlane.f32.xlu1 %v4835_v21  ;;  %v4831_v43 = vpop.f32.mrf.mxu0 }
0x18cb   : > { %v4832_v44 = vadd.f32 %v4831_v43, %v10531_v28 }
0x18cc   : > { %v8244_v11 = vpop.f32.mrf.mxu0 }
0x18cd   : > { %v4838_v13 = vsel %vm1895_vm1, %v4832_v44, -inf }
0x18ce   : > { %4839 = vmax.xlane.f32.xlu0 %v4838_v13 }
0x1953   : > { %v4837_v37 = vpop.xlane.xlu1 %4836 }
0x1954   : > { %v4841_v16 = vsub.f32 %v4829_v27, %v4837_v37 }
0x1956   : > { %v4843_v45 = vmul.f32 1.442695, %v4841_v16 }
0x1957   : > { %v4840_v47 = vpop.xlane.xlu0 %4839 }
0x1958   : > { %9090 = vpow2.f32 %v4843_v45  ;;  %v4842_v50 = vsub.f32 %v4832_v44, %v4840_v47 }
0x195a   : > { %v4845_v52 = vmul.f32 1.442695, %v4842_v50 }
0x195c   : > { %9092 = vpow2.f32 %v4845_v52 }
0x1965   : > { %v9091_v18 = vpop.eup %9090 }
0x1966   : > { %v4847_v24 = vsel %vm1895_vm1, %v9091_v18, 0.0 }
0x1967   : > { %4848 = vadd.xlane.f32.xlu1 %v4847_v24 }
0x1969   : > { %v9093_v9 = vpop.eup %9092 }
0x196a   : > { %v4850_v29 = vsel %vm1895_vm1, %v9093_v9, 0.0 }
0x196b   : > { %4851 = vadd.xlane.f32.xlu0 %v4850_v29 }
0x1978   : > { %4859 = vrot.lane.b32.xlu1 %v10843_v46, %s11350_s12  ;;  %s11352_s12 = smov 32  }
0x197c   : > { %5019 = vrot.lane.b32.xlu1 %v10850_v23, %s11351_s5 }
0x1981   : > { %5021 = vrot.lane.b32.xlu0 %v10845_v35, %s11351_s5 }
0x19f0   : > { %v4849_v31 = vpop.xlane.xlu1 %4848 }
0x19f1   : > { %9094 = vrcp.f32 %v4849_v31 }
0x19f4   : > { %v4860_v32 = vpop.permute.xlu1 %4859  ;;  %v4852_v1 = vpop.xlane.xlu0 %4851 }
0x19f5   : > { %9096 = vrcp.f32 %v4852_v1  ;;  %8246 = vmatpush3.bf16.msra.mxu0 %v4860_v32 }
0x19f6   : > { %8259 = vmatprep.subr.bf16.mxu0 %v9834_v63 }
0x19f8   : > { %v5022_v48 = vpop.permute.xlu0 %5021  ;;  %v5020_v58 = vpop.permute.xlu1 %5019 }
0x19f9   : > { %v5027_v54 = vsel %vm2736_vm3, %v5022_v48, 0 }
0x19fe   : > { %v9095_v33 = vpop.eup %9094 }
0x19ff   : > { %v4855_v20 = vmul.f32 %v9095_v33, %v9091_v18 }
0x1a02   : > { %v9097_v34 = vpop.eup %9096 }
0x1a03   : > { %v4856_v26 = vmul.f32 %v9097_v34, %v9093_v9  ;;  %v8806_v34 = vld [vmem:[#allocation30 + $0x68] sm:$0xff]  }
0x1a05   : > { %v4857_v38 = vpack.c.bf16 %v4856_v26, %v4855_v20  ;;  %v8807_v20 = vld [vmem:[#allocation30 + $0x60] sm:$0xff]  }
0x1a07   : > { %8248 = vmatmul.mubr.msk.bf16.vlgmr.msra.gmra.mxu0 %vm1895_vm1, %v4857_v38 }
0x1a08   : > { %8260 = vmatpush3.bf16.msra.mxu0 %v8802_v36  ;;  %8263 = vmatprep.mubr.msk.bf16.mxu0 %vm9835_vm2, %v9834_v63 }
0x1a09   : > { %8261 = vmatprep.subr.bf16.mxu0 %v9834_v63 }
0x1a0c   : > { %8262 = vmatpush3.bf16.msra.mxu0 %v8803_v39 }
0x1a0d   : > { %8273 = vmatprep.subr.bf16.mxu0 %v9834_v63 }
0x1a0f   : > { %8264 = vmatmul.mubr.msk.bf16.vlgmr.msra.gmra.mxu0 %vm2736_vm3, %v4781_v10 }
0x1a10   : > { %8275 = vmatprep.mubr.msk.bf16.mxu0 %vm9835_vm2, %v9834_v63 }
0x1ac7   : > { %v4899_v41 = vpop.f32.mrf.mxu0 }
0x1ac9   : > { %v8249_v42 = vpop.f32.mrf.mxu0 }
0x1acb   : > { %v4902_v49 = vpop.f32.mrf.mxu0 }
0x1acc   : > { %v4906_v51 = vpack.c.bf16 %v4902_v49, %v4899_v41 }
0x1acd   : > { %v8250_v53 = vpop.f32.mrf.mxu0 }
0x1ace   : > { %8256 = vmatmul.mubr.msk.bf16.vlgmr.msra.gmra.mxu1 %vm2736_vm3, %v4906_v51 }
0x1acf   : > { %8268 = vmatpush3.bf16.xpose.msra.mxu1 %v5027_v54  ;;  %v10901_v56 = vpop.f32.mrf.mxu0  ;;  %8269 = vmatprep.mubr.msk.bf16.mxu1 %vm9835_vm2, %v9834_v63 }
0x1ad0   : > { %8279 = vmatprep.subr.bf16.mxu1 %v9834_v63 }
0x1ad1   : > { %v8265_v55 = vpop.f32.mrf.mxu0 }
0x1ad3   : > { %v10906_v57 = vpop.f32.mrf.mxu0 }
0x1ad5   : > { %v8266_v59 = vpop.f32.mrf.mxu0 }
0x1ad6   : > { %8270 = vmatmul.mubr.msk.bf16.vlgmr.msra.gmra.mxu1 %vm2736_vm3, %v5020_v58 }
0x1ad7   : > { %8283 = vmatprep.mubr.msk.bf16.mxu1 %vm9835_vm2, %v9834_v63  ;;  %8280 = vmatpush3.bf16.msra.mxu1 %v8806_v34 }
0x1ad8   : > { %8281 = vmatprep.subr.bf16.mxu1 %v9834_v63 }
0x1adb   : > { %8282 = vmatpush3.bf16.msra.mxu1 %v8807_v20 }
0x1adc   : > { %8293 = vmatprep.subr.bf16.mxu1 %v9834_v63 }
0x1b8e   : > { %v10911_v60 = vpop.f32.mrf.mxu1 }
0x1b90   : > { %v8257_v61 = vpop.f32.mrf.mxu1 }
0x1b92   : > { %v10913_v4 = vpop.f32.mrf.mxu1 }
0x1b94   : > { %v8258_v6 = vpop.f32.mrf.mxu1 }
0x1b96   : > { %v5063_v7 = vpop.f32.mrf.mxu1 }
0x1b97   : > { %v5064_v8 = vadd.f32 %v5063_v7, %v10527_v17 }
0x1b98   : > { %v8271_v10 = vpop.f32.mrf.mxu1 }
0x1b99   : > { %v5070_v30 = vsel %vm1895_vm1, %v5064_v8, -inf }
0x1b9a   : > { %5071 = vmax.xlane.f32.xlu1 %v5070_v30  ;;  %v5066_v19 = vpop.f32.mrf.mxu1 }
0x1b9b   : > { %v5067_v27 = vadd.f32 %v5066_v19, %v10531_v28 }
0x1b9c   : > { %v8272_v12 = vpop.f32.mrf.mxu1 }
0x1b9d   : > { %v5073_v21 = vsel %vm1895_vm1, %v5067_v27, -inf }
0x1b9e   : > { %5074 = vmax.xlane.f32.xlu0 %v5073_v21 }
0x1c23   : > { %v5072_v43 = vpop.xlane.xlu1 %5071 }
0x1c24   : > { %v5076_v44 = vsub.f32 %v5064_v8, %v5072_v43  ;;  %v5016_v43 = vadd.f32 %v10906_v57, %v10913_v4  ;;  %v8809_v57 = vld [vmem:[#allocation30 + $0x70] sm:$0xff]  }
0x1c26   : > { %v5078_v11 = vmul.f32 1.442695, %v5076_v44 }
0x1c27   : > { %v5075_v13 = vpop.xlane.xlu0 %5074 }
0x1c28   : > { %9098 = vpow2.f32 %v5078_v11  ;;  %v5077_v37 = vsub.f32 %v5067_v27, %v5075_v13 }
0x1c2a   : > { %v5080_v16 = vmul.f32 1.442695, %v5077_v37 }
0x1c2c   : > { %9100 = vpow2.f32 %v5080_v16 }
0x1c35   : > { %v9099_v45 = vpop.eup %9098 }
0x1c36   : > { %v5082_v47 = vsel %vm1895_vm1, %v9099_v45, 0.0 }
0x1c37   : > { %5083 = vadd.xlane.f32.xlu0 %v5082_v47 }
0x1c39   : > { %v9101_v50 = vpop.eup %9100 }
0x1c3a   : > { %v5085_v52 = vsel %vm1895_vm1, %v9101_v50, 0.0 }
0x1c3b   : > { %5086 = vadd.xlane.f32.xlu1 %v5085_v52 }
0x1c4c   : > { %5201 = vrot.lane.b32.xlu1 %v10845_v35, %s11352_s12 }
0x1c4d   : > { %5093 = vrot.lane.b32.xlu0 %v10843_v46, %s11351_s5  ;;  %s11353_s5 = sshll.u32 %s10314_s21, 4 }
0x1c50   : > { %5199 = vrot.lane.b32.xlu1 %v10850_v23, %s11352_s12 }
0x1cc0   : > { %v5084_v18 = vpop.xlane.xlu0 %5083 }
0x1cc1   : > { %9102 = vrcp.f32 %v5084_v18 }
0x1cc4   : > { %v5087_v24 = vpop.xlane.xlu1 %5086  ;;  %v5094_v9 = vpop.permute.xlu0 %5093 }
0x1cc5   : > { %9104 = vrcp.f32 %v5087_v24  ;;  %8274 = vmatpush3.bf16.msra.mxu0 %v5094_v9 }
0x1cc6   : > { %8287 = vmatprep.subr.bf16.mxu0 %v9834_v63 }
0x1cc8   : > { %v5202_v1 = vpop.permute.xlu1 %5201 }
0x1cc9   : > { %v5207_v33 = vsel %vm2736_vm3, %v5202_v1, 0  ;;  %v7509_v1 = vld [vmem:[%s11341_s8 + $0x1] ss:$0 sm:$0xff] }
0x1ccc   : > { %v5200_v23 = vpop.permute.xlu1 %5199 }
0x1cce   : > { %v9103_v29 = vpop.eup %9102 }
0x1ccf   : > { %v5090_v31 = vmul.f32 %v9103_v29, %v9099_v45 }
0x1cd2   : > { %v9105_v62 = vpop.eup %9104 }
0x1cd3   : > { %v5091_v32 = vmul.f32 %v9105_v62, %v9101_v50 }
0x1cd5   : > { %v5092_v35 = vpack.c.bf16 %v5091_v32, %v5090_v31 }
0x1cd7   : > { %8276 = vmatmul.mubr.msk.bf16.vlgmr.msra.gmra.mxu0 %vm1895_vm1, %v5092_v35 }
0x1cd8   : > { %8288 = vmatpush3.bf16.xpose.msra.mxu0 %v5207_v33  ;;  %8289 = vmatprep.mubr.msk.bf16.mxu0 %vm9835_vm2, %v9834_v63 }
0x1cd9   : > { %8299 = vmatprep.subr.bf16.mxu0 %v9834_v63 }
0x1cdf   : > { %8290 = vmatmul.mubr.msk.bf16.vlgmr.msra.gmra.mxu0 %vm2736_vm3, %v5200_v23 }
0x1ce0   : > { %8303 = vmatprep.mubr.msk.bf16.mxu0 %vm9835_vm2, %v9834_v63 }
0x1d97   : > { %v5133_v26 = vpop.f32.mrf.mxu0 }
0x1d99   : > { %v8277_v36 = vpop.f32.mrf.mxu0 }
0x1d9b   : > { %v5136_v38 = vpop.f32.mrf.mxu0 }
0x1d9c   : > { %v5140_v39 = vpack.c.bf16 %v5136_v38, %v5133_v26  ;;  %v8810_v38 = vld [vmem:[%s11342_s17 + $0x1e0] ss:$16 sps:$4 sm:$0xff]  }
0x1d9d   : > { %v8278_v40 = vpop.f32.mrf.mxu0 }
0x1d9e   : > { %8284 = vmatmul.mubr.msk.bf16.vlgmr.msra.gmra.mxu1 %vm2736_vm3, %v5140_v39  ;;  %v8812_v39 = vld [vmem:[%s11342_s17 + $0x1e4] ss:$16 sps:$4 sm:$0xff]   ;;  %v8813_v40 = vld [vmem:[%s11342_s17 + $0x1e8] ss:$16 sps:$4 sm:$0xff]  }
0x1d9f   : > { %v5243_v41 = vpop.f32.mrf.mxu0  ;;  %8295 = vmatprep.mubr.msk.bf16.mxu1 %vm9835_vm2, %v9834_v63 }
0x1da0   : > { %v5244_v42 = vadd.f32 %v5243_v41, %v10527_v17  ;;  %v8815_v41 = vld [vmem:[%s11342_s17 + $0x1ec] ss:$16 sps:$4 sm:$0xff]  }
0x1da1   : > { %v8291_v48 = vpop.f32.mrf.mxu0 }
0x1da2   : > { %v5250_v49 = vsel %vm1895_vm1, %v5244_v42, -inf }
0x1da3   : > { %5251 = vmax.xlane.f32.xlu0 %v5250_v49  ;;  %v5246_v51 = vpop.f32.mrf.mxu0 }
0x1da4   : > { %v5247_v53 = vadd.f32 %v5246_v51, %v10531_v28 }
0x1da5   : > { %v8292_v54 = vpop.f32.mrf.mxu0 }
0x1da6   : > { %v5253_v55 = vsel %vm1895_vm1, %v5247_v53, -inf }
0x1da7   : > { %5254 = vmax.xlane.f32.xlu1 %v5253_v55  ;;  %v8818_v55 = vld [vmem:[%s11342_s17 + $0x1c4] ss:$16 sps:$4 sm:$0xff]  }
0x1db8   : > { %5273 = vrot.lane.b32.xlu1 %v10843_v46, %s11352_s12  ;;  %v5013_v46 = vadd.f32 %v10901_v56, %v10911_v60  ;;  %v8808_v56 = vld [vmem:[#allocation30 + $0x78] sm:$0xff]   ;;  %s11122_s12 = scalar_lea.vmem [#allocation34], %s11353_s5  ;;  %s11354_s5 = sld [smem:[#allocation78_spill]] }
0x1db9   : > { %8300 = vmatpush3.bf16.msra.mxu0 %v8808_v56  ;;  %v8855_v56 = vld [vmem:[%s11342_s17 + $0x108] ss:$16 sps:$4 sm:$0xff]  }
0x1dba   : > { %8301 = vmatprep.subr.bf16.mxu0 %v9834_v63 }
0x1dbd   : > { %8302 = vmatpush3.bf16.msra.mxu0 %v8809_v57 }
0x1dbe   : > { %5693 = vmatprep.subr.bf16.mxu0 %v8815_v41  ;;  %v8859_v41 = vld [vmem:[%s11345_s3 + $0x1f8] sm:$0xff]  }
0x1e2c   : > { %v5252_v58 = vpop.xlane.xlu0 %5251 }
0x1e2d   : > { %v5256_v59 = vsub.f32 %v5244_v42, %v5252_v58  ;;  %v8821_v58 = vld [vmem:[%s11342_s17 + $0x1cc] ss:$16 sps:$4 sm:$0xff]  }
0x1e2f   : > { %v5258_v61 = vmul.f32 1.442695, %v5256_v59  ;;  %v8816_v59 = vld [vmem:[%s11342_s17 + $0x1c0] ss:$16 sps:$4 sm:$0xff]  }
0x1e30   : > { %v5255_v6 = vpop.xlane.xlu1 %5254 }
0x1e31   : > { %9106 = vpow2.f32 %v5258_v61  ;;  %v5257_v17 = vsub.f32 %v5247_v53, %v5255_v6  ;;  %v8819_v61 = vld [vmem:[%s11342_s17 + $0x1c8] ss:$16 sps:$4 sm:$0xff]   ;;  %v8824_v6 = vld [vmem:[%s11342_s17 + $0x1a4] ss:$16 sps:$4 sm:$0xff]  }
0x1e33   : > { %v5260_v7 = vmul.f32 1.442695, %v5257_v17  ;;  %v8827_v17 = vld [vmem:[%s11342_s17 + $0x1ac] ss:$16 sps:$4 sm:$0xff]  }
0x1e34   : > { %v5274_v8 = vpop.permute.xlu1 %5273 }
0x1e35   : > { %9108 = vpow2.f32 %v5260_v7  ;;  %8294 = vmatpush3.bf16.msra.mxu1 %v5274_v8  ;;  %v8822_v7 = vld [vmem:[%s11342_s17 + $0x1a0] ss:$16 sps:$4 sm:$0xff]   ;;  %v8825_v8 = vld [vmem:[%s11342_s17 + $0x1a8] ss:$16 sps:$4 sm:$0xff]  }
0x1e36   : > { %5650 = vmatprep.subr.bf16.mxu1 %v8812_v39 }
0x1e3e   : > { %v9107_v10 = vpop.eup %9106 }
0x1e3f   : > { %v5262_v28 = vsel %vm1895_vm1, %v9107_v10, 0.0 }
0x1e40   : > { %5263 = vadd.xlane.f32.xlu0 %v5262_v28  ;;  %v8830_v28 = vld [vmem:[%s11342_s17 + $0x184] ss:$16 sps:$4 sm:$0xff]  }
0x1e42   : > { %v9109_v30 = vpop.eup %9108 }
0x1e43   : > { %v5265_v19 = vsel %vm1895_vm1, %v9109_v30, 0.0 }
0x1e44   : > { %5266 = vadd.xlane.f32.xlu0 %v5265_v19  ;;  %v8833_v19 = vld [vmem:[%s11342_s17 + $0x18c] ss:$16 sps:$4 sm:$0xff]  }
0x1e5e   : > { %v5190_v27 = vpop.f32.mrf.mxu1 }
0x1e5f   : > { %v5197_v12 = vadd.f32 %v5190_v27, %v5013_v46  ;;  %v8836_v46 = vld [vmem:[%s11342_s17 + $0x164] ss:$16 sps:$4 sm:$0xff]   ;;  %v8839_v27 = vld [vmem:[%s11342_s17 + $0x16c] ss:$16 sps:$4 sm:$0xff]  }
0x1e60   : > { %v8285_v21 = vpop.f32.mrf.mxu1 }
0x1e61   : > { %v8837_v21 = vld [vmem:[%s11342_s17 + $0x168] ss:$16 sps:$4 sm:$0xff]  }
0x1e62   : > { %v5193_v44 = vpop.f32.mrf.mxu1 }
0x1e63   : > { %v5198_v11 = vadd.f32 %v5193_v44, %v5016_v43  ;;  %v8842_v43 = vld [vmem:[%s11342_s17 + $0x144] ss:$16 sps:$4 sm:$0xff]   ;;  %v8845_v44 = vld [vmem:[%s11342_s17 + $0x14c] ss:$16 sps:$4 sm:$0xff]  }
0x1e64   : > { %v8286_v13 = vpop.f32.mrf.mxu1 }
0x1e65   : > { %v8843_v13 = vld [vmem:[%s11342_s17 + $0x148] ss:$16 sps:$4 sm:$0xff]  }
0x1ec9   : > { %v5264_v37 = vpop.xlane.xlu0 %5263 }
0x1eca   : > { %9110 = vrcp.f32 %v5264_v37  ;;  %v8848_v37 = vld [vmem:[%s11342_s17 + $0x124] ss:$16 sps:$4 sm:$0xff]  }
0x1ecd   : > { %v5267_v16 = vpop.xlane.xlu0 %5266 }
0x1ece   : > { %9112 = vrcp.f32 %v5267_v16  ;;  %v8851_v16 = vld [vmem:[%s11342_s17 + $0x12c] ss:$16 sps:$4 sm:$0xff]  }
0x1ed7   : > { %v9111_v45 = vpop.eup %9110 }
0x1ed8   : > { %v5270_v50 = vmul.f32 %v9111_v45, %v9107_v10  ;;  %v8828_v10 = vld [vmem:[%s11342_s17 + $0x180] ss:$16 sps:$4 sm:$0xff]  }
0x1ed9   : > { %v8846_v45 = vld [vmem:[%s11342_s17 + $0x120] ss:$16 sps:$4 sm:$0xff]  }
0x1edb   : > { %v9113_v47 = vpop.eup %9112 }
0x1edc   : > { %v5271_v52 = vmul.f32 %v9113_v47, %v9109_v30  ;;  %v8831_v30 = vld [vmem:[%s11342_s17 + $0x188] ss:$16 sps:$4 sm:$0xff]  }
0x1edd   : > { %v8849_v47 = vld [vmem:[%s11342_s17 + $0x128] ss:$16 sps:$4 sm:$0xff]  }
0x1ede   : > { %v5272_v18 = vpack.c.bf16 %v5271_v52, %v5270_v50  ;;  %v8854_v50 = vld [vmem:[%s11342_s17 + $0x104] ss:$16 sps:$4 sm:$0xff]   ;;  %v8857_v52 = vld [vmem:[%s11342_s17 + $0x10c] ss:$16 sps:$4 sm:$0xff]  }
0x1ee0   : > { %8296 = vmatmul.mubr.msk.bf16.vlgmr.msra.gmra.mxu1 %vm1895_vm1, %v5272_v18  ;;  %v8852_v18 = vld [vmem:[%s11342_s17 + $0x100] ss:$16 sps:$4 sm:$0xff]  }
0x1ee1   : > { %5682 = vmatprep.mubr.bf16.mxu1 %v9833_v0  ;;  %5651 = vmatpush1.bf16.msra.mxu1 %v8810_v38 }
0x1ee2   : > { %5652 = vmatprep.subr.bf16.mxu1 %v8818_v55  ;;  %v8868_v55 = vld [vmem:[%s11345_s3 + $0x128] sm:$0xff]  }
0x1ee5   : > { %5653 = vmatpush1.bf16.msra.mxu1 %v8816_v59  ;;  %v8870_v59 = vld [vmem:[%s11345_s3 + $0x160] sm:$0xff]  }
0x1ee6   : > { %5654 = vmatprep.subr.bf16.mxu1 %v8824_v6  ;;  %v8872_v6 = vld [vmem:[%s11345_s3 + $0x120] sm:$0xff]  }
0x1ee9   : > { %5655 = vmatpush1.bf16.msra.mxu1 %v8822_v7  ;;  %v8874_v7 = vld [vmem:[%s11345_s3 + $0x158] sm:$0xff]  }
0x1eea   : > { %5656 = vmatprep.subr.bf16.mxu1 %v8830_v28  ;;  %v8877_v28 = vld [vmem:[%s11345_s3 + $0x198] sm:$0xff]  }
0x1eed   : > { %5657 = vmatpush1.bf16.msra.mxu1 %v8828_v10  ;;  %v8876_v10 = vld [vmem:[%s11345_s3 + $0x118] sm:$0xff]  }
0x1eee   : > { %5658 = vmatprep.subr.bf16.mxu1 %v8836_v46  ;;  %v8880_v46 = vld [vmem:[%s11345_s3 + $0x110] sm:$0xff]  }
0x1fa0   : > { %v5313_v60 = vpop.f32.mrf.mxu1 }
0x1fa2   : > { %v8297_v4 = vpop.f32.mrf.mxu1 }
0x1fa4   : > { %v5316_v24 = vpop.f32.mrf.mxu1 }
0x1fa5   : > { %v5320_v9 = vpack.c.bf16 %v5316_v24, %v5313_v60 }
0x1fa6   : > { %v8298_v29 = vpop.f32.mrf.mxu1 }
0x1fa7   : > { %8304 = vmatmul.mubr.msk.bf16.vlgmr.msra.gmra.mxu0 %vm2736_vm3, %v5320_v9 }
0x1fa8   : > { %5725 = vmatprep.mubr.bf16.mxu0 %v9833_v0  ;;  %5694 = vmatpush1.bf16.msra.mxu0 %v8813_v40  ;;  %v8858_v40 = vld [vmem:[%s11345_s3 + $0x178] sm:$0xff]  }
0x1fa9   : > { %5695 = vmatprep.subr.bf16.mxu0 %v8821_v58  ;;  %v8869_v58 = vld [vmem:[%s11345_s3 + $0x1a8] sm:$0xff]  }
0x1fac   : > { %5696 = vmatpush1.bf16.msra.mxu0 %v8819_v61  ;;  %v8871_v61 = vld [vmem:[%s11345_s3 + $0x1e0] sm:$0xff]  }
0x1fad   : > { %5697 = vmatprep.subr.bf16.mxu0 %v8827_v17  ;;  %v8873_v17 = vld [vmem:[%s11345_s3 + $0x1a0] sm:$0xff]  }
0x1fb0   : > { %5698 = vmatpush1.bf16.msra.mxu0 %v8825_v8  ;;  %v8875_v8 = vld [vmem:[%s11345_s3 + $0x1d8] sm:$0xff]  }
0x1fb1   : > { %5699 = vmatprep.subr.bf16.mxu0 %v8833_v19  ;;  %v8879_v19 = vld [vmem:[%s11345_s3 + $0x1d0] sm:$0xff]  }
0x1fb4   : > { %5700 = vmatpush1.bf16.msra.mxu0 %v8831_v30  ;;  %v8878_v30 = vld [vmem:[%s11345_s3 + $0x150] sm:$0xff]  }
0x1fb5   : > { %5701 = vmatprep.subr.bf16.mxu0 %v8839_v27  ;;  %v8881_v27 = vld [vmem:[%s11345_s3 + $0x190] sm:$0xff]  }
0x1fb8   : > { %5702 = vmatpush1.bf16.msra.mxu0 %v8837_v21  ;;  %v8883_v21 = vld [vmem:[%s11345_s3 + $0x1c8] sm:$0xff]  }
0x1fb9   : > { %5703 = vmatprep.subr.bf16.mxu0 %v8845_v44  ;;  %v8885_v44 = vld [vmem:[%s11345_s3 + $0x188] sm:$0xff]  }
0x1fbc   : > { %5704 = vmatpush1.bf16.msra.mxu0 %v8843_v13  ;;  %v8887_v13 = vld [vmem:[%s11345_s3 + $0x1c0] sm:$0xff]  }
0x1fbd   : > { %5705 = vmatprep.subr.bf16.mxu0 %v8851_v16  ;;  %v8889_v16 = vld [vmem:[%s11345_s3 + $0x180] sm:$0xff]  }
0x1fc0   : > { %5706 = vmatpush1.bf16.msra.mxu0 %v8849_v47  ;;  %v7546_v47 = vld [vmem:[%s11346_s22 + $0x4] sm:$0xf] }
0x1fc1   : > { %5707 = vmatprep.subr.bf16.mxu0 %v8857_v52  ;;  %v5481_v52 = vrot.slane %v7546_v47, %v10722_v14 }
0x1fc4   : > { %5708 = vmatpush1.bf16.msra.mxu0 %v8855_v56  ;;  %v5485_v56 = vrot.slane %v7546_v47, %v3549_v15 }
0x1fc5   : > { %7984 = vmatprep.subr.bf16.mxu0 %v8859_v41 }
0x2067   : > { %v5370_v62 = vpop.f32.mrf.mxu0 }
0x2068   : > { %v5377_v31 = vadd.f32 %v5370_v62, %v5197_v12  ;;  %v8834_v12 = vld [vmem:[%s11342_s17 + $0x160] ss:$16 sps:$4 sm:$0xff]  }
0x2069   : > { %v8305_v32 = vpop.f32.mrf.mxu0  ;;  %5659 = vmatpush1.bf16.msra.mxu1 %v8834_v12  ;;  %v8882_v12 = vld [vmem:[%s11345_s3 + $0x148] sm:$0xff]  }
0x206a   : > { %v5379_v35 = vadd.f32 %v5377_v31, %v10793_v22  ;;  %5660 = vmatprep.subr.bf16.mxu1 %v8842_v43  ;;  %v7512_v32 = vld [vmem:[%s11343_s15 + $0x1] ss:$0 sm:$0xff]  ;;  %v8884_v43 = vld [vmem:[%s11345_s3 + $0x108] sm:$0xff]  }
0x206b   : > { %v5373_v33 = vpop.f32.mrf.mxu0 }
0x206c   : > { %v5378_v23 = vadd.f32 %v5373_v33, %v5198_v11  ;;  %v10960_v34 = vadd.f32 %v7509_v1, %v5379_v35  ;;  %v8840_v11 = vld [vmem:[%s11342_s17 + $0x140] ss:$16 sps:$4 sm:$0xff]  }
0x206d   : > { %v8306_v20 = vpop.f32.mrf.mxu0  ;;  %5661 = vmatpush1.bf16.msra.mxu1 %v8840_v11  ;;  %v8886_v11 = vld [vmem:[%s11345_s3 + $0x140] sm:$0xff]  }
0x206e   : > { %v5380_v26 = vadd.f32 %v5378_v23, %v10797_v25  ;;  %5395 = vadd.xlane.f32.xlu0 %v10960_v34  ;;  %5662 = vmatprep.subr.bf16.mxu1 %v8848_v37  ;;  %v7513_v23 = vld [vmem:[%s11344_s6 + $0x1] ss:$0 sm:$0xff]  ;;  %s6875_s6 = scalar_lea.sflag [#allocation6], %s10314_s21 }
0x206f   : > { %v8888_v37 = vld [vmem:[%s11345_s3 + $0x100] sm:$0xff]  }
0x2070   : > { %v10964_v36 = vadd.f32 %v7509_v1, %v5380_v26 }
0x2071   : > { %5663 = vmatpush1.bf16.msra.mxu1 %v8846_v45  ;;  %v8892_v45 = vld [vmem:[#allocation31 + $0xac] ss:$12 sps:$4 sm:$0xff]  }
0x2072   : > { %5397 = vadd.xlane.f32.xlu0 %v10964_v36  ;;  %5664 = vmatprep.subr.bf16.mxu1 %v8854_v50  ;;  %v5473_v50 = vrot.slane %v7546_v47, %v10399_v3 }
0x2075   : > { %5665 = vmatpush1.bf16.msra.mxu1 %v8852_v18  ;;  %v5477_v18 = vrot.slane %v7546_v47, %v10402_v5 }
0x2076   : > { %7962 = vmatprep.subr.bf16.mxu1 %v8858_v40 }
0x20f7   : > { %v5396_v22 = vpop.xlane.xlu0 %5395 }
0x20f8   : > { %v5399_v25 = vmul.f32 0.0078125, %v5396_v22  ;;  %v8860_v22 = vld [vmem:[%s11345_s3 + $0x138] sm:$0xff]  }
0x20fa   : > { %v10972_v42 = vsub.f32 %v10960_v34, %v5399_v25  ;;  %v8861_v25 = vld [vmem:[%s11345_s3 + $0x1b8] sm:$0xff]  }
0x20fb   : > { %v5398_v48 = vpop.xlane.xlu0 %5397 }
0x20fc   : > { %v5400_v49 = vmul.f32 0.0078125, %v5398_v48  ;;  %v5403_v51 = vmul.f32 %v10972_v42, %v10972_v42  ;;  %v8863_v48 = vld [vmem:[%s11345_s3 + $0x1f0] sm:$0xff]  }
0x20fe   : > { %v10977_v53 = vsub.f32 %v10964_v36, %v5400_v49  ;;  %5405 = vadd.xlane.f32.xlu0 %v5403_v51  ;;  %v8864_v49 = vld [vmem:[%s11345_s3 + $0x130] sm:$0xff]  }
0x20ff   : > { %v8865_v51 = vld [vmem:[%s11345_s3 + $0x1b0] sm:$0xff]  }
0x2100   : > { %v5404_v54 = vmul.f32 %v10977_v53, %v10977_v53 }
0x2102   : > { %5407 = vadd.xlane.f32.xlu0 %v5404_v54  ;;  %v8867_v54 = vld [vmem:[%s11345_s3 + $0x1e8] sm:$0xff]  }
0x2187   : > { %v5406_v57 = vpop.xlane.xlu0 %5405 }
0x2188   : > { %v5409_v60 = vmul.f32 0.0078125, %v5406_v57 }
0x218a   : > { %v5411_v4 = vadd.f32 1e-05, %v5409_v60 }
0x218b   : > { %v5408_v24 = vpop.xlane.xlu0 %5407 }
0x218c   : > { %9114 = vrsqrt.f32 %v5411_v4  ;;  %v5410_v9 = vmul.f32 0.0078125, %v5408_v24 }
0x218e   : > { %v5412_v29 = vadd.f32 1e-05, %v5410_v9 }
0x2190   : > { %9116 = vrsqrt.f32 %v5412_v29 }
0x2199   : > { %v9115_v62 = vpop.eup %9114 }
0x219a   : > { %v5415_v31 = vmul.f32 %v9115_v62, %v10972_v42  ;;  %v8862_v42 = vld [vmem:[%s11345_s3 + $0x170] sm:$0xff]  }
0x219c   : > { %v5423_v33 = vmul.f32 %v7512_v32, %v5415_v31 }
0x219d   : > { %v9117_v1 = vpop.eup %9116 }
0x219e   : > { %v5416_v35 = vmul.f32 %v9117_v1, %v10977_v53  ;;  %v5431_v26 = vadd.f32 %v7513_v23, %v5423_v33  ;;  %v8866_v53 = vld [vmem:[%s11345_s3 + $0x168] sm:$0xff]  }
0x21a0   : > { %v5424_v20 = vmul.f32 %v7512_v32, %v5416_v35 }
0x21a2   : > { %v5432_v38 = vadd.f32 %v7513_v23, %v5424_v20 }
0x21a4   : > { %v5433_v39 = vpack.c.bf16 %v5432_v38, %v5431_v26 }
0x21a6   : > { %5683 = vmatmul.mubr.bf16.vlgmr.msra.gmra.mxu1 %v5433_v39  ;;  %5726 = vmatmul.mubr.bf16.vlgmr.msra.gmra.mxu0 %v5433_v39 }
0x21a7   : > { %7963 = vmatpush3.bf16.msra.mxu1 %v8860_v22  ;;  %7985 = vmatpush3.bf16.msra.mxu0 %v8861_v25 }
0x21a8   : > { %7964 = vmatprep.subr.bf16.mxu1 %v8862_v42  ;;  %7986 = vmatprep.subr.bf16.mxu0 %v8863_v48 }
0x21ab   : > { %7965 = vmatpush3.bf16.msra.mxu1 %v8864_v49  ;;  %7987 = vmatpush3.bf16.msra.mxu0 %v8865_v51 }
0x21ac   : > { %7966 = vmatprep.subr.bf16.mxu1 %v8866_v53  ;;  %7988 = vmatprep.subr.bf16.mxu0 %v8867_v54 }
0x21af   : > { %7967 = vmatpush3.bf16.msra.mxu1 %v8868_v55  ;;  %7989 = vmatpush3.bf16.msra.mxu0 %v8869_v58 }
0x21b0   : > { %7968 = vmatprep.subr.bf16.mxu1 %v8870_v59  ;;  %7990 = vmatprep.subr.bf16.mxu0 %v8871_v61 }
0x21b3   : > { %7969 = vmatpush3.bf16.msra.mxu1 %v8872_v6  ;;  %7991 = vmatpush3.bf16.msra.mxu0 %v8873_v17 }
0x21b4   : > { %7970 = vmatprep.subr.bf16.mxu1 %v8874_v7  ;;  %7992 = vmatprep.subr.bf16.mxu0 %v8875_v8 }
0x21b7   : > { %7971 = vmatpush3.bf16.msra.mxu1 %v8876_v10  ;;  %7993 = vmatpush3.bf16.msra.mxu0 %v8877_v28 }
0x21b8   : > { %7972 = vmatprep.subr.bf16.mxu1 %v8878_v30  ;;  %7994 = vmatprep.subr.bf16.mxu0 %v8879_v19 }
0x21bb   : > { %7973 = vmatpush3.bf16.msra.mxu1 %v8880_v46  ;;  %7995 = vmatpush3.bf16.msra.mxu0 %v8881_v27 }
0x21bc   : > { %7974 = vmatprep.subr.bf16.mxu1 %v8882_v12  ;;  %7996 = vmatprep.subr.bf16.mxu0 %v8883_v21 }
0x21bf   : > { %7975 = vmatpush3.bf16.msra.mxu1 %v8884_v43  ;;  %7997 = vmatpush3.bf16.msra.mxu0 %v8885_v44 }
0x21c0   : > { %7976 = vmatprep.subr.bf16.mxu1 %v8886_v11  ;;  %7998 = vmatprep.subr.bf16.mxu0 %v8887_v13 }
0x21c3   : > { %7977 = vmatpush3.bf16.msra.mxu1 %v8888_v37  ;;  %7999 = vmatpush3.bf16.msra.mxu0 %v8889_v16 }
0x21c4   : > { %8307 = vmatprep.subr.bf16.mxu0 %v9834_v63  ;;  %6343 = vmatprep.subr.bf16.mxu1 %v8892_v45 }
0x2266   : > { %v5684_v57 = vpop.f32.mrf.mxu1  ;;  %v5727_v60 = vpop.f32.mrf.mxu0 }
0x2267   : > { %v11052_v4 = vadd.f32 %v5684_v57, %v5473_v50  ;;  %v11054_v24 = vadd.f32 %v5727_v60, %v5481_v52 }
0x2268   : > { %v5686_v9 = vpop.f32.mrf.mxu1  ;;  %v5729_v29 = vpop.f32.mrf.mxu0 }
0x2269   : > { %v5736_v62 = vmul.f32 %v11052_v4, %v11052_v4  ;;  %v5738_v31 = vmul.f32 %v11054_v24, %v11054_v24  ;;  %v11060_v32 = vadd.f32 %v5686_v9, %v5477_v18  ;;  %v11062_v1 = vadd.f32 %v5729_v29, %v5485_v56 }
0x226a   : > { %v5688_v2 = vpop.f32.mrf.mxu1  ;;  %v5731_v15 = vpop.f32.mrf.mxu0 }
0x226b   : > { %v5744_v35 = vmul.f32 %v5736_v62, %v11052_v4  ;;  %v5746_v33 = vmul.f32 %v5738_v31, %v11054_v24  ;;  %v5737_v23 = vmul.f32 %v11060_v32, %v11060_v32  ;;  %v5739_v20 = vmul.f32 %v11062_v1, %v11062_v1 }
0x226c   : > { %v11070_v26 = vadd.f32 %v5688_v2, %v5473_v50  ;;  %v11072_v38 = vadd.f32 %v5731_v15, %v5481_v52  ;;  %v5690_v39 = vpop.f32.mrf.mxu1  ;;  %v5733_v40 = vpop.f32.mrf.mxu0 }
0x226d   : > { %v5752_v41 = vmul.f32 0.044715, %v5744_v35  ;;  %v5754_v22 = vmul.f32 0.044715, %v5746_v33  ;;  %v5745_v25 = vmul.f32 %v5737_v23, %v11060_v32  ;;  %v5747_v42 = vmul.f32 %v5739_v20, %v11062_v1 }
0x226e   : > { %v5740_v48 = vmul.f32 %v11070_v26, %v11070_v26  ;;  %v5742_v49 = vmul.f32 %v11072_v38, %v11072_v38  ;;  %v11080_v51 = vadd.f32 %v5690_v39, %v5477_v18  ;;  %v11082_v53 = vadd.f32 %v5733_v40, %v5485_v56 }
0x226f   : > { %v5760_v54 = vadd.f32 %v5752_v41, %v11052_v4  ;;  %v5762_v55 = vadd.f32 %v5754_v22, %v11054_v24  ;;  %v5753_v58 = vmul.f32 0.044715, %v5745_v25  ;;  %v5755_v59 = vmul.f32 0.044715, %v5747_v42 }
0x2270   : > { %v5748_v61 = vmul.f32 %v5740_v48, %v11070_v26  ;;  %v5750_v6 = vmul.f32 %v5742_v49, %v11072_v38  ;;  %v5741_v17 = vmul.f32 %v11080_v51, %v11080_v51  ;;  %v5743_v7 = vmul.f32 %v11082_v53, %v11082_v53 }
0x2271   : > { %v5768_v8 = vmul.f32 0.7978846, %v5760_v54  ;;  %v5770_v10 = vmul.f32 0.7978846, %v5762_v55  ;;  %v5761_v28 = vadd.f32 %v5753_v58, %v11060_v32  ;;  %v5763_v30 = vadd.f32 %v5755_v59, %v11062_v1 }
0x2272   : > { %v5756_v19 = vmul.f32 0.044715, %v5748_v61  ;;  %v5758_v46 = vmul.f32 0.044715, %v5750_v6  ;;  %v5749_v27 = vmul.f32 %v5741_v17, %v11080_v51  ;;  %v5751_v12 = vmul.f32 %v5743_v7, %v11082_v53 }
0x2273   : > { %9118 = vtanh.f32 %v5768_v8  ;;  %v5769_v21 = vmul.f32 0.7978846, %v5761_v28  ;;  %v5771_v43 = vmul.f32 0.7978846, %v5763_v30 }
0x2274   : > { %9120 = vtanh.f32 %v5770_v10  ;;  %v5764_v44 = vadd.f32 %v5756_v19, %v11070_v26  ;;  %v5766_v11 = vadd.f32 %v5758_v46, %v11072_v38  ;;  %v5757_v13 = vmul.f32 0.044715, %v5749_v27  ;;  %v8890_v19 = vld [vmem:[#allocation31 + $0xa8] ss:$12 sps:$4 sm:$0xff]  }
0x2275   : > { %9122 = vtanh.f32 %v5769_v21  ;;  %v5759_v37 = vmul.f32 0.044715, %v5751_v12  ;;  %v8896_v12 = vld [vmem:[#allocation31 + $0x94] ss:$12 sps:$4 sm:$0xff]  }
0x2276   : > { %9124 = vtanh.f32 %v5771_v43  ;;  %v5772_v16 = vmul.f32 0.7978846, %v5764_v44  ;;  %v5774_v45 = vmul.f32 0.7978846, %v5766_v11  ;;  %v5765_v47 = vadd.f32 %v5757_v13, %v11080_v51  ;;  %v8902_v21 = vld [vmem:[#allocation31 + $0x60] ss:$12 sps:$4 sm:$0xff]  }
0x2277   : > { %v5767_v50 = vadd.f32 %v5759_v37, %v11082_v53  ;;  %v8905_v43 = vld [vmem:[#allocation31 + $0x68] ss:$12 sps:$4 sm:$0xff]   ;;  %v8908_v44 = vld [vmem:[#allocation31 + $0x4c] ss:$12 sps:$4 sm:$0xff]   ;;  %v8909_v13 = vld [vmem:[#allocation31 + $0x50] ss:$12 sps:$4 sm:$0xff]  }
0x2278   : > { %9126 = vtanh.f32 %v5772_v16  ;;  %v5773_v52 = vmul.f32 0.7978846, %v5765_v47  ;;  %v8906_v11 = vld [vmem:[#allocation31 + $0x48] ss:$12 sps:$4 sm:$0xff]   ;;  %v8910_v16 = vld [vmem:[#allocation31 + $0x30] ss:$12 sps:$4 sm:$0xff]  }
0x2279   : > { %9128 = vtanh.f32 %v5774_v45  ;;  %v5775_v18 = vmul.f32 0.7978846, %v5767_v50  ;;  %v8912_v37 = vld [vmem:[#allocation31 + $0x34] ss:$12 sps:$4 sm:$0xff]   ;;  %v8913_v45 = vld [vmem:[#allocation31 + $0x38] ss:$12 sps:$4 sm:$0xff]  }
0x227a   : > { %9130 = vtanh.f32 %v5773_v52  ;;  %v8916_v47 = vld [vmem:[#allocation31 + $0x1c] ss:$12 sps:$4 sm:$0xff]   ;;  %v8914_v50 = vld [vmem:[#allocation31 + $0x18] ss:$12 sps:$4 sm:$0xff]   ;;  %v8917_v52 = vld [vmem:[#allocation31 + $0x20] ss:$12 sps:$4 sm:$0xff]  }
0x227b   : > { %9132 = vtanh.f32 %v5775_v18  ;;  %v8920_v18 = vld [vmem:[#allocation31 + $0x4] ss:$12 sps:$4 sm:$0xff]  }
0x2280   : > { %v9119_v56 = vpop.eup %9118 }
0x2281   : > { %v9121_v57 = vpop.eup %9120  ;;  %v5784_v31 = vadd.f32 1.0, %v9119_v56  ;;  %v8918_v56 = vld [vmem:[#allocation31] ss:$12 sps:$4 sm:$0xff]  }
0x2282   : > { %v9123_v60 = vpop.eup %9122  ;;  %v5786_v35 = vadd.f32 1.0, %v9121_v57  ;;  %v8921_v57 = vld [vmem:[#allocation31 + $0x8] ss:$12 sps:$4 sm:$0xff]  }
0x2283   : > { %v9125_v9 = vpop.eup %9124  ;;  %v5785_v29 = vadd.f32 1.0, %v9123_v60  ;;  %v5792_v25 = vmul.f32 0.5, %v5784_v31  ;;  %v8924_v60 = vld [vmem:[#allocation33 + $0x74] ss:$8 sps:$4 sm:$0xff]  }
0x2284   : > { %v5787_v2 = vadd.f32 1.0, %v9125_v9  ;;  %v5794_v54 = vmul.f32 0.5, %v5786_v35 }
0x2285   : > { %v9127_v62 = vpop.eup %9126  ;;  %v5793_v22 = vmul.f32 0.5, %v5785_v29  ;;  %v5800_v7 = vmul.f32 %v5792_v25, %v11052_v4  ;;  %v8897_v4 = vld [vmem:[#allocation31 + $0x98] ss:$12 sps:$4 sm:$0xff]  }
0x2286   : > { %v9129_v15 = vpop.eup %9128  ;;  %v5788_v33 = vadd.f32 1.0, %v9127_v62  ;;  %v5795_v49 = vmul.f32 0.5, %v5787_v2  ;;  %v5802_v28 = vmul.f32 %v5794_v54, %v11054_v24  ;;  %v8898_v24 = vld [vmem:[#allocation31 + $0x78] ss:$12 sps:$4 sm:$0xff]  }
0x2287   : > { %v9131_v23 = vpop.eup %9130  ;;  %v5790_v20 = vadd.f32 1.0, %v9129_v15  ;;  %v5801_v6 = vmul.f32 %v5793_v22, %v11060_v32  ;;  %v8894_v32 = vld [vmem:[#allocation31 + $0x90] ss:$12 sps:$4 sm:$0xff]  }
0x2288   : > { %v9133_v39 = vpop.eup %9132  ;;  %v5796_v40 = vmul.f32 0.5, %v5788_v33  ;;  %v5789_v41 = vadd.f32 1.0, %v9131_v23  ;;  %v5803_v8 = vmul.f32 %v5795_v49, %v11062_v1  ;;  %v8900_v1 = vld [vmem:[#allocation31 + $0x7c] ss:$12 sps:$4 sm:$0xff]   ;;  %v8922_v54 = vld [vmem:[#allocation33 + $0x70] ss:$8 sps:$4 sm:$0xff]  }
0x2289   : > { %v5798_v42 = vmul.f32 0.5, %v5790_v20  ;;  %v5791_v48 = vadd.f32 1.0, %v9133_v39 }
0x228a   : > { %v5797_v55 = vmul.f32 0.5, %v5789_v41  ;;  %v5804_v58 = vmul.f32 %v5796_v40, %v11070_v26  ;;  %v8893_v26 = vld [vmem:[#allocation31 + $0xb0] ss:$12 sps:$4 sm:$0xff]  }
0x228b   : > { %v5799_v59 = vmul.f32 0.5, %v5791_v48  ;;  %v5806_v61 = vmul.f32 %v5798_v42, %v11072_v38 }
0x228c   : > { %v5805_v17 = vmul.f32 %v5797_v55, %v11080_v51  ;;  %v5808_v27 = vpack.c.bf16 %v5804_v58, %v5800_v7  ;;  %v8901_v51 = vld [vmem:[#allocation31 + $0x80] ss:$12 sps:$4 sm:$0xff]   ;;  %v8934_v7 = vld [vmem:[#allocation33 + $0x30] ss:$8 sps:$4 sm:$0xff]  }
0x228d   : > { %v5807_v10 = vmul.f32 %v5799_v59, %v11082_v53  ;;  %v5810_v38 = vpack.c.bf16 %v5806_v61, %v5802_v28  ;;  %v8904_v53 = vld [vmem:[#allocation31 + $0x64] ss:$12 sps:$4 sm:$0xff]   ;;  %v8930_v59 = vld [vmem:[#allocation33 + $0x54] ss:$8 sps:$4 sm:$0xff]  }
0x228e   : > { %v5809_v30 = vpack.c.bf16 %v5805_v17, %v5801_v6  ;;  %v8927_v58 = vld [vmem:[#allocation33 + $0x64] ss:$8 sps:$4 sm:$0xff]   ;;  %v8928_v61 = vld [vmem:[#allocation33 + $0x50] ss:$8 sps:$4 sm:$0xff]   ;;  %v8931_v17 = vld [vmem:[#allocation33 + $0x40] ss:$8 sps:$4 sm:$0xff]  }
0x228f   : > { %v5811_v46 = vpack.c.bf16 %v5807_v10, %v5803_v8  ;;  %v8933_v6 = vld [vmem:[#allocation33 + $0x44] ss:$8 sps:$4 sm:$0xff]   ;;  %v8937_v10 = vld [vmem:[#allocation33 + $0x20] ss:$8 sps:$4 sm:$0xff]   ;;  %v8942_v28 = vld [vmem:[#allocation33 + $0x14] ss:$8 sps:$4 sm:$0xff]  }
0x2290   : > { %6101 = vmatprep.mubr.bf16.mxu1 %v5809_v30  ;;  %v8939_v8 = vld [vmem:[#allocation33 + $0x24] ss:$8 sps:$4 sm:$0xff]  }
0x2291   : > { %6142 = vmatprep.mubr.bf16.mxu0 %v5811_v46  ;;  %6102 = vmatmul.mubr.bf16.vlgmr.msra.gmra.mxu1 %v5808_v27  ;;  %v8945_v30 = vld [vmem:[#allocation33 + $0x4] ss:$8 sps:$4 sm:$0xff]   ;;  %v8948_v46 = vld [vmem:[#allocation33 + $0x174] ss:$8 sps:$4 sm:$0xff]   ;;  %v8946_v27 = vld [vmem:[#allocation33 + $0x170] ss:$8 sps:$4 sm:$0xff]  }
0x2292   : > { %6143 = vmatmul.mubr.bf16.vlgmr.msra.gmra.mxu0 %v5810_v38  ;;  %6344 = vmatpush1.bf16.msra.mxu1 %v8890_v19  ;;  %v8943_v19 = vld [vmem:[#allocation33] ss:$8 sps:$4 sm:$0xff]   ;;  %v8954_v38 = vld [vmem:[#allocation33 + $0x164] ss:$8 sps:$4 sm:$0xff]  }
0x2293   : > { %8308 = vmatpush3.bf16.msra.mxu0 %v8893_v26  ;;  %6345 = vmatprep.subr.bf16.mxu1 %v8896_v12  ;;  %v8951_v26 = vld [vmem:[#allocation33 + $0xf4] ss:$8 sps:$4 sm:$0xff]   ;;  %v8949_v12 = vld [vmem:[#allocation33 + $0xf0] ss:$8 sps:$4 sm:$0xff]  }
0x2294   : > { %8309 = vmatprep.subr.bf16.mxu0 %v9834_v63  ;;  %6375 = vmatprep.mubr.bf16.mxu1 %v9833_v0 }
0x2295   : > { %8323 = vmatprep.mubr.msk.bf16.mxu0 %vm9835_vm2, %v9834_v63 }
0x2296   : > { %6346 = vmatpush1.bf16.msra.mxu1 %v8894_v32  ;;  %v8952_v32 = vld [vmem:[#allocation33 + $0x160] ss:$8 sps:$4 sm:$0xff]  }
0x2297   : > { %8310 = vmatpush3.bf16.msra.mxu0 %v8897_v4  ;;  %6347 = vmatprep.subr.bf16.mxu1 %v8900_v1  ;;  %v8957_v4 = vld [vmem:[#allocation33 + $0xe4] ss:$8 sps:$4 sm:$0xff]   ;;  %v8955_v1 = vld [vmem:[#allocation33 + $0xe0] ss:$8 sps:$4 sm:$0xff]  }
0x2298   : > { %8311 = vmatprep.subr.bf16.mxu0 %v9834_v63 }
0x229a   : > { %6348 = vmatpush1.bf16.msra.mxu1 %v8898_v24  ;;  %v8960_v24 = vld [vmem:[#allocation33 + $0x154] ss:$8 sps:$4 sm:$0xff]  }
0x229b   : > { %8312 = vmatpush3.bf16.msra.mxu0 %v8901_v51  ;;  %6349 = vmatprep.subr.bf16.mxu1 %v8904_v53  ;;  %v8958_v51 = vld [vmem:[#allocation33 + $0x150] ss:$8 sps:$4 sm:$0xff]   ;;  %v8963_v53 = vld [vmem:[#allocation33 + $0xd4] ss:$8 sps:$4 sm:$0xff]  }
0x229c   : > { %8313 = vmatprep.subr.bf16.mxu0 %v9834_v63 }
0x229e   : > { %6350 = vmatpush1.bf16.msra.mxu1 %v8902_v21  ;;  %v8961_v21 = vld [vmem:[#allocation33 + $0xd0] ss:$8 sps:$4 sm:$0xff]  }
0x229f   : > { %8314 = vmatpush3.bf16.msra.mxu0 %v8905_v43  ;;  %6351 = vmatprep.subr.bf16.mxu1 %v8908_v44  ;;  %v8966_v43 = vld [vmem:[#allocation33 + $0x144] ss:$8 sps:$4 sm:$0xff]   ;;  %v8964_v44 = vld [vmem:[#allocation33 + $0x140] ss:$8 sps:$4 sm:$0xff]  }
0x22a0   : > { %8315 = vmatprep.subr.bf16.mxu0 %v9834_v63 }
0x22a2   : > { %6352 = vmatpush1.bf16.msra.mxu1 %v8906_v11  ;;  %v8969_v11 = vld [vmem:[#allocation33 + $0xc4] ss:$8 sps:$4 sm:$0xff]  }
0x22a3   : > { %8316 = vmatpush3.bf16.msra.mxu0 %v8909_v13  ;;  %6353 = vmatprep.subr.bf16.mxu1 %v8912_v37  ;;  %v8967_v13 = vld [vmem:[#allocation33 + $0xc0] ss:$8 sps:$4 sm:$0xff]   ;;  %v8972_v37 = vld [vmem:[#allocation33 + $0x134] ss:$8 sps:$4 sm:$0xff]  }
0x22a4   : > { %8317 = vmatprep.subr.bf16.mxu0 %v9834_v63 }
0x22a6   : > { %6354 = vmatpush1.bf16.msra.mxu1 %v8910_v16  ;;  %v8970_v16 = vld [vmem:[#allocation33 + $0x130] ss:$8 sps:$4 sm:$0xff]  }
0x22a7   : > { %8318 = vmatpush3.bf16.msra.mxu0 %v8913_v45  ;;  %6355 = vmatprep.subr.bf16.mxu1 %v8916_v47  ;;  %v8975_v45 = vld [vmem:[#allocation33 + $0xb4] ss:$8 sps:$4 sm:$0xff]   ;;  %v8973_v47 = vld [vmem:[#allocation33 + $0xb0] ss:$8 sps:$4 sm:$0xff]  }
0x22a8   : > { %8319 = vmatprep.subr.bf16.mxu0 %v9834_v63 }
0x22aa   : > { %6356 = vmatpush1.bf16.msra.mxu1 %v8914_v50  ;;  %v8978_v50 = vld [vmem:[#allocation33 + $0x124] ss:$8 sps:$4 sm:$0xff]  }
0x22ab   : > { %8320 = vmatpush3.bf16.msra.mxu0 %v8917_v52  ;;  %6357 = vmatprep.subr.bf16.mxu1 %v8920_v18  ;;  %v8976_v52 = vld [vmem:[#allocation33 + $0x120] ss:$8 sps:$4 sm:$0xff]   ;;  %v8981_v18 = vld [vmem:[#allocation33 + $0xa4] ss:$8 sps:$4 sm:$0xff]  }
0x22ac   : > { %8321 = vmatprep.subr.bf16.mxu0 %v9834_v63  ;;  %v7676_v63 = vld [vmem:[%s11347_s1 + $0x1] ss:$0 sm:$0xff]  ;;  %s7758_s1 = sshll.u32 %s10082_s18, 8 }
0x22ad   : > { %s11156_s3 = scalar_lea.hbm %s10054_s28, %s7758_s1 }
0x22ae   : > { %6358 = vmatpush1.bf16.msra.mxu1 %v8918_v56  ;;  %v8979_v56 = vld [vmem:[#allocation33 + $0xa0] ss:$8 sps:$4 sm:$0xff]  }
0x22af   : > { %8322 = vmatpush3.bf16.msra.mxu0 %v8921_v57  ;;  %6784 = vmatprep.subr.bf16.mxu1 %v8924_v60  ;;  %v8984_v57 = vld [vmem:[#allocation33 + $0x114] ss:$8 sps:$4 sm:$0xff]   ;;  %v8982_v60 = vld [vmem:[#allocation33 + $0x110] ss:$8 sps:$4 sm:$0xff]  }
0x22b0   : > { %6827 = vmatprep.subr.bf16.mxu0 %v8948_v46 }
0x2351   : > { %v7978_v9 = vpop.f32.mrf.mxu1 }
0x2352   : > { %v8000_v29 = vpop.f32.mrf.mxu0 }
0x2353   : > { %v7979_v62 = vpop.f32.mrf.mxu1 }
0x2354   : > { %v7980_v31 = vadd.f32 %v7979_v62, %v7978_v9  ;;  %v8001_v2 = vpop.f32.mrf.mxu0  ;;  %v8987_v9 = vld [vmem:[#allocation33 + $0x94] ss:$8 sps:$4 sm:$0xff]   ;;  %v8990_v62 = vld [vmem:[#allocation33 + $0x104] ss:$8 sps:$4 sm:$0xff]  }
0x2355   : > { %v8002_v15 = vadd.f32 %v8001_v2, %v8000_v29  ;;  %v7981_v35 = vpop.f32.mrf.mxu1  ;;  %v8985_v29 = vld [vmem:[#allocation33 + $0x90] ss:$8 sps:$4 sm:$0xff]   ;;  %v8991_v2 = vld [vmem:[#allocation33 + $0x80] ss:$8 sps:$4 sm:$0xff]  }
0x2356   : > { %v8003_v33 = vpop.f32.mrf.mxu0 }
0x2357   : > { %v6145_v23 = vadd.f32 %v8002_v15, %v7980_v31  ;;  %v7982_v20 = vpop.f32.mrf.mxu1  ;;  %v8988_v31 = vld [vmem:[#allocation33 + $0x100] ss:$8 sps:$4 sm:$0xff]   ;;  %v8993_v15 = vld [vmem:[#allocation33 + $0x84] ss:$8 sps:$4 sm:$0xff]  }
0x2358   : > { %v7983_v39 = vadd.f32 %v7982_v20, %v7981_v35  ;;  %v8004_v40 = vpop.f32.mrf.mxu0  ;;  %v6198_v35 = vld [vmem:[%s11354_s5] sm:$0x7]  ;;  %s6893_s5 = sshll.u32 %s11122_s12, 4  ;;  %s11158_s5 = int_to_ptr.vmem [resolvable:$true] %s6893_s5 }
0x2359   : > { %v6151_v41 = vadd.f32 %v6145_v23, %v10960_v34  ;;  %v8005_v22 = vadd.f32 %v8004_v40, %v8003_v33  ;;  %v8925_v34 = vld [vmem:[#allocation33 + $0x60] ss:$8 sps:$4 sm:$0xff]   ;;  %v6203_v33 = vrot.slane %v6198_v35, %v10399_v3  ;;  %v6211_v23 = vrot.slane %v6198_v35, %v10722_v14  ;;  %s9660_s8 = scalar_lea.vmem %s11158_s5, 256  ;;  %p9667_p6 = scmp.lt.s32.totalorder %s11158_s5, %s9665_s13 }
0x235a   : > { %v6207_v20 = vrot.slane %v6198_v35, %v10402_v5  ;;  %p9661_p10 = scmp.ne.s32.totalorder %s11158_s5, %s9660_s8  ;;  %p9668_p1 = scmp.lt.s32.totalorder %s9666_s14, %s9660_s8 }
0x235b   : > { %v6161_v25 = vadd.f32 %v7676_v63, %v6151_v41  ;;  %v6148_v42 = vadd.f32 %v8005_v22, %v7983_v39 }
0x235c   : > { %p9662_p13 = pnand %p9661_p10, %p11355_p7  ;;  %p9669_p9 = por %p9668_p1, %p9667_p6 }
0x235d   : > { %6163 = vst [vmem:[%s11122_s12] sm:$0xff] %v6161_v25  ;;  %v6152_v48 = vadd.f32 %v6148_v42, %v10964_v36  ;;  %v8936_v36 = vld [vmem:[#allocation33 + $0x34] ss:$8 sps:$4 sm:$0xff]  }
0x235e   : > { %p9663_p5 = pneg %p9662_p13 }
0x235f   : > { %v6162_v49 = vadd.f32 %v7676_v63, %v6152_v48 }
0x2360   : > { %p9670_p12 = pnand %p9669_p9, %p9663_p5 }
0x2361   : > { %6164 = vst [vmem:[%s11122_s12 + $0x8] sm:$0xff] %v6162_v49  ;;  %v6165_v55 = vpack.c.bf16 %v6162_v49, %v6161_v25 }
0x2363   : > { %6376 = vmatmul.mubr.bf16.vlgmr.msra.gmra.mxu1 %v6165_v55  ;;  %8324 = vmatmul.mubr.bf16.vlgmr.msra.gmra.mxu0 %v6165_v55 }
0x2364   : > { %6785 = vmatpush1.bf16.msra.mxu1 %v8922_v54  ;;  %6859 = vmatprep.mubr.bf16.mxu0 %v9833_v0  ;;  %v8940_v0 = vld [vmem:[#allocation33 + $0x10] ss:$8 sps:$4 sm:$0xff]  }
0x2365   : > { %6786 = vmatprep.subr.bf16.mxu1 %v8927_v58  ;;  %6828 = vmatpush1.bf16.msra.mxu0 %v8946_v27 }
0x2366   : > { %6829 = vmatprep.subr.bf16.mxu0 %v8954_v38 }
0x2368   : > { %6787 = vmatpush1.bf16.msra.mxu1 %v8925_v34 }
0x2369   : > { %6788 = vmatprep.subr.bf16.mxu1 %v8930_v59  ;;  %6830 = vmatpush1.bf16.msra.mxu0 %v8952_v32 }
0x236a   : > { %6831 = vmatprep.subr.bf16.mxu0 %v8960_v24 }
0x236c   : > { %6789 = vmatpush1.bf16.msra.mxu1 %v8928_v61 }
0x236d   : > { %6790 = vmatprep.subr.bf16.mxu1 %v8933_v6  ;;  %6832 = vmatpush1.bf16.msra.mxu0 %v8958_v51 }
0x236e   : > { %6833 = vmatprep.subr.bf16.mxu0 %v8966_v43 }
0x2370   : > { %6791 = vmatpush1.bf16.msra.mxu1 %v8931_v17 }
0x2371   : > { %6792 = vmatprep.subr.bf16.mxu1 %v8936_v36  ;;  %6834 = vmatpush1.bf16.msra.mxu0 %v8964_v44 }
0x2372   : > { %6835 = vmatprep.subr.bf16.mxu0 %v8972_v37 }
0x2374   : > { %6793 = vmatpush1.bf16.msra.mxu1 %v8934_v7 }
0x2375   : > { %6794 = vmatprep.subr.bf16.mxu1 %v8939_v8  ;;  %6836 = vmatpush1.bf16.msra.mxu0 %v8970_v16 }
0x2376   : > { %6837 = vmatprep.subr.bf16.mxu0 %v8978_v50 }
0x2378   : > { %6795 = vmatpush1.bf16.msra.mxu1 %v8937_v10 }
0x2379   : > { %6796 = vmatprep.subr.bf16.mxu1 %v8942_v28  ;;  %6838 = vmatpush1.bf16.msra.mxu0 %v8976_v52 }
0x237a   : > { %6839 = vmatprep.subr.bf16.mxu0 %v8984_v57 }
0x237c   : > { %6797 = vmatpush1.bf16.msra.mxu1 %v8940_v0 }
0x237d   : > { %6798 = vmatprep.subr.bf16.mxu1 %v8945_v30  ;;  %6840 = vmatpush1.bf16.msra.mxu0 %v8982_v60 }
0x237e   : > { %6841 = vmatprep.subr.bf16.mxu0 %v8990_v62 }
0x2380   : > { %6799 = vmatpush1.bf16.msra.mxu1 %v8943_v19 }
0x2381   : > { %6800 = vmatprep.subr.bf16.mxu1 %v8951_v26  ;;  %6842 = vmatpush1.bf16.msra.mxu0 %v8988_v31 }
0x2384   : > { %6801 = vmatpush2.bf16.msra.mxu1 %v8949_v12 }
0x2385   : > { %6802 = vmatprep.subr.bf16.mxu1 %v8957_v4 }
0x2388   : > { %6803 = vmatpush2.bf16.msra.mxu1 %v8955_v1 }
0x2389   : > { %6804 = vmatprep.subr.bf16.mxu1 %v8963_v53 }
0x238c   : > { %6805 = vmatpush2.bf16.msra.mxu1 %v8961_v21 }
0x238d   : > { %6806 = vmatprep.subr.bf16.mxu1 %v8969_v11 }
0x2390   : > { %6807 = vmatpush2.bf16.msra.mxu1 %v8967_v13 }
0x2391   : > { %6808 = vmatprep.subr.bf16.mxu1 %v8975_v45 }
0x2394   : > { %6809 = vmatpush2.bf16.msra.mxu1 %v8973_v47 }
0x2395   : > { %6810 = vmatprep.subr.bf16.mxu1 %v8981_v18 }
0x2398   : > { %6811 = vmatpush2.bf16.msra.mxu1 %v8979_v56 }
0x2399   : > { %6812 = vmatprep.subr.bf16.mxu1 %v8987_v9 }
0x239c   : > { %6813 = vmatpush2.bf16.msra.mxu1 %v8985_v29 }
0x239d   : > { %6814 = vmatprep.subr.bf16.mxu1 %v8993_v15 }
0x23a0   : > { %6815 = vmatpush2.bf16.msra.mxu1 %v8991_v2 }
0x2423   : > { %v6377_v63 = vpop.f32.mrf.mxu1  ;;  %v6420_v39 = vpop.f32.mrf.mxu0 }
0x2424   : > { %v11132_v40 = vadd.f32 %v6377_v63, %v6203_v33  ;;  %v11134_v41 = vadd.f32 %v6420_v39, %v6211_v23 }
0x2425   : > { %v6379_v22 = vpop.f32.mrf.mxu1  ;;  %v8325_v25 = vpop.f32.mrf.mxu0 }
0x2426   : > { %v6427_v42 = vmul.f32 %v11132_v40, %v11132_v40  ;;  %v6429_v48 = vmul.f32 %v11134_v41, %v11134_v41  ;;  %v11140_v49 = vadd.f32 %v6379_v22, %v6207_v20 }
0x2427   : > { %v6381_v54 = vpop.f32.mrf.mxu1  ;;  %v6423_v14 = vpop.f32.mrf.mxu0 }
0x2428   : > { %v6433_v55 = vmul.f32 %v6427_v42, %v11132_v40  ;;  %v6435_v58 = vmul.f32 %v6429_v48, %v11134_v41  ;;  %v6428_v34 = vmul.f32 %v11140_v49, %v11140_v49  ;;  %v6382_v59 = vadd.f32 %v6381_v54, %v6203_v33 }
0x2429   : > { %v6424_v61 = vadd.f32 %v6423_v14, %v6211_v23  ;;  %v6383_v6 = vpop.f32.mrf.mxu1  ;;  %v8326_v17 = vpop.f32.mrf.mxu0 }
0x242a   : > { %v6439_v36 = vmul.f32 0.044715, %v6433_v55  ;;  %v6441_v7 = vmul.f32 0.044715, %v6435_v58  ;;  %v6434_v8 = vmul.f32 %v6428_v34, %v11140_v49  ;;  %v6430_v10 = vmul.f32 %v6382_v59, %v6382_v59 }
0x242b   : > { %v6432_v28 = vmul.f32 %v6424_v61, %v6424_v61  ;;  %v6384_v0 = vadd.f32 %v6383_v6, %v6207_v20 }
0x242c   : > { %v6445_v30 = vadd.f32 %v6439_v36, %v11132_v40  ;;  %v6447_v19 = vadd.f32 %v6441_v7, %v11134_v41  ;;  %v6440_v46 = vmul.f32 0.044715, %v6434_v8  ;;  %v6436_v27 = vmul.f32 %v6430_v10, %v6382_v59 }
0x242d   : > { %v6438_v26 = vmul.f32 %v6432_v28, %v6424_v61  ;;  %v6431_v12 = vmul.f32 %v6384_v0, %v6384_v0 }
0x242e   : > { %v6451_v38 = vmul.f32 0.7978846, %v6445_v30  ;;  %v6453_v32 = vmul.f32 0.7978846, %v6447_v19  ;;  %v6446_v4 = vadd.f32 %v6440_v46, %v11140_v49  ;;  %v6442_v1 = vmul.f32 0.044715, %v6436_v27 }
0x242f   : > { %v6444_v24 = vmul.f32 0.044715, %v6438_v26  ;;  %v6437_v51 = vmul.f32 %v6431_v12, %v6384_v0 }
0x2430   : > { %9134 = vtanh.f32 %v6451_v38  ;;  %v6452_v53 = vmul.f32 0.7978846, %v6446_v4  ;;  %v6448_v21 = vadd.f32 %v6442_v1, %v6382_v59 }
0x2431   : > { %9136 = vtanh.f32 %v6453_v32  ;;  %v6450_v43 = vadd.f32 %v6444_v24, %v6424_v61  ;;  %v6443_v44 = vmul.f32 0.044715, %v6437_v51 }
0x2432   : > { %9138 = vtanh.f32 %v6452_v53  ;;  %v6454_v11 = vmul.f32 0.7978846, %v6448_v21 }
0x2433   : > { %v6456_v13 = vmul.f32 0.7978846, %v6450_v43  ;;  %v6449_v37 = vadd.f32 %v6443_v44, %v6384_v0 }
0x2434   : > { %9140 = vtanh.f32 %v6454_v11 }
0x2435   : > { %9142 = vtanh.f32 %v6456_v13  ;;  %v6455_v16 = vmul.f32 0.7978846, %v6449_v37 }
0x2437   : > { %9144 = vtanh.f32 %v6455_v16 }
0x243d   : > { %v9135_v45 = vpop.eup %9134 }
0x243e   : > { %v9137_v47 = vpop.eup %9136  ;;  %v6463_v60 = vadd.f32 1.0, %v9135_v45 }
0x243f   : > { %v9139_v50 = vpop.eup %9138  ;;  %v6465_v52 = vadd.f32 1.0, %v9137_v47 }
0x2440   : > { %v6464_v56 = vadd.f32 1.0, %v9139_v50  ;;  %v6469_v23 = vmul.f32 0.5, %v6463_v60 }
0x2441   : > { %v9141_v18 = vpop.eup %9140  ;;  %v6471_v29 = vmul.f32 0.5, %v6465_v52 }
0x2442   : > { %v9143_v57 = vpop.eup %9142  ;;  %v6466_v9 = vadd.f32 1.0, %v9141_v18  ;;  %v6470_v33 = vmul.f32 0.5, %v6464_v56  ;;  %v6475_v54 = vmul.f32 %v6469_v23, %v11132_v40 }
0x2443   : > { %v6468_v62 = vadd.f32 1.0, %v9143_v57  ;;  %v6477_v20 = vmul.f32 %v6471_v29, %v11134_v41 }
0x2444   : > { %v9145_v31 = vpop.eup %9144  ;;  %v6472_v2 = vmul.f32 0.5, %v6466_v9  ;;  %v6476_v42 = vmul.f32 %v6470_v33, %v11140_v49 }
0x2445   : > { %v6474_v15 = vmul.f32 0.5, %v6468_v62  ;;  %v6467_v35 = vadd.f32 1.0, %v9145_v31 }
0x2446   : > { %v6478_v22 = vmul.f32 %v6472_v2, %v6382_v59 }
0x2447   : > { %v6480_v63 = vmul.f32 %v6474_v15, %v6424_v61  ;;  %v6473_v39 = vmul.f32 0.5, %v6467_v35 }
0x2448   : > { %v6481_v55 = vpack.c.bf16 %v6478_v22, %v6475_v54 }
0x2449   : > { %v6483_v25 = vpack.c.bf16 %v6480_v63, %v6477_v20  ;;  %v6479_v48 = vmul.f32 %v6473_v39, %v6384_v0 }
0x244b   : > { %6860 = vmatmul.mubr.bf16.vlgmr.msra.gmra.mxu0 %v6483_v25  ;;  %v6482_v14 = vpack.c.bf16 %v6479_v48, %v6476_v42 }
0x244d   : > { %6816 = vmatprep.mubr.bf16.mxu1 %v6482_v14 }
0x244e   : > { %6817 = vmatmul.mubr.bf16.vlgmr.msra.gmra.mxu1 %v6481_v55 }
0x244f   : > { %9673 = shalt.err (!%p9670_p12)
}
0x2450   : > { %s9674_s18 = scalar_lea.hbm %s11156_s3, 256  ;;  %s9678_s1 = scalar_lea.hbm %s10054_s28, 512 }
0x2451   : > { %p9675_p11 = scmp.ne.s32.totalorder %s11156_s3, %s9674_s18  ;;  %p9679_p2 = scmp.lt.s32.totalorder %s11156_s3, %s10054_s28 }
0x2452   : > { %p9680_p3 = scmp.lt.s32.totalorder %s9678_s1, %s9674_s18 }
0x2453   : > { %p9676_p8 = pnand %p9675_p11, %p11355_p7 }
0x2454   : > { %p9681_p4 = por %p9680_p3, %p9679_p2 }
0x2455   : > { %p9677_p0 = pneg %p9676_p8 }
0x2457   : > { %p9682_p10 = pnand %p9681_p4, %p9677_p0 }
0x2459   : > { %9685 = shalt.err (!%p9682_p10)
}
0x245a   : > { %s9843_s8 = smov 128   ;;  %s11356_s13 = sld [smem:[#allocation80_spill]]  ;;  %v6532_v40 = vld [vmem:[%s10048_s23] sm:$0x3] }
0x245b   : > { %s9844_s14 = smov 8   ;;  %v6537_v49 = vrot.slane %v6532_v40, %v10399_v3  ;;  %s7757_s9 = sshll.u32 %s10365_s16, 5  ;;  %v6541_v58 = vrot.slane %v6532_v40, %v10402_v5 }
0x245c   : > { %8401 = dma.vmem_to_hbm [thread:$0]  (%p11355_p7), %s11158_s5, 256, %s11156_s3, %s6875_s6, %s9843_s8, %s9843_s8, %s9844_s14  }
0x2460   : > { %s1542_s12 = scalar_lea.vmem %s11356_s13, %s7757_s9 }
0x250b   : > { %v6861_v41 = vpop.f32.mrf.mxu0 }
0x250d   : > { %v6863_v34 = vpop.f32.mrf.mxu0 }
0x250e   : > { %v6818_v59 = vpop.f32.mrf.mxu1 }
0x250f   : > { %v6819_v61 = vadd.f32 %v6818_v59, %v6537_v49  ;;  %v6865_v7 = vpop.f32.mrf.mxu0 }
0x2510   : > { %v6820_v6 = vpop.f32.mrf.mxu1 }
0x2511   : > { %v6862_v17 = vadd.f32 %v6861_v41, %v6819_v61  ;;  %v6821_v36 = vadd.f32 %v6820_v6, %v6541_v58  ;;  %v6867_v3 = vpop.f32.mrf.mxu0 }
0x2512   : > { %v6822_v8 = vpop.f32.mrf.mxu1 }
0x2513   : > { %6870 = vst [vmem:[%s1542_s12] sm:$0xff] %v6862_v17  ;;  %v6864_v10 = vadd.f32 %v6863_v34, %v6821_v36  ;;  %v6823_v28 = vadd.f32 %v6822_v8, %v6537_v49 }
0x2514   : > { %v6824_v0 = vpop.f32.mrf.mxu1 }
0x2515   : > { %6871 = vst [vmem:[%s1542_s12 + $0x8] sm:$0xff] %v6864_v10  ;;  %v6866_v30 = vadd.f32 %v6865_v7, %v6823_v28  ;;  %v6825_v19 = vadd.f32 %v6824_v0, %v6541_v58 }
0x2517   : > { %6872 = vst [vmem:[%s1542_s12 + $0x10] sm:$0xff] %v6866_v30  ;;  %v6868_v46 = vadd.f32 %v6867_v3, %v6825_v19 }
0x2519   : > { %6873 = vst [vmem:[%s1542_s12 + $0x18] sm:$0xff] %v6868_v46 }
0x251a PF: > { %s6911_s2 = sand.u32 1, %s9750_s0   ;;  %p11357_p7 = scmp.ne.s32.totalorder %s11309_s19, 0 }
0x251b   : > { %p11358_p13 = scmp.ge.s32.totalorder %s9762_s11, 2  ;;  %s6912_s21 = scalar_lea.sflag [#allocation6], %s6911_s2 }
0x251d   : > { %p8463_p5 = pnand %p11358_p13, %p11357_p7 }
0x251f   : > { %p8464_p6 = pneg %p8463_p5 }
0x2521   : > { %9745 = dma.done.wait (%p8464_p6), %s6912_s21, 256  }
0x2522   : > { %9747 = vsyncadd (%p8464_p6), %s6912_s21, 4294967040  ;;  %p112_p1 = scmp.ge.s32.totalorder %s10245_s4, 4   ;;  %s11359_s0 = smov %s9754_s20 }
0x2523   : > { %s11360_s20 = smov %s9758_s10  ;;  %s11361_s10 = smov %s10256_s7 }
0x2524   : > { %s11362_s11 = smov %s10245_s4  ;;  %114 = sbr.rel (!%p112_p1) target bundleno = 100 (0x64), region = 368 }
0x2529   :  { %6925 = vsyncpa [#allocation5], 1 }
0x252a   :  { %6927 = vsyncpa [#allocation5 + $0x1], 1 }
0x252b   :  { %6928 = vsyncpa [#allocation8], 1 }
0x252c   :  { %6929 = vsyncpa [#allocation11], 1 }
0x252d   :  { %6930 = vsyncpa [#allocation14], 1 }
0x252e   :  { %6931 = vsyncpa [#allocation17], 1 }
0x252f   :  { %6932 = vsyncpa [#allocation20], 1 }
0x2530   :  { %6933 = vsyncpa [#allocation23], 1 }
0x2531   :  { %6934 = vsyncpa [#allocation26], 1 }
0x2532   :  { %6935 = vsyncpa [#allocation29], 1 }
0x2533   :  { %6936 = vsyncpa [#allocation32], 1 }
0x2534   :  { %6937 = vsyncpa [#allocation6], 1 }
0x2535   :  { %6939 = vsyncpa [#allocation6 + $0x1], 1 }

</bundles_post_ra>
